<compile_context>
chip_gen: v5e
topology: v5e:2x2
jax: 0.10.0
libtpu: 0.0.40
codegen_flags: <defaults>
</compile_context>

<pallas_src>
import math
import functools

import jax
import jax.numpy as jnp
from jax.experimental import pallas as pl
from jax.experimental.pallas import tpu as pltpu


def _full_attention_kernel(x_ref, wqkv_ref, bqkv_ref, wproj_ref, bproj_ref,
                           y_ref, att_ref, qkv_scr, y_scr, *, n_head):
    # x_ref    : (1, T, C)  fp32 input slab for this batch element
    # wqkv_ref : (C, 3C)    bf16 fused [scale*Wq^T | Wk^T | Wv^T]
    # bqkv_ref : (1, 3C)    fp32 fused [scale*bq | bk | bv]
    # wproj_ref: (C, C)     bf16 Wproj^T
    # bproj_ref: (1, C)     fp32
    # y_ref    : (1, T, C)  output
    # att_ref  : (1, T, T)  head-averaged attention probs (fp32)
    # qkv_scr  : (T, 3C)    bf16 VMEM scratch holding the fused QKV projection
    # y_scr    : (T, C)     fp32 VMEM scratch accumulating per-head outputs
    T = x_ref.shape[1]
    C = x_ref.shape[2]
    hd = C // n_head

    # ---- Fused QKV projection: one bf16 MXU matmul, fp32 accumulation. ----
    x_bf16 = x_ref[0].astype(jnp.bfloat16)                             # (T, C)
    qkv = jnp.dot(x_bf16, wqkv_ref[...],
                  preferred_element_type=jnp.float32) + bqkv_ref[...]  # (T, 3C) f32
    # Park in VMEM as bf16 (MXU operand form for the per-head matmuls); keeps
    # register pressure flat across the head loop.
    qkv_scr[...] = qkv.astype(jnp.bfloat16)

    inv_nh = jnp.float32(1.0 / n_head)

    # ---- Per-head attention (n_head is a small static constant). ----
    for h in range(n_head):
        lo = h * hd
        qh = qkv_scr[:, 0 * C + lo:0 * C + lo + hd]                    # (T, hd) bf16
        kh = qkv_scr[:, 1 * C + lo:1 * C + lo + hd]                    # (T, hd) bf16
        vh = qkv_scr[:, 2 * C + lo:2 * C + lo + hd]                    # (T, hd) bf16

        # scores = (scale*q) @ k^T  (scale baked into wqkv; rhs contraction on dim 1)
        s = jax.lax.dot_general(
            qh, kh, (((1,), (1,)), ((), ())),
            preferred_element_type=jnp.float32)                        # (T, T) f32

        # Numerically stable softmax along the lane axis; elementwise math in f32,
        # reciprocal on the EUP.
        s = s - jnp.max(s, axis=-1, keepdims=True)
        e = jnp.exp(s)
        p = e * pl.reciprocal(jnp.sum(e, axis=-1, keepdims=True), approx=True)

        # Accumulate head-averaged attention directly in the output VMEM block.
        if h == 0:
            att_ref[0] = p
        else:
            att_ref[0] = att_ref[0] + p

        # P @ V in bf16; write this head's 32-lane slab straight into scratch.
        y_scr[:, lo:lo + hd] = jnp.dot(p.astype(jnp.bfloat16), vh,
                                       preferred_element_type=jnp.float32)

    att_ref[0] = att_ref[0] * inv_nh

    # ---- Output projection (bf16 MXU, fp32 accumulation + bias). ----
    y = jnp.dot(y_scr[...].astype(jnp.bfloat16), wproj_ref[...],
                preferred_element_type=jnp.float32) + bproj_ref[...]
    y_ref[0] = y.astype(y_ref.dtype)


def prepare_full_attention_params(wq, bq, wk, bk, wv, bv, wproj, bproj, *, n_head):
    """One-time weight prep (do NOT call per forward): nn.Linear computes
    x @ W^T + b, so stack transposed Q/K/V weights into (C, 3C), fold the
    1/sqrt(head_dim) softmax scale into the Q third, and cast MXU operands
    to bf16."""
    C = wq.shape[0]
    hd = C // n_head
    scale = jnp.float32(1.0 / math.sqrt(hd))
    wqkv = jnp.concatenate([wq.T * scale, wk.T, wv.T], axis=1)         # (C, 3C)
    bqkv = jnp.concatenate([bq * scale, bk, bv]).reshape(1, 3 * C)     # (1, 3C)
    return dict(
        wqkv=wqkv.astype(jnp.bfloat16),
        bqkv=bqkv.astype(jnp.float32),
        wproj_t=wproj.T.astype(jnp.bfloat16),                          # (C, C)
        bproj=bproj.reshape(1, C).astype(jnp.float32),                 # (1, C)
    )


def full_attention(x, params, *, n_head):
    """x: (B, T, C) fp32; params from prepare_full_attention_params.
    Returns (y, att_mean): y (B, T, C), att_mean (B, T, T)."""
    B, T, C = x.shape
    assert C % n_head == 0

    kernel = functools.partial(_full_attention_kernel, n_head=n_head)

    # Constant-index weight/bias blocks: single-buffered (they stay resident).
    resident = dict(pipeline_mode=pl.Buffered(1))

    y, att = pl.pallas_call(
        kernel,
        out_shape=(jax.ShapeDtypeStruct((B, T, C), x.dtype),
                   jax.ShapeDtypeStruct((B, T, T), jnp.float32)),
        grid_spec=pltpu.PrefetchScalarGridSpec(
            num_scalar_prefetch=0,
            grid=(B,),
            in_specs=[
                pl.BlockSpec((1, T, C), lambda b: (b, 0, 0)),              # x slab
                pl.BlockSpec((C, 3 * C), lambda b: (0, 0), **resident),    # fused QKV W
                pl.BlockSpec((1, 3 * C), lambda b: (0, 0), **resident),    # fused QKV b
                pl.BlockSpec((C, C), lambda b: (0, 0), **resident),        # proj W
                pl.BlockSpec((1, C), lambda b: (0, 0), **resident),        # proj b
            ],
            out_specs=[
                pl.BlockSpec((1, T, C), lambda b: (b, 0, 0)),              # y
                pl.BlockSpec((1, T, T), lambda b: (b, 0, 0)),              # att mean
            ],
            scratch_shapes=[
                pltpu.VMEM((T, 3 * C), jnp.bfloat16),                      # qkv scratch
                pltpu.VMEM((T, C), jnp.float32),                           # y scratch
            ],
        ),
        compiler_params=pltpu.CompilerParams(
            dimension_semantics=("parallel",)),
    )(x, params["wqkv"], params["bqkv"], params["wproj_t"], params["bproj"])
    return y, att


def _reference(x, wq, bq, wk, bk, wv, bv, wproj, bproj, n_head):
    """Pure-JAX fp32 reference mirroring the PyTorch forward (eval mode)."""
    B, T, C = x.shape
    hd = C // n_head

    def lin(z, w, b):
        return z @ w.T + b

    q = lin(x, wq, bq).reshape(B, T, n_head, hd).transpose(0, 2, 1, 3)
    k = lin(x, wk, bk).reshape(B, T, n_head, hd).transpose(0, 2, 1, 3)
    v = lin(x, wv, bv).reshape(B, T, n_head, hd).transpose(0, 2, 1, 3)
    att = jnp.einsum('bhtd,bhsd->bhts', q, k) * (1.0 / math.sqrt(hd))
    att = jax.nn.softmax(att, axis=-1)
    y = jnp.einsum('bhts,bhsd->bhtd', att, v)
    y = y.transpose(0, 2, 1, 3).reshape(B, T, C)
    y = y @ wproj.T + bproj
    return y, att.mean(axis=1)


if __name__ == "__main__":
    # Lane-dense small shapes: T, C multiples of 128 so every store is an
    # unmasked vst and all blocks satisfy the (8, 128) constraint.
    B, T, C, n_head = 2, 128, 128, 4

    key = jax.random.PRNGKey(0)
    ks = jax.random.split(key, 9)
    x = jax.random.normal(ks[0], (B, T, C), dtype=jnp.float32)

    bound = 1.0 / math.sqrt(C)

    def u(k, shape):
        return jax.random.uniform(k, shape, jnp.float32, -bound, bound)

    wq, bq = u(ks[1], (C, C)), u(ks[2], (C,))
    wk, bk = u(ks[3], (C, C)), u(ks[4], (C,))
    wv, bv = u(ks[5], (C, C)), u(ks[6], (C,))
    wp, bp = u(ks[7], (C, C)), u(ks[8], (C,))

    params = prepare_full_attention_params(wq, bq, wk, bk, wv, bv, wp, bp,
                                           n_head=n_head)
    y, att = full_attention(x, params, n_head=n_head)
    y, att = jax.block_until_ready((y, att))

    y_ref, att_ref = _reference(x, wq, bq, wk, bk, wv, bv, wp, bp, n_head)
    assert y.shape == (B, T, C) and att.shape == (B, T, T)
    # bf16 MXU operands + approx reciprocal vs. the fp32 XLA reference:
    # loose-but-meaningful tolerance.
    assert jnp.allclose(y, y_ref, atol=2e-2, rtol=2e-2), "y mismatch vs reference"
    assert jnp.allclose(att, att_ref, atol=2e-2, rtol=2e-2), "att mismatch vs reference"

    print("KERNEL_OK")
</pallas_src>

<mosaic_0001>
module attributes {stable_mosaic.version = 11 : i64} {
  func.func @_full_attention_kernel(%arg0: i32, %arg1: memref<1x128x128xf32, #tpu.memory_space<vmem>>, %arg2: memref<128x384xbf16, #tpu.memory_space<vmem>>, %arg3: memref<1x384xf32, #tpu.memory_space<vmem>>, %arg4: memref<128x128xbf16, #tpu.memory_space<vmem>>, %arg5: memref<1x128xf32, #tpu.memory_space<vmem>>, %arg6: memref<1x128x128xf32, #tpu.memory_space<vmem>>, %arg7: memref<1x128x128xf32, #tpu.memory_space<vmem>>, %arg8: memref<128x384xbf16, #tpu.memory_space<vmem>>, %arg9: memref<128x128xf32, #tpu.memory_space<vmem>>) attributes {dimension_semantics = [#tpu.dimension_semantics<parallel>], iteration_bounds = array<i64: 2>, scalar_prefetch = 0 : i64, scratch_operands = 2 : i64, tpu.core_type = #tpu.core_type<tc>, window_params = [{transform_indices = @transform_0, window_bounds = array<i64: 1, 128, 128>}, {pipeline_mode = #tpu.pipeline_mode<synchronous>, transform_indices = @transform_1, window_bounds = array<i64: 128, 384>}, {pipeline_mode = #tpu.pipeline_mode<synchronous>, transform_indices = @transform_2, window_bounds = array<i64: 1, 384>}, {pipeline_mode = #tpu.pipeline_mode<synchronous>, transform_indices = @transform_3, window_bounds = array<i64: 128, 128>}, {pipeline_mode = #tpu.pipeline_mode<synchronous>, transform_indices = @transform_4, window_bounds = array<i64: 1, 128>}, {transform_indices = @transform_5, window_bounds = array<i64: 1, 128, 128>}, {transform_indices = @transform_6, window_bounds = array<i64: 1, 128, 128>}]} {
    %c0 = arith.constant 0 : index
    %c0_0 = arith.constant 0 : index
    %c0_1 = arith.constant 0 : index
    %0 = vector.load %arg1[%c0, %c0_0, %c0_1] : memref<1x128x128xf32, #tpu.memory_space<vmem>>, vector<1x128x128xf32>
    %1 = vector.shape_cast %0 : vector<1x128x128xf32> to vector<128x128xf32>
    %2 = arith.truncf %1 : vector<128x128xf32> to vector<128x128xbf16>
    %c0_2 = arith.constant 0 : index
    %c0_3 = arith.constant 0 : index
    %3 = vector.load %arg2[%c0_2, %c0_3] : memref<128x384xbf16, #tpu.memory_space<vmem>>, vector<128x384xbf16>
    %cst = arith.constant dense<0.000000e+00> : vector<128x384xf32>
    %4 = tpu.matmul %2, %3, %cst {dimension_numbers = #tpu.dot_dimension_numbers<[1], [0], [0], [1], [0, 0, 1, 1], [], []>} : vector<128x128xbf16>, vector<128x384xbf16>, vector<128x384xf32> -> vector<128x384xf32>
    %c0_4 = arith.constant 0 : index
    %c0_5 = arith.constant 0 : index
    %5 = vector.load %arg3[%c0_4, %c0_5] : memref<1x384xf32, #tpu.memory_space<vmem>>, vector<1x384xf32>
    %6 = vector.broadcast %5 : vector<1x384xf32> to vector<128x384xf32>
    %7 = arith.addf %4, %6 : vector<128x384xf32>
    %8 = arith.truncf %7 : vector<128x384xf32> to vector<128x384xbf16>
    %c0_6 = arith.constant 0 : index
    %c0_7 = arith.constant 0 : index
    %9 = vector.load %arg8[%c0_6, %c0_7] : memref<128x384xbf16, #tpu.memory_space<vmem>>, vector<128x384xbf16>
    tpu.vector_store %arg8[%c0_6, %c0_7], %8 {strides = array<i32>} : memref<128x384xbf16, #tpu.memory_space<vmem>>, vector<128x384xbf16>,
    %c0_8 = arith.constant 0 : index
    %c0_9 = arith.constant 0 : index
    %10 = vector.load %arg8[%c0_8, %c0_9] : memref<128x384xbf16, #tpu.memory_space<vmem>>, vector<128x32xbf16>
    %c0_10 = arith.constant 0 : index
    %c128 = arith.constant 128 : index
    %11 = vector.load %arg8[%c0_10, %c128] : memref<128x384xbf16, #tpu.memory_space<vmem>>, vector<128x32xbf16>
    %c0_11 = arith.constant 0 : index
    %c256 = arith.constant 256 : index
    %12 = vector.load %arg8[%c0_11, %c256] : memref<128x384xbf16, #tpu.memory_space<vmem>>, vector<128x32xbf16>
    %cst_12 = arith.constant dense<0.000000e+00> : vector<128x128xf32>
    %13 = tpu.matmul %10, %11, %cst_12 {dimension_numbers = #tpu.dot_dimension_numbers<[1], [1], [0], [0], [0, 0, 1, 0], [], []>} : vector<128x32xbf16>, vector<128x32xbf16>, vector<128x128xf32> -> vector<128x128xf32>
    %cst_13 = arith.constant dense<0xFF800000> : vector<128xf32>
    %14 = vector.multi_reduction <maximumf>, %13, %cst_13 [1] : vector<128x128xf32> to vector<128xf32>
    %15 = vector.shape_cast %14 : vector<128xf32> to vector<128x1xf32>
    %16 = vector.broadcast %15 : vector<128x1xf32> to vector<128x128xf32>
    %17 = arith.subf %13, %16 : vector<128x128xf32>
    %18 = math.exp %17 : vector<128x128xf32>
    %cst_14 = arith.constant dense<0.000000e+00> : vector<128xf32>
    %19 = vector.multi_reduction <add>, %18, %cst_14 [1] : vector<128x128xf32> to vector<128xf32>
    %20 = vector.shape_cast %19 : vector<128xf32> to vector<128x1xf32>
    %21 = tpu.reciprocal %20 {approx = true} : vector<128x1xf32> -> vector<128x1xf32>
    %22 = vector.broadcast %21 : vector<128x1xf32> to vector<128x128xf32>
    %23 = arith.mulf %18, %22 : vector<128x128xf32>
    %c0_15 = arith.constant 0 : index
    %c0_16 = arith.constant 0 : index
    %c0_17 = arith.constant 0 : index
    %24 = vector.load %arg7[%c0_15, %c0_16, %c0_17] : memref<1x128x128xf32, #tpu.memory_space<vmem>>, vector<1x128x128xf32>
    %25 = vector.shape_cast %24 : vector<1x128x128xf32> to vector<128x128xf32>
    %26 = vector.shape_cast %23 : vector<128x128xf32> to vector<1x128x128xf32>
    tpu.vector_store %arg7[%c0_15, %c0_16, %c0_17], %26 {strides = array<i32>} : memref<1x128x128xf32, #tpu.memory_space<vmem>>, vector<1x128x128xf32>,
    %27 = arith.truncf %23 : vector<128x128xf32> to vector<128x128xbf16>
    %cst_18 = arith.constant dense<0.000000e+00> : vector<128x32xf32>
    %28 = tpu.matmul %27, %12, %cst_18 {dimension_numbers = #tpu.dot_dimension_numbers<[1], [0], [0], [1], [0, 0, 1, 1], [], []>} : vector<128x128xbf16>, vector<128x32xbf16>, vector<128x32xf32> -> vector<128x32xf32>
    %c0_19 = arith.constant 0 : index
    %c0_20 = arith.constant 0 : index
    %29 = vector.load %arg9[%c0_19, %c0_20] : memref<128x128xf32, #tpu.memory_space<vmem>>, vector<128x32xf32>
    tpu.vector_store %arg9[%c0_19, %c0_20], %28 {strides = array<i32>} : memref<128x128xf32, #tpu.memory_space<vmem>>, vector<128x32xf32>,
    %c0_21 = arith.constant 0 : index
    %c32 = arith.constant 32 : index
    %30 = vector.load %arg8[%c0_21, %c32] : memref<128x384xbf16, #tpu.memory_space<vmem>>, vector<128x32xbf16>
    %c0_22 = arith.constant 0 : index
    %c160 = arith.constant 160 : index
    %31 = vector.load %arg8[%c0_22, %c160] : memref<128x384xbf16, #tpu.memory_space<vmem>>, vector<128x32xbf16>
    %c0_23 = arith.constant 0 : index
    %c288 = arith.constant 288 : index
    %32 = vector.load %arg8[%c0_23, %c288] : memref<128x384xbf16, #tpu.memory_space<vmem>>, vector<128x32xbf16>
    %cst_24 = arith.constant dense<0.000000e+00> : vector<128x128xf32>
    %33 = tpu.matmul %30, %31, %cst_24 {dimension_numbers = #tpu.dot_dimension_numbers<[1], [1], [0], [0], [0, 0, 1, 0], [], []>} : vector<128x32xbf16>, vector<128x32xbf16>, vector<128x128xf32> -> vector<128x128xf32>
    %cst_25 = arith.constant dense<0xFF800000> : vector<128xf32>
    %34 = vector.multi_reduction <maximumf>, %33, %cst_25 [1] : vector<128x128xf32> to vector<128xf32>
    %35 = vector.shape_cast %34 : vector<128xf32> to vector<128x1xf32>
    %36 = vector.broadcast %35 : vector<128x1xf32> to vector<128x128xf32>
    %37 = arith.subf %33, %36 : vector<128x128xf32>
    %38 = math.exp %37 : vector<128x128xf32>
    %cst_26 = arith.constant dense<0.000000e+00> : vector<128xf32>
    %39 = vector.multi_reduction <add>, %38, %cst_26 [1] : vector<128x128xf32> to vector<128xf32>
    %40 = vector.shape_cast %39 : vector<128xf32> to vector<128x1xf32>
    %41 = tpu.reciprocal %40 {approx = true} : vector<128x1xf32> -> vector<128x1xf32>
    %42 = vector.broadcast %41 : vector<128x1xf32> to vector<128x128xf32>
    %43 = arith.mulf %38, %42 : vector<128x128xf32>
    %c0_27 = arith.constant 0 : index
    %c0_28 = arith.constant 0 : index
    %c0_29 = arith.constant 0 : index
    %44 = vector.load %arg7[%c0_27, %c0_28, %c0_29] : memref<1x128x128xf32, #tpu.memory_space<vmem>>, vector<1x128x128xf32>
    %45 = vector.shape_cast %44 : vector<1x128x128xf32> to vector<128x128xf32>
    %46 = arith.addf %45, %43 : vector<128x128xf32>
    %c0_30 = arith.constant 0 : index
    %c0_31 = arith.constant 0 : index
    %c0_32 = arith.constant 0 : index
    %47 = vector.load %arg7[%c0_30, %c0_31, %c0_32] : memref<1x128x128xf32, #tpu.memory_space<vmem>>, vector<1x128x128xf32>
    %48 = vector.shape_cast %47 : vector<1x128x128xf32> to vector<128x128xf32>
    %49 = vector.shape_cast %46 : vector<128x128xf32> to vector<1x128x128xf32>
    tpu.vector_store %arg7[%c0_30, %c0_31, %c0_32], %49 {strides = array<i32>} : memref<1x128x128xf32, #tpu.memory_space<vmem>>, vector<1x128x128xf32>,
    %50 = arith.truncf %43 : vector<128x128xf32> to vector<128x128xbf16>
    %cst_33 = arith.constant dense<0.000000e+00> : vector<128x32xf32>
    %51 = tpu.matmul %50, %32, %cst_33 {dimension_numbers = #tpu.dot_dimension_numbers<[1], [0], [0], [1], [0, 0, 1, 1], [], []>} : vector<128x128xbf16>, vector<128x32xbf16>, vector<128x32xf32> -> vector<128x32xf32>
    %c0_34 = arith.constant 0 : index
    %c32_35 = arith.constant 32 : index
    %52 = vector.load %arg9[%c0_34, %c32_35] : memref<128x128xf32, #tpu.memory_space<vmem>>, vector<128x32xf32>
    tpu.vector_store %arg9[%c0_34, %c32_35], %51 {strides = array<i32>} : memref<128x128xf32, #tpu.memory_space<vmem>>, vector<128x32xf32>,
    %c0_36 = arith.constant 0 : index
    %c64 = arith.constant 64 : index
    %53 = vector.load %arg8[%c0_36, %c64] : memref<128x384xbf16, #tpu.memory_space<vmem>>, vector<128x32xbf16>
    %c0_37 = arith.constant 0 : index
    %c192 = arith.constant 192 : index
    %54 = vector.load %arg8[%c0_37, %c192] : memref<128x384xbf16, #tpu.memory_space<vmem>>, vector<128x32xbf16>
    %c0_38 = arith.constant 0 : index
    %c320 = arith.constant 320 : index
    %55 = vector.load %arg8[%c0_38, %c320] : memref<128x384xbf16, #tpu.memory_space<vmem>>, vector<128x32xbf16>
    %cst_39 = arith.constant dense<0.000000e+00> : vector<128x128xf32>
    %56 = tpu.matmul %53, %54, %cst_39 {dimension_numbers = #tpu.dot_dimension_numbers<[1], [1], [0], [0], [0, 0, 1, 0], [], []>} : vector<128x32xbf16>, vector<128x32xbf16>, vector<128x128xf32> -> vector<128x128xf32>
    %cst_40 = arith.constant dense<0xFF800000> : vector<128xf32>
    %57 = vector.multi_reduction <maximumf>, %56, %cst_40 [1] : vector<128x128xf32> to vector<128xf32>
    %58 = vector.shape_cast %57 : vector<128xf32> to vector<128x1xf32>
    %59 = vector.broadcast %58 : vector<128x1xf32> to vector<128x128xf32>
    %60 = arith.subf %56, %59 : vector<128x128xf32>
    %61 = math.exp %60 : vector<128x128xf32>
    %cst_41 = arith.constant dense<0.000000e+00> : vector<128xf32>
    %62 = vector.multi_reduction <add>, %61, %cst_41 [1] : vector<128x128xf32> to vector<128xf32>
    %63 = vector.shape_cast %62 : vector<128xf32> to vector<128x1xf32>
    %64 = tpu.reciprocal %63 {approx = true} : vector<128x1xf32> -> vector<128x1xf32>
    %65 = vector.broadcast %64 : vector<128x1xf32> to vector<128x128xf32>
    %66 = arith.mulf %61, %65 : vector<128x128xf32>
    %c0_42 = arith.constant 0 : index
    %c0_43 = arith.constant 0 : index
    %c0_44 = arith.constant 0 : index
    %67 = vector.load %arg7[%c0_42, %c0_43, %c0_44] : memref<1x128x128xf32, #tpu.memory_space<vmem>>, vector<1x128x128xf32>
    %68 = vector.shape_cast %67 : vector<1x128x128xf32> to vector<128x128xf32>
    %69 = arith.addf %68, %66 : vector<128x128xf32>
    %c0_45 = arith.constant 0 : index
    %c0_46 = arith.constant 0 : index
    %c0_47 = arith.constant 0 : index
    %70 = vector.load %arg7[%c0_45, %c0_46, %c0_47] : memref<1x128x128xf32, #tpu.memory_space<vmem>>, vector<1x128x128xf32>
    %71 = vector.shape_cast %70 : vector<1x128x128xf32> to vector<128x128xf32>
    %72 = vector.shape_cast %69 : vector<128x128xf32> to vector<1x128x128xf32>
    tpu.vector_store %arg7[%c0_45, %c0_46, %c0_47], %72 {strides = array<i32>} : memref<1x128x128xf32, #tpu.memory_space<vmem>>, vector<1x128x128xf32>,
    %73 = arith.truncf %66 : vector<128x128xf32> to vector<128x128xbf16>
    %cst_48 = arith.constant dense<0.000000e+00> : vector<128x32xf32>
    %74 = tpu.matmul %73, %55, %cst_48 {dimension_numbers = #tpu.dot_dimension_numbers<[1], [0], [0], [1], [0, 0, 1, 1], [], []>} : vector<128x128xbf16>, vector<128x32xbf16>, vector<128x32xf32> -> vector<128x32xf32>
    %c0_49 = arith.constant 0 : index
    %c64_50 = arith.constant 64 : index
    %75 = vector.load %arg9[%c0_49, %c64_50] : memref<128x128xf32, #tpu.memory_space<vmem>>, vector<128x32xf32>
    tpu.vector_store %arg9[%c0_49, %c64_50], %74 {strides = array<i32>} : memref<128x128xf32, #tpu.memory_space<vmem>>, vector<128x32xf32>,
    %c0_51 = arith.constant 0 : index
    %c96 = arith.constant 96 : index
    %76 = vector.load %arg8[%c0_51, %c96] : memref<128x384xbf16, #tpu.memory_space<vmem>>, vector<128x32xbf16>
    %c0_52 = arith.constant 0 : index
    %c224 = arith.constant 224 : index
    %77 = vector.load %arg8[%c0_52, %c224] : memref<128x384xbf16, #tpu.memory_space<vmem>>, vector<128x32xbf16>
    %c0_53 = arith.constant 0 : index
    %c352 = arith.constant 352 : index
    %78 = vector.load %arg8[%c0_53, %c352] : memref<128x384xbf16, #tpu.memory_space<vmem>>, vector<128x32xbf16>
    %cst_54 = arith.constant dense<0.000000e+00> : vector<128x128xf32>
    %79 = tpu.matmul %76, %77, %cst_54 {dimension_numbers = #tpu.dot_dimension_numbers<[1], [1], [0], [0], [0, 0, 1, 0], [], []>} : vector<128x32xbf16>, vector<128x32xbf16>, vector<128x128xf32> -> vector<128x128xf32>
    %cst_55 = arith.constant dense<0xFF800000> : vector<128xf32>
    %80 = vector.multi_reduction <maximumf>, %79, %cst_55 [1] : vector<128x128xf32> to vector<128xf32>
    %81 = vector.shape_cast %80 : vector<128xf32> to vector<128x1xf32>
    %82 = vector.broadcast %81 : vector<128x1xf32> to vector<128x128xf32>
    %83 = arith.subf %79, %82 : vector<128x128xf32>
    %84 = math.exp %83 : vector<128x128xf32>
    %cst_56 = arith.constant dense<0.000000e+00> : vector<128xf32>
    %85 = vector.multi_reduction <add>, %84, %cst_56 [1] : vector<128x128xf32> to vector<128xf32>
    %86 = vector.shape_cast %85 : vector<128xf32> to vector<128x1xf32>
    %87 = tpu.reciprocal %86 {approx = true} : vector<128x1xf32> -> vector<128x1xf32>
    %88 = vector.broadcast %87 : vector<128x1xf32> to vector<128x128xf32>
    %89 = arith.mulf %84, %88 : vector<128x128xf32>
    %c0_57 = arith.constant 0 : index
    %c0_58 = arith.constant 0 : index
    %c0_59 = arith.constant 0 : index
    %90 = vector.load %arg7[%c0_57, %c0_58, %c0_59] : memref<1x128x128xf32, #tpu.memory_space<vmem>>, vector<1x128x128xf32>
    %91 = vector.shape_cast %90 : vector<1x128x128xf32> to vector<128x128xf32>
    %92 = arith.addf %91, %89 : vector<128x128xf32>
    %c0_60 = arith.constant 0 : index
    %c0_61 = arith.constant 0 : index
    %c0_62 = arith.constant 0 : index
    %93 = vector.load %arg7[%c0_60, %c0_61, %c0_62] : memref<1x128x128xf32, #tpu.memory_space<vmem>>, vector<1x128x128xf32>
    %94 = vector.shape_cast %93 : vector<1x128x128xf32> to vector<128x128xf32>
    %95 = vector.shape_cast %92 : vector<128x128xf32> to vector<1x128x128xf32>
    tpu.vector_store %arg7[%c0_60, %c0_61, %c0_62], %95 {strides = array<i32>} : memref<1x128x128xf32, #tpu.memory_space<vmem>>, vector<1x128x128xf32>,
    %96 = arith.truncf %89 : vector<128x128xf32> to vector<128x128xbf16>
    %cst_63 = arith.constant dense<0.000000e+00> : vector<128x32xf32>
    %97 = tpu.matmul %96, %78, %cst_63 {dimension_numbers = #tpu.dot_dimension_numbers<[1], [0], [0], [1], [0, 0, 1, 1], [], []>} : vector<128x128xbf16>, vector<128x32xbf16>, vector<128x32xf32> -> vector<128x32xf32>
    %c0_64 = arith.constant 0 : index
    %c96_65 = arith.constant 96 : index
    %98 = vector.load %arg9[%c0_64, %c96_65] : memref<128x128xf32, #tpu.memory_space<vmem>>, vector<128x32xf32>
    tpu.vector_store %arg9[%c0_64, %c96_65], %97 {strides = array<i32>} : memref<128x128xf32, #tpu.memory_space<vmem>>, vector<128x32xf32>,
    %c0_66 = arith.constant 0 : index
    %c0_67 = arith.constant 0 : index
    %c0_68 = arith.constant 0 : index
    %99 = vector.load %arg7[%c0_66, %c0_67, %c0_68] : memref<1x128x128xf32, #tpu.memory_space<vmem>>, vector<1x128x128xf32>
    %100 = vector.shape_cast %99 : vector<1x128x128xf32> to vector<128x128xf32>
    %cst_69 = arith.constant 2.500000e-01 : f32
    %101 = vector.broadcast %cst_69 : f32 to vector<128x128xf32>
    %102 = arith.mulf %100, %101 : vector<128x128xf32>
    %c0_70 = arith.constant 0 : index
    %c0_71 = arith.constant 0 : index
    %c0_72 = arith.constant 0 : index
    %103 = vector.load %arg7[%c0_70, %c0_71, %c0_72] : memref<1x128x128xf32, #tpu.memory_space<vmem>>, vector<1x128x128xf32>
    %104 = vector.shape_cast %103 : vector<1x128x128xf32> to vector<128x128xf32>
    %105 = vector.shape_cast %102 : vector<128x128xf32> to vector<1x128x128xf32>
    tpu.vector_store %arg7[%c0_70, %c0_71, %c0_72], %105 {strides = array<i32>} : memref<1x128x128xf32, #tpu.memory_space<vmem>>, vector<1x128x128xf32>,
    %c0_73 = arith.constant 0 : index
    %c0_74 = arith.constant 0 : index
    %106 = vector.load %arg9[%c0_73, %c0_74] : memref<128x128xf32, #tpu.memory_space<vmem>>, vector<128x128xf32>
    %107 = arith.truncf %106 : vector<128x128xf32> to vector<128x128xbf16>
    %c0_75 = arith.constant 0 : index
    %c0_76 = arith.constant 0 : index
    %108 = vector.load %arg4[%c0_75, %c0_76] : memref<128x128xbf16, #tpu.memory_space<vmem>>, vector<128x128xbf16>
    %cst_77 = arith.constant dense<0.000000e+00> : vector<128x128xf32>
    %109 = tpu.matmul %107, %108, %cst_77 {dimension_numbers = #tpu.dot_dimension_numbers<[1], [0], [0], [1], [0, 0, 1, 1], [], []>} : vector<128x128xbf16>, vector<128x128xbf16>, vector<128x128xf32> -> vector<128x128xf32>
    %c0_78 = arith.constant 0 : index
    %c0_79 = arith.constant 0 : index
    %110 = vector.load %arg5[%c0_78, %c0_79] : memref<1x128xf32, #tpu.memory_space<vmem>>, vector<1x128xf32>
    %111 = vector.broadcast %110 : vector<1x128xf32> to vector<128x128xf32>
    %112 = arith.addf %109, %111 : vector<128x128xf32>
    %c0_80 = arith.constant 0 : index
    %c0_81 = arith.constant 0 : index
    %c0_82 = arith.constant 0 : index
    %113 = vector.load %arg6[%c0_80, %c0_81, %c0_82] : memref<1x128x128xf32, #tpu.memory_space<vmem>>, vector<1x128x128xf32>
    %114 = vector.shape_cast %113 : vector<1x128x128xf32> to vector<128x128xf32>
    %115 = vector.shape_cast %112 : vector<128x128xf32> to vector<1x128x128xf32>
    tpu.vector_store %arg6[%c0_80, %c0_81, %c0_82], %115 {strides = array<i32>} : memref<1x128x128xf32, #tpu.memory_space<vmem>>, vector<1x128x128xf32>,
    return
  }
  func.func @transform_0(%arg0: i32) -> (i32, i32, i32) {
    %c0_i32 = arith.constant 0 : i32
    %c0_i32_0 = arith.constant 0 : i32
    %c0_i32_1 = arith.constant 0 : i32
    return %arg0, %c0_i32, %c0_i32_0 : i32, i32, i32
  }
  func.func @transform_1(%arg0: i32) -> (i32, i32) {
    %c0_i32 = arith.constant 0 : i32
    %c0_i32_0 = arith.constant 0 : i32
    %c0_i32_1 = arith.constant 0 : i32
    return %c0_i32, %c0_i32_0 : i32, i32
  }
  func.func @transform_2(%arg0: i32) -> (i32, i32) {
    %c0_i32 = arith.constant 0 : i32
    %c0_i32_0 = arith.constant 0 : i32
    %c0_i32_1 = arith.constant 0 : i32
    return %c0_i32, %c0_i32_0 : i32, i32
  }
  func.func @transform_3(%arg0: i32) -> (i32, i32) {
    %c0_i32 = arith.constant 0 : i32
    %c0_i32_0 = arith.constant 0 : i32
    %c0_i32_1 = arith.constant 0 : i32
    return %c0_i32, %c0_i32_0 : i32, i32
  }
  func.func @transform_4(%arg0: i32) -> (i32, i32) {
    %c0_i32 = arith.constant 0 : i32
    %c0_i32_0 = arith.constant 0 : i32
    %c0_i32_1 = arith.constant 0 : i32
    return %c0_i32, %c0_i32_0 : i32, i32
  }
  func.func @transform_5(%arg0: i32) -> (i32, i32, i32) {
    %c0_i32 = arith.constant 0 : i32
    %c0_i32_0 = arith.constant 0 : i32
    %c0_i32_1 = arith.constant 0 : i32
    return %arg0, %c0_i32, %c0_i32_0 : i32, i32, i32
  }
  func.func @transform_6(%arg0: i32) -> (i32, i32, i32) {
    %c0_i32 = arith.constant 0 : i32
    %c0_i32_0 = arith.constant 0 : i32
    %c0_i32_1 = arith.constant 0 : i32
    return %arg0, %c0_i32, %c0_i32_0 : i32, i32, i32
  }
}

</mosaic_0001>

<bundles_post_ra>
// kernel: tpu_custom_call.1
= control target key start
LH: loop header
LB: loop body
LE: loop exit
PB: predicated region body
PF: predicated region fallthrough
CT: control target
= control target key end

     0   :  { %s6469_s0 = inlined_call_operand.hbm [shape: f32[2,128,128], index: 0, kind: input, shape index: {}]   ;;  %s6470_s1 = inlined_call_operand.hbm [shape: bf16[128,384], index: 1, kind: input, shape index: {}]   ;;  %s6471_s2 = inlined_call_operand.hbm [shape: f32[1,384], index: 2, kind: input, shape index: {}]   ;;  %s6472_s3 = inlined_call_operand.hbm [shape: bf16[128,128], index: 3, kind: input, shape index: {}]   ;;  %s6473_s4 = inlined_call_operand.vmem [shape: f32[1,128], index: 4, kind: input, shape index: {}]   ;;  %s6474_s5 = inlined_call_operand.hbm [shape: f32[2,128,128], index: 5, kind: output, shape index: {0}]   ;;  %s6475_s6 = inlined_call_operand.hbm [shape: f32[2,128,128], index: 6, kind: output, shape index: {1}]  }
   0x1   :  { %6496 = sst [smem:[#allocation41_spill]] %s6469_s0 }
   0x2   :  { %6497 = sst [smem:[#allocation42_spill]] %s6470_s1 }
   0x3   :  { %12 = vsyncpa [#allocation5], 0 }
   0x4   :  { %14 = vsyncpa [#allocation5 + $0x1], 0 }
   0x5   :  { %15 = vsyncpa [#allocation8], 0 }
   0x6   :  { %16 = vsyncpa [#allocation11], 0 }
   0x7   :  { %17 = vsyncpa [#allocation6], 0 }
   0x8   :  { %19 = vsyncpa [#allocation6 + $0x1], 0 }
   0x9   :  { %20 = vsyncpa [#allocation14], 0 }
   0xa   :  { %22 = vsyncpa [#allocation14 + $0x1], 0  ;;  %s4906_s21 = smov 0   ;;  %s4908_s22 = smov 0  }
   0xb   :  { %s4910_s23 = smov 0   ;;  %s4912_s24 = smov 0  }
   0xc LB: > { %s4927_s25 = sadd.s32 4294967295, %s4855_s24   ;;  %s3572_s26 = sadd.s32 4294967294, %s4855_s24   ;;  %s4855_s24 = sphi %s4912_s24, %s6553_s24   ;;  %s4851_s23 = sphi %s4910_s23, %s6552_s23   ;;  %s4847_s22 = sphi %s4908_s22, %s6551_s22   ;;  %s4843_s21 = sphi %s4906_s21, %s6550_s21  }
   0xd   : > { %p48_p0 = scmp.ne.s32.totalorder %s4847_s22, %s4843_s21  ;;  %p49_p1 = scmp.eq.s32.totalorder %s4927_s25, 0 }
   0xe   : > { %p156_p2 = scmp.eq.s32.totalorder %s4927_s25, 1  ;;  %p162_p3 = scmp.eq.s32.totalorder %s3572_s26, 1 }
   0xf   : > { %p4936_p4 = por %p49_p1, %p48_p0  ;;  %p3573_p5 = scmp.ge.s32.totalorder %s4855_s24, 1 }
  0x10   : > { %p4941_p6 = por %p162_p3, %p48_p0  ;;  %p195_p7 = scmp.lt.s32.totalorder %s4855_s24, 3 }
  0x11   : > { %s6500_s1 = sld [smem:[#allocation42_spill]]  ;;  %s4857_s9 = smov [#allocation7]  }
  0x12   : > { %p4949_p8 = pnand %p3573_p5, %p195_p7  ;;  %s208_s10 = sshll.u32 %s4857_s9, 4  ;;  %s209_s10 = int_to_ptr.vmem [resolvable:$true] %s208_s10 }
  0x13   : > { %s221_s14 = sshll.u32 %s6471_s2, 4  ;;  %s4858_s15 = smov 192   ;;  %s222_s14 = int_to_ptr.hbm [resolvable:$true] %s221_s14 }
  0x14   : > { %p4297_p9 = pneg %p4949_p8  ;;  %s4859_s16 = smov 12  }
  0x15   : > { %s4860_s17 = smov [#allocation9]   ;;  %s232_s26 = sshll.u32 %s6472_s3, 4  ;;  %s233_s26 = int_to_ptr.hbm [resolvable:$true] %s232_s26 }
  0x16   : > { %p4957_p10 = pnand %p4297_p9, %p49_p1  ;;  %s223_s18 = sshll.u32 %s4860_s17, 4  ;;  %s224_s18 = int_to_ptr.vmem [resolvable:$true] %s223_s18 }
  0x17   : > { %s206_s7 = sshll.u32 %s6500_s1, 4  ;;  %s4861_s29 = smov [#allocation10]   ;;  %s207_s7 = int_to_ptr.hbm [resolvable:$true] %s206_s7 }
  0x18   : > { %4300 = dma.hbm_to_vmem [thread:$0]  (!%p4957_p10), %s207_s7, 3072, %s209_s10, [#allocation8], %s4858_s15, %s4858_s15, %s4859_s16  }
  0x19   : > { %4303 = dma.hbm_to_vmem [thread:$0]  (!%p4957_p10), %s222_s14, 48, %s224_s18, [#allocation8]  }
  0x1a   : > { %s234_s30 = sshll.u32 %s4861_s29, 4  ;;  %s4862_s7 = smov 64   ;;  %s235_s30 = int_to_ptr.vmem [resolvable:$true] %s234_s30 }
  0x1b   : > { %s4863_s9 = smov 4   ;;  %s4975_s10 = sadd.s32 1, %s4855_s24  }
  0x1c   : > { %4306 = dma.hbm_to_vmem [thread:$0]  (!%p4957_p10), %s233_s26, 1024, %s235_s30, [#allocation11], %s4862_s7, %s4862_s7, %s4863_s9  }
  0x1d   : > { %s32_s12 = ssub.s32 %s4855_s24, %s4975_s10  ;;  %s35_s13 = sadd.s32 1, %s4851_s23 }
  0x1e   : > { %p33_p12 = scmp.eq.s32.totalorder %s32_s12, 0  ;;  %p42_p13 = scmp.ne.s32.totalorder %s4851_s23, %s4847_s22 }
  0x1f   : > { %p43_p0 = scmp.eq.s32.totalorder %s4855_s24, 0  ;;  %p4321_p3 = scmp.lt.s32.totalorder %s4855_s24, 2 }
  0x20   : > { %s4985_s14 = scalar_select %p33_p12, %s4851_s23, %s35_s13  }
  0x21   : > { %p44_p5 = por %p43_p0, %p42_p13  ;;  %p4989_p7 = por %p156_p2, %p42_p13 }
  0x22   : > { %s251_s11 = sand.u32 1, %s4851_s23   ;;  %s4140_s16 = sshll.u32 %s4855_s24, 7 }
  0x23   : > { %s3578_s17 = sshll.u32 %s251_s11, 7  ;;  %s6504_s0 = sld [smem:[#allocation41_spill]] }
  0x24   : > { %s255_s29 = scalar_lea.vmem [#allocation4], %s3578_s17  ;;  %p5000_p9 = pnand %p4321_p3, %p44_p5 }
  0x25   : > { %s263_s30 = sshll.u32 %s255_s29, 4  ;;  %s252_s9 = scalar_lea.sflag [#allocation5], %s251_s11  ;;  %s264_s30 = int_to_ptr.vmem [resolvable:$true] %s263_s30 }
  0x26   : > { %p4723_p10 = pneg %p5000_p9 }
  0x29   : > { %s260_s20 = scalar_lea.hbm %s6504_s0, %s4140_s16  ;;  %s4726_s18 = scalar_lea.hbm %s6504_s0, 256 }
  0x2a   : > { %s261_s26 = sshll.u32 %s260_s20, 4  ;;  %s262_s26 = int_to_ptr.hbm [resolvable:$true] %s261_s26 }
  0x2b   : > { %s4719_s12 = sshra.s32 %s262_s26, 4  ;;  %s4720_s12 = int_to_ptr.hbm [resolvable:$true] %s4719_s12 }
  0x2c   : > { %s4721_s13 = scalar_lea.hbm %s4720_s12, 128  ;;  %p4727_p0 = scmp.lt.s32.totalorder %s4720_s12, %s6504_s0 }
  0x2d   : > { %p4722_p2 = scmp.ne.s32.totalorder %s4720_s12, %s4721_s13  ;;  %p4728_p3 = scmp.lt.s32.totalorder %s4726_s18, %s4721_s13 }
  0x2f   : > { %p4724_p12 = pnand %p4723_p10, %p4722_p2  ;;  %p4729_p5 = por %p4728_p3, %p4727_p0 }
  0x31   : > { %p4725_p13 = pneg %p4724_p12 }
  0x33   : > { %p4730_p11 = pnand %p4729_p5, %p4725_p13 }
  0x35   : > { %4733 = shalt.err (!%p4730_p11)
}
  0x36   : > { %s4864_s11 = smov 128   ;;  %s4865_s29 = smov 8  }
  0x37   : > { %4310 = dma.hbm_to_vmem [thread:$0]  (!%p5000_p9), %s262_s26, 2048, %s264_s30, %s252_s9, %s4864_s11, %s4864_s11, %s4865_s29  }
  0x38   : > { %275 = sbr.rel (%p4949_p8) target bundleno = 1883 (0x75b), region = 40 }
  0x3d   : > { %s5017_s16 = sand.u32 1, %s4847_s22  }
  0x3e   : > { %s5020_s17 = sshll.u32 %s5017_s16, 7  ;;  %s278_s12 = scalar_lea.sflag [#allocation5], %s5017_s16 }
  0x3f   : > { %s5024_s13 = scalar_lea.vmem [#allocation4], %s5020_s17 }
  0x40   : > { %4822 = dma.done.wait (%p4936_p4), %s278_s12, 2048  }
  0x41   : > { %4824 = vsyncadd (%p4936_p4), %s278_s12, 4294965248 }
  0x42   : > { %4826 = dma.done.wait (%p49_p1), [#allocation8], 3120  }
  0x43   : > { %4828 = vsyncadd (%p49_p1), [#allocation8], 4294964176 }
  0x44   : > { %4830 = dma.done.wait (%p49_p1), [#allocation11], 1024  }
  0x45   : > { %4832 = vsyncadd (%p49_p1), [#allocation11], 4294966272  ;;  %v3674_v0 = vld [vmem:[#allocation7 + $0xa8] sm:$0xf]  ;;  %v4163_v1 = vld [vmem:[#allocation7 + $0xb0] sm:$0xf0] }
  0x46   : > { %v4162_v2 = vld [vmem:[#allocation7 + $0xac] sm:$0xf]  ;;  %v3675_v3 = vor.u32 %v4163_v1, %v3674_v0  ;;  %v3676_v4 = vld [vmem:[#allocation7 + $0xb4] sm:$0xf0]  ;;  %v3682_v5 = vld [vmem:[#allocation7 + $0xb0] sm:$0xf] }
  0x47   : > { %v4164_v6 = vld [vmem:[#allocation7 + $0xb8] sm:$0xf0]  ;;  %v3679_v7 = vor.u32 %v4162_v2, %v3676_v4  ;;  %v3662_v9 = vld [vmem:[#allocation7 + $0x90] sm:$0xf]  ;;  %v4159_v11 = vld [vmem:[#allocation7 + $0x94] sm:$0xf] }
  0x48   : > { %v3683_v8 = vor.u32 %v4164_v6, %v3682_v5  ;;  %v4160_v10 = vld [vmem:[#allocation7 + $0x98] sm:$0xf0]  ;;  %523 = vmatpush.bf16.msra.mxu0 %v3675_v3  ;;  %v3664_v13 = vld [vmem:[#allocation7 + $0x9c] sm:$0xf0]  ;;  %v3670_v14 = vld [vmem:[#allocation7 + $0x98] sm:$0xf] }
  0x49   : > { %v3663_v12 = vor.u32 %v4160_v10, %v3662_v9  ;;  %v4161_v15 = vld [vmem:[#allocation7 + $0xa0] sm:$0xf0]  ;;  %572 = vmatpush.bf16.msra.mxu1 %v3679_v7  ;;  %v3667_v16 = vor.u32 %v4159_v11, %v3664_v13  ;;  %v3650_v18 = vld [vmem:[#allocation7 + $0x78] sm:$0xf]  ;;  %v4156_v20 = vld [vmem:[#allocation7 + $0x7c] sm:$0xf] }
  0x4a   : > { %621 = vmatpush.bf16.msra.mxu2 %v3683_v8  ;;  %v3671_v17 = vor.u32 %v4161_v15, %v3670_v14  ;;  %v4157_v19 = vld [vmem:[#allocation7 + $0x80] sm:$0xf0]  ;;  %v3652_v21 = vld [vmem:[#allocation7 + $0x84] sm:$0xf0]  ;;  %v3658_v22 = vld [vmem:[#allocation7 + $0x80] sm:$0xf] }
  0x4b   : > { %v4158_v23 = vld [vmem:[#allocation7 + $0x88] sm:$0xf0]  ;;  %v3651_v24 = vor.u32 %v4157_v19, %v3650_v18  ;;  %v3655_v25 = vor.u32 %v4156_v20, %v3652_v21  ;;  %v3638_v27 = vld [vmem:[#allocation7 + $0x60] sm:$0xf]  ;;  %v4153_v29 = vld [vmem:[#allocation7 + $0x64] sm:$0xf] }
  0x4c   : > { %524 = vmatpush.bf16.msra.mxu0 %v3663_v12  ;;  %v3659_v26 = vor.u32 %v4158_v23, %v3658_v22  ;;  %v4154_v28 = vld [vmem:[#allocation7 + $0x68] sm:$0xf0]  ;;  %v3640_v30 = vld [vmem:[#allocation7 + $0x6c] sm:$0xf0]  ;;  %v3646_v31 = vld [vmem:[#allocation7 + $0x68] sm:$0xf] }
  0x4d   : > { %573 = vmatpush.bf16.msra.mxu1 %v3667_v16  ;;  %v4155_v32 = vld [vmem:[#allocation7 + $0x70] sm:$0xf0]  ;;  %v3639_v33 = vor.u32 %v4154_v28, %v3638_v27  ;;  %v3643_v34 = vor.u32 %v4153_v29, %v3640_v30  ;;  %v3626_v36 = vld [vmem:[#allocation7 + $0x48] sm:$0xf]  ;;  %v4150_v38 = vld [vmem:[#allocation7 + $0x4c] sm:$0xf] }
  0x4e   : > { %622 = vmatpush.bf16.msra.mxu2 %v3671_v17  ;;  %v3647_v35 = vor.u32 %v4155_v32, %v3646_v31  ;;  %v4151_v37 = vld [vmem:[#allocation7 + $0x50] sm:$0xf0]  ;;  %v3628_v39 = vld [vmem:[#allocation7 + $0x54] sm:$0xf0]  ;;  %v3634_v40 = vld [vmem:[#allocation7 + $0x50] sm:$0xf] }
  0x4f   : > { %v4152_v41 = vld [vmem:[#allocation7 + $0x58] sm:$0xf0]  ;;  %v3627_v42 = vor.u32 %v4151_v37, %v3626_v36  ;;  %v3614_v43 = vld [vmem:[#allocation7 + $0x30] sm:$0xf]  ;;  %v3631_v44 = vor.u32 %v4150_v38, %v3628_v39  ;;  %v4147_v47 = vld [vmem:[#allocation7 + $0x34] sm:$0xf] }
  0x50   : > { %525 = vmatpush.bf16.msra.mxu0 %v3651_v24  ;;  %v3635_v45 = vor.u32 %v4152_v41, %v3634_v40  ;;  %v4148_v46 = vld [vmem:[#allocation7 + $0x38] sm:$0xf0]  ;;  %v3616_v48 = vld [vmem:[#allocation7 + $0x3c] sm:$0xf0]  ;;  %v3622_v49 = vld [vmem:[#allocation7 + $0x38] sm:$0xf] }
  0x51   : > { %574 = vmatpush.bf16.msra.mxu1 %v3655_v25  ;;  %v4149_v50 = vld [vmem:[#allocation7 + $0x40] sm:$0xf0]  ;;  %v3615_v51 = vor.u32 %v4148_v46, %v3614_v43  ;;  %v3619_v52 = vor.u32 %v4147_v47, %v3616_v48  ;;  %v3602_v54 = vld [vmem:[#allocation7 + $0x18] sm:$0xf]  ;;  %v4144_v56 = vld [vmem:[#allocation7 + $0x1c] sm:$0xf] }
  0x52   : > { %623 = vmatpush.bf16.msra.mxu2 %v3659_v26  ;;  %v3623_v53 = vor.u32 %v4149_v50, %v3622_v49  ;;  %v4145_v55 = vld [vmem:[#allocation7 + $0x20] sm:$0xf0]  ;;  %v3604_v57 = vld [vmem:[#allocation7 + $0x24] sm:$0xf0]  ;;  %v3610_v58 = vld [vmem:[#allocation7 + $0x20] sm:$0xf] }
  0x53   : > { %v4146_v59 = vld [vmem:[#allocation7 + $0x28] sm:$0xf0]  ;;  %v3603_v60 = vor.u32 %v4145_v55, %v3602_v54  ;;  %v3607_v61 = vor.u32 %v4144_v56, %v3604_v57  ;;  %v3590_v63 = vld [vmem:[#allocation7] sm:$0xf]  ;;  %v4141_v1 = vld [vmem:[#allocation7 + $0x4] sm:$0xf] }
  0x54   : > { %526 = vmatpush.bf16.msra.mxu0 %v3639_v33  ;;  %v3611_v62 = vor.u32 %v4146_v59, %v3610_v58  ;;  %v4142_v0 = vld [vmem:[#allocation7 + $0x8] sm:$0xf0]  ;;  %v3592_v2 = vld [vmem:[#allocation7 + $0xc] sm:$0xf0]  ;;  %v3598_v3 = vld [vmem:[#allocation7 + $0x8] sm:$0xf] }
  0x55   : > { %575 = vmatpush.bf16.msra.mxu1 %v3643_v34  ;;  %v4143_v4 = vld [vmem:[#allocation7 + $0x10] sm:$0xf0]  ;;  %v3591_v5 = vor.u32 %v4142_v0, %v3590_v63  ;;  %v331_v6 = vld [vmem:[%s5024_s13] sm:$0xff]  ;;  %v332_v7 = vld [vmem:[%s5024_s13 + $0x8] sm:$0xff]  ;;  %v3595_v8 = vor.u32 %v4141_v1, %v3592_v2  ;;  %s4866_s27 = smov 64   ;;  %s4867_s8 = smov 96  }
  0x56   : > { %624 = vmatpush.bf16.msra.mxu2 %v3647_v35  ;;  %v3599_v9 = vor.u32 %v4143_v4, %v3598_v3  ;;  %v347_v10 = vpack.c.bf16 %v332_v7, %v331_v6  ;;  %v333_v11 = vld [vmem:[%s5024_s13 + $0x10] sm:$0xff]  ;;  %v334_v12 = vld [vmem:[%s5024_s13 + $0x18] sm:$0xff]  ;;  %v335_v14 = vld [vmem:[%s5024_s13 + $0x20] sm:$0xff]  ;;  %s4868_s26 = smov 32   ;;  %vm862_vm0 = vcmask 261120   ;;  %s6003_s30 = scalar_lea.vmem [#allocation13], %s5020_s17 }
  0x57   : > { %v348_v13 = vpack.c.bf16 %v334_v12, %v333_v11  ;;  %v336_v15 = vld [vmem:[%s5024_s13 + $0x28] sm:$0xff]  ;;  %v337_v17 = vld [vmem:[%s5024_s13 + $0x30] sm:$0xff]  ;;  %v338_v18 = vld [vmem:[%s5024_s13 + $0x38] sm:$0xff]  ;;  %vm1875_vm1 = vcmask 523520   ;;  %vm2526_vm2 = vcmask 785920   ;;  %vm3177_vm3 = vcmask 1048320  }
  0x58   : > { %527 = vmatpush.bf16.msra.mxu0 %v3627_v42  ;;  %v349_v16 = vpack.c.bf16 %v336_v15, %v335_v14  ;;  %v350_v19 = vpack.c.bf16 %v338_v18, %v337_v17  ;;  %v339_v20 = vld [vmem:[%s5024_s13 + $0x40] sm:$0xff]  ;;  %v340_v21 = vld [vmem:[%s5024_s13 + $0x48] sm:$0xff]  ;;  %v341_v23 = vld [vmem:[%s5024_s13 + $0x50] sm:$0xff]  ;;  %s6363_s18 = scalar_lea.vmem [#allocation12], %s5020_s17  ;;  %s4269_s19 = sshll.u32 %s4927_s25, 7 }
  0x59   : > { %576 = vmatpush.bf16.msra.mxu1 %v3631_v44  ;;  %v351_v22 = vpack.c.bf16 %v340_v21, %v339_v20  ;;  %v342_v24 = vld [vmem:[%s5024_s13 + $0x58] sm:$0xff]  ;;  %v343_v26 = vld [vmem:[%s5024_s13 + $0x60] sm:$0xff]  ;;  %v344_v27 = vld [vmem:[%s5024_s13 + $0x68] sm:$0xff]  ;;  %s3433_s29 = scalar_lea.hbm %s6475_s6, %s4269_s19  ;;  %s3434_s17 = sshll.u32 %s6003_s30, 4  ;;  %s3435_s17 = int_to_ptr.vmem [resolvable:$true] %s3434_s17 }
  0x5a   : > { %625 = vmatpush.bf16.msra.mxu2 %v3635_v45  ;;  %v352_v25 = vpack.c.bf16 %v342_v24, %v341_v23  ;;  %v353_v28 = vpack.c.bf16 %v344_v27, %v343_v26  ;;  %v345_v29 = vld [vmem:[%s5024_s13 + $0x70] sm:$0xff]  ;;  %v346_v30 = vld [vmem:[%s5024_s13 + $0x78] sm:$0xff]  ;;  %v387_v32 = vld [vmem:[#allocation9] sm:$0x7]  ;;  %s3436_s12 = sshll.u32 %s3433_s29, 4  ;;  %s3405_s13 = scalar_lea.sflag [#allocation14], %s5017_s16  ;;  %s3437_s12 = int_to_ptr.hbm [resolvable:$true] %s3436_s12 }
  0x5b   : > { %v354_v31 = vpack.c.bf16 %v346_v30, %v345_v29  ;;  %v5054_v33 = vperm.slane %v387_v32, 0  ;;  %v5056_v34 = vperm.slane %v387_v32, 1  ;;  %v5060_v40 = vperm.slane %v387_v32, 2  ;;  %s4769_s9 = scalar_lea.hbm %s6475_s6, 256 }
  0x5c   : > { %528 = vmatpush.bf16.msra.mxu0 %v3615_v51 }
  0x5d   : > { %577 = vmatpush.bf16.msra.mxu1 %v3619_v52 }
  0x5e   : > { %626 = vmatpush.bf16.msra.mxu2 %v3623_v53 }
  0x60   : > { %529 = vmatpush.bf16.msra.mxu0 %v3603_v60 }
  0x61   : > { %578 = vmatpush.bf16.msra.mxu1 %v3607_v61 }
  0x62   : > { %627 = vmatpush.bf16.msra.mxu2 %v3611_v62 }
  0x64   : > { %530 = vmatpush.bf16.msra.mxu0 %v3591_v5 }
  0x65   : > { %579 = vmatpush.bf16.msra.mxu1 %v3595_v8 }
  0x66   : > { %628 = vmatpush.bf16.msra.mxu2 %v3599_v9 }
  0x67   : > { %531 = vmatmul.bf16.vlgmr.msra.gmra.mxu0 %v347_v10 }
  0x68   : > { %580 = vmatmul.bf16.vlgmr.msra.gmra.mxu1 %v347_v10 }
  0x69   : > { %629 = vmatmul.bf16.vlgmr.msra.gmra.mxu2 %v347_v10 }
  0x77   : > { %536 = vmatmul.bf16.gmra.mxu0 %v348_v13 }
  0x78   : > { %585 = vmatmul.bf16.gmra.mxu1 %v348_v13 }
  0x79   : > { %634 = vmatmul.bf16.gmra.mxu2 %v348_v13 }
  0x87   : > { %541 = vmatmul.bf16.gmra.mxu0 %v349_v16 }
  0x88   : > { %590 = vmatmul.bf16.gmra.mxu1 %v349_v16 }
  0x89   : > { %639 = vmatmul.bf16.gmra.mxu2 %v349_v16 }
  0x97   : > { %546 = vmatmul.bf16.gmra.mxu0 %v350_v19 }
  0x98   : > { %595 = vmatmul.bf16.gmra.mxu1 %v350_v19 }
  0x99   : > { %644 = vmatmul.bf16.gmra.mxu2 %v350_v19 }
  0xa7   : > { %551 = vmatmul.bf16.gmra.mxu0 %v351_v22 }
  0xa8   : > { %600 = vmatmul.bf16.gmra.mxu1 %v351_v22 }
  0xa9   : > { %649 = vmatmul.bf16.gmra.mxu2 %v351_v22 }
  0xb7   : > { %556 = vmatmul.bf16.gmra.mxu0 %v352_v25 }
  0xb8   : > { %605 = vmatmul.bf16.gmra.mxu1 %v352_v25 }
  0xb9   : > { %654 = vmatmul.bf16.gmra.mxu2 %v352_v25 }
  0xc7   : > { %561 = vmatmul.bf16.gmra.mxu0 %v353_v28 }
  0xc8   : > { %610 = vmatmul.bf16.gmra.mxu1 %v353_v28 }
  0xc9   : > { %659 = vmatmul.bf16.gmra.mxu2 %v353_v28 }
  0xd7   : > { %566 = vmatmul.bf16.gmra.mxu0 %v354_v31 }
  0xd8   : > { %615 = vmatmul.bf16.gmra.mxu1 %v354_v31 }
  0xd9   : > { %664 = vmatmul.bf16.gmra.mxu2 %v354_v31 }
  0xe4   : > { %v532_v35 = vpop.f32.mrf.mxu0 }
  0xe5   : > { %v533_v36 = vadd.f32 %v532_v35, %v5054_v33  ;;  %v581_v37 = vpop.f32.mrf.mxu1 }
  0xe6   : > { %v582_v38 = vadd.f32 %v581_v37, %v5056_v34 }
  0xe8   : > { %v670_v39 = vpack.c.bf16 %v582_v38, %v533_v36 }
  0xea   : > { %702 = vst [vmem:[#allocation2] sm:$0xff] %v670_v39 }
  0xec   : > { %v630_v41 = vpop.f32.mrf.mxu2  ;;  %v534_v43 = vpop.f32.mrf.mxu0 }
  0xed   : > { %v631_v42 = vadd.f32 %v630_v41, %v5060_v40  ;;  %v535_v44 = vadd.f32 %v534_v43, %v5054_v33  ;;  %v583_v45 = vpop.f32.mrf.mxu1 }
  0xee   : > { %v584_v47 = vadd.f32 %v583_v45, %v5056_v34 }
  0xef   : > { %v671_v46 = vpack.c.bf16 %v631_v42, %v631_v42 }
  0xf0   : > { %v672_v48 = vpack.c.bf16 %v584_v47, %v535_v44 }
  0xf1   : > { %703 = vst [vmem:[#allocation2 + $0x8] sm:$0xf] %v671_v46  ;;  %v3926_v56 = vld [vmem:[#allocation2 + $0x4] sm:$0xf]  ;;  %v3790_v59 = vld [vmem:[#allocation2] sm:$0xf] }
  0xf2   : > { %704 = vst [vmem:[#allocation2 + $0xc] sm:$0xff] %v672_v48  ;;  %v3822_v58 = vld [vmem:[#allocation2 + $0x4] sm:$0xf]  ;;  %v3998_v13 = vld [vmem:[#allocation2] sm:$0xf] }
  0xf3   : > { %v4030_v14 = vld [vmem:[#allocation2 + $0x4] sm:$0xf]  ;;  %v3894_v17 = vld [vmem:[#allocation2] sm:$0xf] }
  0xf4   : > { %v632_v49 = vpop.f32.mrf.mxu2  ;;  %v537_v51 = vpop.f32.mrf.mxu0 }
  0xf5   : > { %v633_v50 = vadd.f32 %v632_v49, %v5060_v40  ;;  %v538_v52 = vadd.f32 %v537_v51, %v5054_v33  ;;  %v586_v53 = vpop.f32.mrf.mxu1 }
  0xf6   : > { %v587_v55 = vadd.f32 %v586_v53, %v5056_v34 }
  0xf7   : > { %v673_v54 = vpack.c.bf16 %v633_v50, %v633_v50 }
  0xf8   : > { %v674_v57 = vpack.c.bf16 %v587_v55, %v538_v52 }
  0xf9   : > { %705 = vst [vmem:[#allocation2 + $0x14] sm:$0xf] %v673_v54  ;;  %v4221_v60 = vld [vmem:[#allocation2 + $0xc] sm:$0xf0]  ;;  %v4189_v62 = vld [vmem:[#allocation2 + $0x8] sm:$0xf0] }
  0xfa   : > { %v4197_v61 = vld [vmem:[#allocation2 + $0xc] sm:$0xf0]  ;;  %706 = vst [vmem:[#allocation2 + $0x18] sm:$0xff] %v674_v57  ;;  %v3927_v63 = vor.u32 %v4221_v60, %v3926_v56  ;;  %v3791_v1 = vor.u32 %v4189_v62, %v3790_v59  ;;  %v4237_v9 = vld [vmem:[#allocation2 + $0x8] sm:$0xf0] }
  0xfb   : > { %v3823_v0 = vor.u32 %v4197_v61, %v3822_v58  ;;  %v4245_v10 = vld [vmem:[#allocation2 + $0xc] sm:$0xf0]  ;;  %v4213_v12 = vld [vmem:[#allocation2 + $0x8] sm:$0xf0]  ;;  %v3999_v15 = vor.u32 %v4237_v9, %v3998_v13 }
  0xfc   : > { %v635_v2 = vpop.f32.mrf.mxu2  ;;  %2036 = vrot.lane.b32.xlu0 %v3927_v63, %s4866_s27  ;;  %v539_v4 = vpop.f32.mrf.mxu0  ;;  %1329 = vrot.lane.b32.xlu2 %v3791_v1, %s4867_s8  ;;  %v4031_v16 = vor.u32 %v4245_v10, %v4030_v14  ;;  %v3895_v19 = vor.u32 %v4213_v12, %v3894_v17 }
  0xfd   : > { %v636_v3 = vadd.f32 %v635_v2, %v5060_v40  ;;  %1385 = vrot.lane.b32.xlu1 %v3823_v0, %s4867_s8  ;;  %v540_v5 = vadd.f32 %v539_v4, %v5054_v33  ;;  %v588_v6 = vpop.f32.mrf.mxu1 }
  0xfe   : > { %v589_v8 = vadd.f32 %v588_v6, %v5056_v34 }
  0xff   : > { %v675_v7 = vpack.c.bf16 %v636_v3, %v636_v3 }
 0x100   : > { %v676_v11 = vpack.c.bf16 %v589_v8, %v540_v5 }
 0x101   : > { %707 = vst [vmem:[#allocation2 + $0x20] sm:$0xf] %v675_v7  ;;  %v3826_v26 = vld [vmem:[#allocation2 + $0x1c] sm:$0xf]  ;;  %v3898_v28 = vld [vmem:[#allocation2 + $0x18] sm:$0xf] }
 0x102   : > { %708 = vst [vmem:[#allocation2 + $0x24] sm:$0xff] %v676_v11  ;;  %v4034_v29 = vld [vmem:[#allocation2 + $0x1c] sm:$0xf]  ;;  %v3794_v49 = vld [vmem:[#allocation2 + $0x18] sm:$0xf] }
 0x103   : > { %v4002_v51 = vld [vmem:[#allocation2 + $0x18] sm:$0xf]  ;;  %v3930_v62 = vld [vmem:[#allocation2 + $0x1c] sm:$0xf] }
 0x104   : > { %v637_v18 = vpop.f32.mrf.mxu2  ;;  %2631 = vrot.lane.b32.xlu0 %v3999_v15, %s4868_s26  ;;  %v542_v21 = vpop.f32.mrf.mxu0  ;;  %1980 = vrot.lane.b32.xlu2 %v3895_v19, %s4866_s27 }
 0x105   : > { %v638_v20 = vadd.f32 %v637_v18, %v5060_v40  ;;  %2687 = vrot.lane.b32.xlu1 %v4031_v16, %s4868_s26  ;;  %v543_v22 = vadd.f32 %v542_v21, %v5054_v33  ;;  %v591_v23 = vpop.f32.mrf.mxu1 }
 0x106   : > { %v592_v25 = vadd.f32 %v591_v23, %v5056_v34 }
 0x107   : > { %v677_v24 = vpack.c.bf16 %v638_v20, %v638_v20 }
 0x108   : > { %v678_v27 = vpack.c.bf16 %v592_v25, %v543_v22 }
 0x109   : > { %709 = vst [vmem:[#allocation2 + $0x2c] sm:$0xf] %v677_v24  ;;  %v4198_v30 = vld [vmem:[#allocation2 + $0x24] sm:$0xf0]  ;;  %v4214_v31 = vld [vmem:[#allocation2 + $0x20] sm:$0xf0] }
 0x10a   : > { %v4246_v32 = vld [vmem:[#allocation2 + $0x24] sm:$0xf0]  ;;  %710 = vst [vmem:[#allocation2 + $0x30] sm:$0xff] %v678_v27  ;;  %v3827_v35 = vor.u32 %v4198_v30, %v3826_v26  ;;  %v3899_v36 = vor.u32 %v4214_v31, %v3898_v28  ;;  %v4190_v46 = vld [vmem:[#allocation2 + $0x20] sm:$0xf0] }
 0x10b   : > { %v4035_v37 = vor.u32 %v4246_v32, %v4034_v29  ;;  %v4238_v48 = vld [vmem:[#allocation2 + $0x20] sm:$0xf0]  ;;  %v3795_v50 = vor.u32 %v4190_v46, %v3794_v49  ;;  %v4222_v60 = vld [vmem:[#allocation2 + $0x24] sm:$0xf0] }
 0x10c   : > { %v640_v38 = vpop.f32.mrf.mxu2  ;;  %1387 = vrot.lane.b32.xlu0 %v3827_v35, %s4867_s8  ;;  %v544_v41 = vpop.f32.mrf.mxu0  ;;  %v4003_v53 = vor.u32 %v4238_v48, %v4002_v51  ;;  %v3931_v3 = vor.u32 %v4222_v60, %v3930_v62 }
 0x10d   : > { %v641_v39 = vadd.f32 %v640_v38, %v5060_v40  ;;  %1982 = vrot.lane.b32.xlu1 %v3899_v36, %s4866_s27  ;;  %2689 = vrot.lane.b32.xlu2 %v4035_v37, %s4868_s26  ;;  %v545_v42 = vadd.f32 %v544_v41, %v5054_v33  ;;  %v593_v43 = vpop.f32.mrf.mxu1 }
 0x10e   : > { %v594_v45 = vadd.f32 %v593_v43, %v5056_v34 }
 0x10f   : > { %v679_v44 = vpack.c.bf16 %v641_v39, %v641_v39 }
 0x110   : > { %v680_v47 = vpack.c.bf16 %v594_v45, %v545_v42 }
 0x111   : > { %711 = vst [vmem:[#allocation2 + $0x38] sm:$0xf] %v679_v44  ;;  %v3798_v63 = vld [vmem:[#allocation2 + $0x30] sm:$0xf]  ;;  %v3830_v1 = vld [vmem:[#allocation2 + $0x34] sm:$0xf] }
 0x112   : > { %712 = vst [vmem:[#allocation2 + $0x3c] sm:$0xff] %v680_v47  ;;  %v3934_v16 = vld [vmem:[#allocation2 + $0x34] sm:$0xf] }
 0x113   : > { %v4038_v18 = vld [vmem:[#allocation2 + $0x34] sm:$0xf] }
 0x114   : > { %v642_v52 = vpop.f32.mrf.mxu2  ;;  %1331 = vrot.lane.b32.xlu0 %v3795_v50, %s4867_s8  ;;  %v547_v55 = vpop.f32.mrf.mxu0 }
 0x115   : > { %v643_v54 = vadd.f32 %v642_v52, %v5060_v40  ;;  %2633 = vrot.lane.b32.xlu2 %v4003_v53, %s4868_s26  ;;  %v548_v56 = vadd.f32 %v547_v55, %v5054_v33  ;;  %v596_v57 = vpop.f32.mrf.mxu1 }
 0x116   : > { %v597_v59 = vadd.f32 %v596_v57, %v5056_v34 }
 0x117   : > { %v681_v58 = vpack.c.bf16 %v643_v54, %v643_v54 }
 0x118   : > { %v682_v61 = vpack.c.bf16 %v597_v59, %v548_v56 }
 0x119   : > { %713 = vst [vmem:[#allocation2 + $0x44] sm:$0xf] %v681_v58  ;;  %v4191_v0 = vld [vmem:[#allocation2 + $0x38] sm:$0xf0]  ;;  %v4199_v2 = vld [vmem:[#allocation2 + $0x3c] sm:$0xf0] }
 0x11a   : > { %714 = vst [vmem:[#allocation2 + $0x48] sm:$0xff] %v682_v61  ;;  %v3799_v4 = vor.u32 %v4191_v0, %v3798_v63  ;;  %v3831_v5 = vor.u32 %v4199_v2, %v3830_v1  ;;  %v4223_v13 = vld [vmem:[#allocation2 + $0x3c] sm:$0xf0] }
 0x11b   : > { %v4247_v15 = vld [vmem:[#allocation2 + $0x3c] sm:$0xf0]  ;;  %v3935_v17 = vor.u32 %v4223_v13, %v3934_v16 }
 0x11c   : > { %v645_v6 = vpop.f32.mrf.mxu2  ;;  %2038 = vrot.lane.b32.xlu0 %v3931_v3, %s4866_s27  ;;  %1333 = vrot.lane.b32.xlu1 %v3799_v4, %s4867_s8  ;;  %v549_v8 = vpop.f32.mrf.mxu0  ;;  %v4039_v20 = vor.u32 %v4247_v15, %v4038_v18 }
 0x11d   : > { %v646_v7 = vadd.f32 %v645_v6, %v5060_v40  ;;  %1389 = vrot.lane.b32.xlu2 %v3831_v5, %s4867_s8  ;;  %v550_v9 = vadd.f32 %v549_v8, %v5054_v33  ;;  %v598_v10 = vpop.f32.mrf.mxu1 }
 0x11e   : > { %v599_v12 = vadd.f32 %v598_v10, %v5056_v34 }
 0x11f   : > { %v683_v11 = vpack.c.bf16 %v646_v7, %v646_v7 }
 0x120   : > { %v684_v14 = vpack.c.bf16 %v599_v12, %v550_v9 }
 0x121   : > { %715 = vst [vmem:[#allocation2 + $0x50] sm:$0xf] %v683_v11  ;;  %v4042_v27 = vld [vmem:[#allocation2 + $0x4c] sm:$0xf]  ;;  %v3802_v49 = vld [vmem:[#allocation2 + $0x48] sm:$0xf] }
 0x122   : > { %716 = vst [vmem:[#allocation2 + $0x54] sm:$0xff] %v684_v14  ;;  %v3938_v29 = vld [vmem:[#allocation2 + $0x4c] sm:$0xf] }
 0x123   : > { %v3834_v30 = vld [vmem:[#allocation2 + $0x4c] sm:$0xf] }
 0x124   : > { %v647_v19 = vpop.f32.mrf.mxu2  ;;  %2040 = vrot.lane.b32.xlu1 %v3935_v17, %s4866_s27  ;;  %v552_v22 = vpop.f32.mrf.mxu0 }
 0x125   : > { %v648_v21 = vadd.f32 %v647_v19, %v5060_v40  ;;  %2691 = vrot.lane.b32.xlu2 %v4039_v20, %s4868_s26  ;;  %v553_v23 = vadd.f32 %v552_v22, %v5054_v33  ;;  %v601_v24 = vpop.f32.mrf.mxu1 }
 0x126   : > { %v602_v26 = vadd.f32 %v601_v24, %v5056_v34 }
 0x127   : > { %v685_v25 = vpack.c.bf16 %v648_v21, %v648_v21 }
 0x128   : > { %v686_v28 = vpack.c.bf16 %v602_v26, %v553_v23 }
 0x129   : > { %717 = vst [vmem:[#allocation2 + $0x5c] sm:$0xf] %v685_v25  ;;  %v4248_v31 = vld [vmem:[#allocation2 + $0x54] sm:$0xf0]  ;;  %v4192_v48 = vld [vmem:[#allocation2 + $0x50] sm:$0xf0] }
 0x12a   : > { %v4224_v32 = vld [vmem:[#allocation2 + $0x54] sm:$0xf0]  ;;  %718 = vst [vmem:[#allocation2 + $0x60] sm:$0xff] %v686_v28  ;;  %v4043_v36 = vor.u32 %v4248_v31, %v4042_v27  ;;  %v3803_v51 = vor.u32 %v4192_v48, %v3802_v49 }
 0x12b   : > { %v4200_v35 = vld [vmem:[#allocation2 + $0x54] sm:$0xf0]  ;;  %v3939_v37 = vor.u32 %v4224_v32, %v3938_v29 }
 0x12c   : > { %v3835_v38 = vor.u32 %v4200_v35, %v3834_v30  ;;  %v650_v39 = vpop.f32.mrf.mxu2  ;;  %2693 = vrot.lane.b32.xlu0 %v4043_v36, %s4868_s26  ;;  %v554_v42 = vpop.f32.mrf.mxu0 }
 0x12d   : > { %v651_v41 = vadd.f32 %v650_v39, %v5060_v40  ;;  %2042 = vrot.lane.b32.xlu1 %v3939_v37, %s4866_s27  ;;  %v555_v43 = vadd.f32 %v554_v42, %v5054_v33  ;;  %v603_v44 = vpop.f32.mrf.mxu1 }
 0x12e   : > { %1391 = vrot.lane.b32.xlu2 %v3835_v38, %s4867_s8  ;;  %v604_v46 = vadd.f32 %v603_v44, %v5056_v34 }
 0x12f   : > { %v687_v45 = vpack.c.bf16 %v651_v41, %v651_v41 }
 0x130   : > { %v688_v47 = vpack.c.bf16 %v604_v46, %v555_v43 }
 0x131   : > { %719 = vst [vmem:[#allocation2 + $0x68] sm:$0xf] %v687_v45  ;;  %v4046_v58 = vld [vmem:[#allocation2 + $0x64] sm:$0xf]  ;;  %v3806_v13 = vld [vmem:[#allocation2 + $0x60] sm:$0xf] }
 0x132   : > { %720 = vst [vmem:[#allocation2 + $0x6c] sm:$0xff] %v688_v47  ;;  %v3838_v60 = vld [vmem:[#allocation2 + $0x64] sm:$0xf] }
 0x133   : > { %v3942_v61 = vld [vmem:[#allocation2 + $0x64] sm:$0xf] }
 0x134   : > { %v652_v50 = vpop.f32.mrf.mxu2  ;;  %v557_v53 = vpop.f32.mrf.mxu0 }
 0x135   : > { %v653_v52 = vadd.f32 %v652_v50, %v5060_v40  ;;  %v558_v54 = vadd.f32 %v557_v53, %v5054_v33  ;;  %v606_v55 = vpop.f32.mrf.mxu1 }
 0x136   : > { %1335 = vrot.lane.b32.xlu2 %v3803_v51, %s4867_s8  ;;  %v607_v57 = vadd.f32 %v606_v55, %v5056_v34 }
 0x137   : > { %v689_v56 = vpack.c.bf16 %v653_v52, %v653_v52 }
 0x138   : > { %v690_v59 = vpack.c.bf16 %v607_v57, %v558_v54 }
 0x139   : > { %721 = vst [vmem:[#allocation2 + $0x74] sm:$0xf] %v689_v56  ;;  %v4249_v62 = vld [vmem:[#allocation2 + $0x6c] sm:$0xf0]  ;;  %v4193_v11 = vld [vmem:[#allocation2 + $0x68] sm:$0xf0] }
 0x13a   : > { %v4201_v63 = vld [vmem:[#allocation2 + $0x6c] sm:$0xf0]  ;;  %722 = vst [vmem:[#allocation2 + $0x78] sm:$0xff] %v690_v59  ;;  %v4047_v1 = vor.u32 %v4249_v62, %v4046_v58  ;;  %v3807_v14 = vor.u32 %v4193_v11, %v3806_v13 }
 0x13b   : > { %v4225_v0 = vld [vmem:[#allocation2 + $0x6c] sm:$0xf0]  ;;  %v3839_v2 = vor.u32 %v4201_v63, %v3838_v60 }
 0x13c   : > { %v3943_v3 = vor.u32 %v4225_v0, %v3942_v61  ;;  %v655_v4 = vpop.f32.mrf.mxu2  ;;  %2695 = vrot.lane.b32.xlu0 %v4047_v1, %s4868_s26  ;;  %v559_v6 = vpop.f32.mrf.mxu0  ;;  %v4006_v11 = vld [vmem:[#allocation2 + $0x30] sm:$0xf] }
 0x13d   : > { %v656_v5 = vadd.f32 %v655_v4, %v5060_v40  ;;  %1393 = vrot.lane.b32.xlu1 %v3839_v2, %s4867_s8  ;;  %v560_v7 = vadd.f32 %v559_v6, %v5054_v33  ;;  %v608_v8 = vpop.f32.mrf.mxu1 }
 0x13e   : > { %2044 = vrot.lane.b32.xlu2 %v3943_v3, %s4866_s27  ;;  %v609_v10 = vadd.f32 %v608_v8, %v5056_v34 }
 0x13f   : > { %v691_v9 = vpack.c.bf16 %v656_v5, %v656_v5 }
 0x140   : > { %v692_v12 = vpack.c.bf16 %v609_v10, %v560_v7  ;;  %v4239_v7 = vld [vmem:[#allocation2 + $0x38] sm:$0xf0] }
 0x141   : > { %723 = vst [vmem:[#allocation2 + $0x80] sm:$0xf] %v691_v9  ;;  %v3810_v22 = vld [vmem:[#allocation2 + $0x78] sm:$0xf]  ;;  %v3842_v24 = vld [vmem:[#allocation2 + $0x7c] sm:$0xf]  ;;  %v4007_v13 = vor.u32 %v4239_v7, %v4006_v11 }
 0x142   : > { %724 = vst [vmem:[#allocation2 + $0x84] sm:$0xff] %v692_v12  ;;  %v3946_v25 = vld [vmem:[#allocation2 + $0x7c] sm:$0xf]  ;;  %v4216_v9 = vld [vmem:[#allocation2 + $0x50] sm:$0xf0] }
 0x143   : > { %v4050_v44 = vld [vmem:[#allocation2 + $0x7c] sm:$0xf] }
 0x144   : > { %v657_v15 = vpop.f32.mrf.mxu2  ;;  %v562_v17 = vpop.f32.mrf.mxu0  ;;  %v4184_v11 = vld [vmem:[#allocation2 + $0x58] sm:$0xf0] }
 0x145   : > { %v658_v16 = vadd.f32 %v657_v15, %v5060_v40  ;;  %1337 = vrot.lane.b32.xlu1 %v3807_v14, %s4867_s8  ;;  %v563_v18 = vadd.f32 %v562_v17, %v5054_v33  ;;  %v611_v19 = vpop.f32.mrf.mxu1  ;;  %v3906_v14 = vld [vmem:[#allocation2 + $0x48] sm:$0xf] }
 0x146   : > { %v612_v21 = vadd.f32 %v611_v19, %v5056_v34  ;;  %v4217_v19 = vld [vmem:[#allocation2 + $0x68] sm:$0xf0] }
 0x147   : > { %v693_v20 = vpack.c.bf16 %v658_v16, %v658_v16  ;;  %v3907_v16 = vor.u32 %v4216_v9, %v3906_v14  ;;  %v4241_v14 = vld [vmem:[#allocation2 + $0x68] sm:$0xf0] }
 0x148   : > { %v694_v23 = vpack.c.bf16 %v612_v21, %v563_v18  ;;  %v3910_v18 = vld [vmem:[#allocation2 + $0x60] sm:$0xf] }
 0x149   : > { %725 = vst [vmem:[#allocation2 + $0x8c] sm:$0xf] %v693_v20  ;;  %v4194_v26 = vld [vmem:[#allocation2 + $0x80] sm:$0xf0]  ;;  %v4202_v27 = vld [vmem:[#allocation2 + $0x84] sm:$0xf0] }
 0x14a   : > { %v4226_v28 = vld [vmem:[#allocation2 + $0x84] sm:$0xf0]  ;;  %726 = vst [vmem:[#allocation2 + $0x90] sm:$0xff] %v694_v23  ;;  %v3811_v29 = vor.u32 %v4194_v26, %v3810_v22  ;;  %v3843_v30 = vor.u32 %v4202_v27, %v3842_v24  ;;  %v4218_v21 = vld [vmem:[#allocation2 + $0x80] sm:$0xf0]  ;;  %v3911_v26 = vor.u32 %v4217_v19, %v3910_v18 }
 0x14b   : > { %v3947_v31 = vor.u32 %v4226_v28, %v3946_v25  ;;  %v4250_v42 = vld [vmem:[#allocation2 + $0x84] sm:$0xf0]  ;;  %v4205_v19 = vld [vmem:[#allocation2 + $0x10] sm:$0xf0] }
 0x14c   : > { %v660_v32 = vpop.f32.mrf.mxu2  ;;  %1339 = vrot.lane.b32.xlu0 %v3811_v29, %s4867_s8  ;;  %v564_v36 = vpop.f32.mrf.mxu0  ;;  %v4051_v45 = vor.u32 %v4250_v42, %v4050_v44  ;;  %v3862_v18 = vld [vmem:[#allocation2 + $0x8] sm:$0xf] }
 0x14d   : > { %v661_v35 = vadd.f32 %v660_v32, %v5060_v40  ;;  %1395 = vrot.lane.b32.xlu1 %v3843_v30, %s4867_s8  ;;  %2046 = vrot.lane.b32.xlu2 %v3947_v31, %s4866_s27  ;;  %v565_v37 = vadd.f32 %v564_v36, %v5054_v33  ;;  %v613_v38 = vpop.f32.mrf.mxu1  ;;  %v4215_v32 = vld [vmem:[#allocation2 + $0x38] sm:$0xf0] }
 0x14e   : > { %v614_v41 = vadd.f32 %v613_v38, %v5056_v34 }
 0x14f   : > { %v695_v39 = vpack.c.bf16 %v661_v35, %v661_v35  ;;  %v4242_v35 = vld [vmem:[#allocation2 + $0x80] sm:$0xf0] }
 0x150   : > { %v696_v43 = vpack.c.bf16 %v614_v41, %v565_v37 }
 0x151   : > { %727 = vst [vmem:[#allocation2 + $0x98] sm:$0xf] %v695_v39  ;;  %v3846_v53 = vld [vmem:[#allocation2 + $0x94] sm:$0xf]  ;;  %v3814_v56 = vld [vmem:[#allocation2 + $0x90] sm:$0xf] }
 0x152   : > { %728 = vst [vmem:[#allocation2 + $0x9c] sm:$0xff] %v696_v43  ;;  %v4054_v55 = vld [vmem:[#allocation2 + $0x94] sm:$0xf] }
 0x153   : > { %v3950_v10 = vld [vmem:[#allocation2 + $0x94] sm:$0xf] }
 0x154   : > { %v662_v46 = vpop.f32.mrf.mxu2  ;;  %v567_v48 = vpop.f32.mrf.mxu0  ;;  %v3742_v36 = vld [vmem:[#allocation2 + $0x94] sm:$0xf] }
 0x155   : > { %v663_v47 = vadd.f32 %v662_v46, %v5060_v40  ;;  %2697 = vrot.lane.b32.xlu1 %v4051_v45, %s4868_s26  ;;  %v568_v49 = vadd.f32 %v567_v48, %v5054_v33  ;;  %v616_v50 = vpop.f32.mrf.mxu1  ;;  %v3902_v45 = vld [vmem:[#allocation2 + $0x30] sm:$0xf]  ;;  %v4018_v46 = vld [vmem:[#allocation2 + $0x78] sm:$0xf] }
 0x156   : > { %v617_v52 = vadd.f32 %v616_v50, %v5056_v34  ;;  %v4019_v48 = vor.u32 %v4242_v35, %v4018_v46  ;;  %v3870_v35 = vld [vmem:[#allocation2 + $0x38] sm:$0xf]  ;;  %v3758_v46 = vld [vmem:[#allocation2 + $0x8] sm:$0xf] }
 0x157   : > { %v697_v51 = vpack.c.bf16 %v663_v47, %v663_v47  ;;  %v3903_v47 = vor.u32 %v4215_v32, %v3902_v45 }
 0x158   : > { %v698_v54 = vpack.c.bf16 %v617_v52, %v568_v49  ;;  %v3782_v39 = vld [vmem:[#allocation2 + $0x98] sm:$0xf]  ;;  %v3918_v49 = vld [vmem:[#allocation2 + $0x90] sm:$0xf] }
 0x159   : > { %729 = vst [vmem:[#allocation2 + $0xa4] sm:$0xf] %v697_v51  ;;  %v4203_v57 = vld [vmem:[#allocation2 + $0x9c] sm:$0xf0]  ;;  %v4195_v59 = vld [vmem:[#allocation2 + $0x98] sm:$0xf0] }
 0x15a   : > { %v4251_v58 = vld [vmem:[#allocation2 + $0x9c] sm:$0xf0]  ;;  %730 = vst [vmem:[#allocation2 + $0xa8] sm:$0xff] %v698_v54  ;;  %v3847_v60 = vor.u32 %v4203_v57, %v3846_v53  ;;  %v3815_v62 = vor.u32 %v4195_v59, %v3814_v56  ;;  %v4219_v43 = vld [vmem:[#allocation2 + $0x98] sm:$0xf0] }
 0x15b   : > { %v4055_v61 = vor.u32 %v4251_v58, %v4054_v55  ;;  %v4227_v6 = vld [vmem:[#allocation2 + $0x9c] sm:$0xf0]  ;;  %v3919_v51 = vor.u32 %v4219_v43, %v3918_v49  ;;  %v4186_v54 = vld [vmem:[#allocation2 + $0x88] sm:$0xf0]  ;;  %v4178_v55 = vld [vmem:[#allocation2 + $0x84] sm:$0xf0] }
 0x15c   : > { %v665_v63 = vpop.f32.mrf.mxu2  ;;  %1397 = vrot.lane.b32.xlu0 %v3847_v60, %s4867_s8  ;;  %v569_v1 = vpop.f32.mrf.mxu0  ;;  %1341 = vrot.lane.b32.xlu2 %v3815_v62, %s4867_s8  ;;  %v3951_v12 = vor.u32 %v4227_v6, %v3950_v10  ;;  %v4179_v31 = vld [vmem:[#allocation2 + $0x9c] sm:$0xf0]  ;;  %v4240_v57 = vld [vmem:[#allocation2 + $0x50] sm:$0xf0]  ;;  %v4210_v59 = vld [vmem:[#allocation2 + $0x88] sm:$0xf0] }
 0x15d   : > { %v666_v0 = vadd.f32 %v665_v63, %v5060_v40  ;;  %2699 = vrot.lane.b32.xlu1 %v4055_v61, %s4868_s26  ;;  %v570_v2 = vadd.f32 %v569_v1, %v5054_v33  ;;  %v618_v3 = vpop.f32.mrf.mxu1  ;;  %v5141_v33 = vpop.permute.xlu2 %1329  ;;  %v3743_v44 = vor.u32 %v4179_v31, %v3742_v36  ;;  %v3778_v53 = vld [vmem:[#allocation2 + $0x80] sm:$0xf]  ;;  %v3738_v60 = vld [vmem:[#allocation2 + $0x7c] sm:$0xf]  ;;  %v4010_v1 = vld [vmem:[#allocation2 + $0x48] sm:$0xf] }
 0x15e   : > { %v619_v5 = vadd.f32 %v618_v3, %v5056_v34  ;;  %v3882_v58 = vld [vmem:[#allocation2 + $0x80] sm:$0xf]  ;;  %v3779_v61 = vor.u32 %v4186_v54, %v3778_v53  ;;  %v4243_v62 = vld [vmem:[#allocation2 + $0x98] sm:$0xf0]  ;;  %v3739_v63 = vor.u32 %v4178_v55, %v3738_v60  ;;  %v4185_v3 = vld [vmem:[#allocation2 + $0x70] sm:$0xf0] }
 0x15f   : > { %v699_v4 = vpack.c.bf16 %v666_v0, %v666_v0  ;;  %v906_v52 = vsel %vm862_vm0, %v3743_v44, 0  ;;  %v4022_v6 = vld [vmem:[#allocation2 + $0x90] sm:$0xf]  ;;  %v4176_v31 = vld [vmem:[#allocation2 + $0x54] sm:$0xf0] }
 0x160   : > { %v700_v8 = vpack.c.bf16 %v619_v5, %v570_v2  ;;  %v4187_v41 = vld [vmem:[#allocation2 + $0xa0] sm:$0xf0]  ;;  %v3774_v2 = vld [vmem:[#allocation2 + $0x68] sm:$0xf]  ;;  %v3883_v5 = vor.u32 %v4210_v59, %v3882_v58  ;;  %v4023_v7 = vor.u32 %v4243_v62, %v4022_v6  ;;  %v3770_v10 = vld [vmem:[#allocation2 + $0x50] sm:$0xf] }
 0x161   : > { %731 = vst [vmem:[#allocation2 + $0xb0] sm:$0xf] %v699_v4  ;;  %v3850_v20 = vld [vmem:[#allocation2 + $0xac] sm:$0xf]  ;;  %v3783_v50 = vor.u32 %v4187_v41, %v3782_v39  ;;  %v4011_v4 = vor.u32 %v4240_v57, %v4010_v1  ;;  %v3775_v9 = vor.u32 %v4185_v3, %v3774_v2  ;;  %v4211_v39 = vld [vmem:[#allocation2 + $0xa0] sm:$0xf0] }
 0x162   : > { %732 = vst [vmem:[#allocation2 + $0xb4] sm:$0xff] %v700_v8  ;;  %v3746_v23 = vld [vmem:[#allocation2 + $0xac] sm:$0xf]  ;;  %v903_v8 = vsel %vm862_vm0, %v3739_v63, 0  ;;  %v4207_v41 = vld [vmem:[#allocation2 + $0x40] sm:$0xf0] }
 0x163   : > { %v3730_v36 = vld [vmem:[#allocation2 + $0x4c] sm:$0xf]  ;;  %v4094_v43 = vld [vmem:[#allocation2 + $0x98] sm:$0xf]  ;;  %v4259_v44 = vld [vmem:[#allocation2 + $0xa0] sm:$0xf0] }
 0x164   : > { %v667_v15 = vpop.f32.mrf.mxu2  ;;  %2048 = vrot.lane.b32.xlu0 %v3951_v12, %s4866_s27  ;;  %1986 = vrot.lane.b32.xlu2 %v3907_v16, %s4866_s27  ;;  %v4177_v12 = vld [vmem:[#allocation2 + $0x6c] sm:$0xf0]  ;;  %v4209_v16 = vld [vmem:[#allocation2 + $0x70] sm:$0xf0]  ;;  %v3731_v45 = vor.u32 %v4176_v31, %v3730_v36  ;;  %v4175_v55 = vld [vmem:[#allocation2 + $0x3c] sm:$0xf0] }
 0x165   : > { %v668_v17 = vadd.f32 %v667_v15, %v5060_v40  ;;  %2635 = vrot.lane.b32.xlu1 %v4007_v13, %s4868_s26  ;;  %v3914_v40 = vld [vmem:[#allocation2 + $0x78] sm:$0xf]  ;;  %v5148_v37 = vpop.permute.xlu2 %1980  ;;  %v3734_v13 = vld [vmem:[#allocation2 + $0x64] sm:$0xf]  ;;  %v3878_v15 = vld [vmem:[#allocation2 + $0x68] sm:$0xf] }
 0x166   : > { %v3915_v28 = vor.u32 %v4218_v21, %v3914_v40  ;;  %v4014_v21 = vld [vmem:[#allocation2 + $0x60] sm:$0xf]  ;;  %v3863_v40 = vor.u32 %v4205_v19, %v3862_v18  ;;  %v3874_v57 = vld [vmem:[#allocation2 + $0x50] sm:$0xf]  ;;  %v3726_v58 = vld [vmem:[#allocation2 + $0x34] sm:$0xf] }
 0x167   : > { %v701_v34 = vpack.c.bf16 %v668_v17, %v668_v17  ;;  %v4208_v59 = vld [vmem:[#allocation2 + $0x58] sm:$0xf0]  ;;  %v3986_v60 = vld [vmem:[#allocation2 + $0x80] sm:$0xf]  ;;  %v3990_v63 = vld [vmem:[#allocation2 + $0x98] sm:$0xf]  ;;  %v3727_v2 = vor.u32 %v4175_v55, %v3726_v58 }
 0x168   : > { %v3786_v30 = vld [vmem:[#allocation2 + $0xb0] sm:$0xf]  ;;  %v4235_v1 = vld [vmem:[#allocation2 + $0xa0] sm:$0xf0] }
 0x169   : > { %733 = vst [vmem:[#allocation2 + $0xbc] sm:$0xf] %v701_v34  ;;  %v4204_v22 = vld [vmem:[#allocation2 + $0xb4] sm:$0xf0]  ;;  %v3771_v34 = vor.u32 %v4184_v11, %v3770_v10  ;;  %v3991_v6 = vor.u32 %v4235_v1, %v3990_v63  ;;  %v3722_v10 = vld [vmem:[#allocation2 + $0x1c] sm:$0xf] }
 0x16a   : > { %v4180_v24 = vld [vmem:[#allocation2 + $0xb4] sm:$0xf0]  ;;  %v3851_v25 = vor.u32 %v4204_v22, %v3850_v20  ;;  %v3735_v20 = vor.u32 %v4177_v12, %v3734_v13  ;;  %v4206_v12 = vld [vmem:[#allocation2 + $0x28] sm:$0xf0]  ;;  %v4082_v13 = vld [vmem:[#allocation2 + $0x50] sm:$0xf] }
 0x16b   : > { %v3747_v27 = vor.u32 %v4180_v24, %v3746_v23  ;;  %v3766_v22 = vld [vmem:[#allocation2 + $0x38] sm:$0xf]  ;;  %v4183_v23 = vld [vmem:[#allocation2 + $0x40] sm:$0xf0]  ;;  %v4015_v24 = vor.u32 %v4241_v14, %v4014_v21  ;;  %v4256_v14 = vld [vmem:[#allocation2 + $0x58] sm:$0xf0] }
 0x16c   : > { %1399 = vrot.lane.b32.xlu0 %v3851_v25, %s4867_s8  ;;  %1990 = vrot.lane.b32.xlu2 %v3915_v28, %s4866_s27  ;;  %v3879_v25 = vor.u32 %v4209_v16, %v3878_v15  ;;  %v3767_v28 = vor.u32 %v4183_v23, %v3766_v22  ;;  %v4252_v15 = vld [vmem:[#allocation2 + $0xb4] sm:$0xf0]  ;;  %v4083_v19 = vor.u32 %v4256_v14, %v4082_v13  ;;  %v3954_v63 = vld [vmem:[#allocation2 + $0xac] sm:$0xf]  ;;  %v4026_v1 = vld [vmem:[#allocation2 + $0xa8] sm:$0xf] }
 0x16d   : > { %1988 = vrot.lane.b32.xlu1 %v3911_v26, %s4866_s27  ;;  %v909_v29 = vsel %vm862_vm0, %v3747_v27, 0  ;;  %v5156_v0 = vpop.permute.xlu2 %2689  ;;  %v900_v27 = vsel %vm862_vm0, %v3735_v20, 0  ;;  %v4058_v20 = vld [vmem:[#allocation2 + $0xac] sm:$0xf] }
 0x16e   : > { %911 = vmatpush.bf16.xpose.msra.mxu3 %v909_v29  ;;  %v3762_v29 = vld [vmem:[#allocation2 + $0x20] sm:$0xf]  ;;  %v5170_v32 = vpop.permute.xlu0 %2036  ;;  %v4059_v21 = vor.u32 %v4252_v15, %v4058_v20  ;;  %v4166_v15 = vld [vmem:[#allocation2 + $0x20] sm:$0xf0]  ;;  %v4098_v20 = vld [vmem:[#allocation2 + $0xb0] sm:$0xf] }
 0x16f   : > { %v5154_v56 = vpop.permute.xlu1 %1385 }
 0x170   : > { %v4188_v38 = vld [vmem:[#allocation2 + $0xb8] sm:$0xf0] }
 0x171   : > { %v3787_v42 = vor.u32 %v4188_v38, %v3786_v30  ;;  %v4182_v30 = vld [vmem:[#allocation2 + $0x28] sm:$0xf0]  ;;  %v3886_v38 = vld [vmem:[#allocation2 + $0x98] sm:$0xf] }
 0x172   : > { %v3887_v49 = vor.u32 %v4211_v39, %v3886_v38  ;;  %v3922_v39 = vld [vmem:[#allocation2 + $0xa8] sm:$0xf] }
 0x173   : > { %1176 = vmatpush.bf16.msrb.mxu0 %v3787_v42  ;;  %v3763_v42 = vor.u32 %v4182_v30, %v3762_v29  ;;  %v4233_v29 = vld [vmem:[#allocation2 + $0x70] sm:$0xf0] }
 0x174   : > { %1984 = vrot.lane.b32.xlu0 %v3903_v47, %s4866_s27  ;;  %1992 = vrot.lane.b32.xlu2 %v3919_v51, %s4866_s27  ;;  %v4181_v47 = vld [vmem:[#allocation2 + $0x10] sm:$0xf0]  ;;  %v4095_v51 = vor.u32 %v4259_v44, %v4094_v43 }
 0x175   : > { %2641 = vrot.lane.b32.xlu1 %v4019_v48, %s4868_s26  ;;  %v5164_v26 = vpop.permute.xlu2 %2633  ;;  %v3759_v53 = vor.u32 %v4181_v47, %v3758_v46  ;;  %v4220_v30 = vld [vmem:[#allocation2 + $0xb0] sm:$0xf0] }
 0x176   : > { %912 = vmatpush.bf16.xpose.msra.mxu3 %v906_v52  ;;  %v897_v52 = vsel %vm862_vm0, %v3731_v45, 0  ;;  %v5180_v62 = vpop.permute.xlu0 %2631  ;;  %v4086_v45 = vld [vmem:[#allocation2 + $0x68] sm:$0xf]  ;;  %v4257_v46 = vld [vmem:[#allocation2 + $0x70] sm:$0xf0] }
 0x177   : > { %1177 = vmatpush.bf16.msrb.mxu0 %v3783_v50  ;;  %v5162_v17 = vpop.permute.xlu1 %2687  ;;  %v3871_v50 = vor.u32 %v4207_v41, %v3870_v35  ;;  %v3923_v41 = vor.u32 %v4220_v30, %v3922_v39  ;;  %v4196_v47 = vld [vmem:[#allocation2 + $0xb0] sm:$0xf0]  ;;  %v3694_v30 = vld [vmem:[#allocation2 + $0x30] sm:$0xf] }
 0x17b   : > { %1178 = vmatpush.bf16.msrb.mxu0 %v3779_v61  ;;  %v4234_v61 = vld [vmem:[#allocation2 + $0x88] sm:$0xf0] }
 0x17c   : > { %2637 = vrot.lane.b32.xlu0 %v4011_v4, %s4868_s26  ;;  %2643 = vrot.lane.b32.xlu2 %v4023_v7, %s4868_s26  ;;  %v3875_v4 = vor.u32 %v4208_v59, %v3874_v57  ;;  %v894_v7 = vsel %vm862_vm0, %v3727_v2, 0 }
 0x17d   : > { %1748 = vrot.lane.b32.xlu1 %v3883_v5, %s4867_s8  ;;  %v5177_v54 = vpop.permute.xlu2 %1389  ;;  %v3987_v5 = vor.u32 %v4234_v61, %v3986_v60  ;;  %v4228_v60 = vld [vmem:[#allocation2 + $0xb4] sm:$0xf0]  ;;  %v4244_v61 = vld [vmem:[#allocation2 + $0xb0] sm:$0xf0] }
 0x17e   : > { %913 = vmatpush.bf16.xpose.msra.mxu3 %v903_v8  ;;  %v4174_v8 = vld [vmem:[#allocation2 + $0x24] sm:$0xf0]  ;;  %v3955_v2 = vor.u32 %v4228_v60, %v3954_v63  ;;  %v4169_v63 = vld [vmem:[#allocation2 + $0x68] sm:$0xf0] }
 0x17f   : > { %1179 = vmatpush.bf16.msrb.mxu0 %v3775_v9  ;;  %v5172_v48 = vpop.permute.xlu1 %1982  ;;  %v3866_v9 = vld [vmem:[#allocation2 + $0x20] sm:$0xf]  ;;  %v3723_v16 = vor.u32 %v4174_v8, %v3722_v10  ;;  %v3994_v8 = vld [vmem:[#allocation2 + $0xb0] sm:$0xf] }
 0x180   : > { %v3867_v18 = vor.u32 %v4206_v12, %v3866_v9  ;;  %v4236_v9 = vld [vmem:[#allocation2 + $0xb8] sm:$0xf0] }
 0x181   : > { %v891_v23 = vsel %vm862_vm0, %v3723_v16, 0  ;;  %v3995_v14 = vor.u32 %v4236_v9, %v3994_v8  ;;  %v3690_v16 = vld [vmem:[#allocation2 + $0x18] sm:$0xf] }
 0x183   : > { %1180 = vmatpush.bf16.msrb.mxu0 %v3771_v34  ;;  %v5190_v34 = vpop.permute.xlu0 %1387 }
 0x184   : > { %2639 = vrot.lane.b32.xlu0 %v4015_v24, %s4868_s26  ;;  %1738 = vrot.lane.b32.xlu2 %v3863_v40, %s4867_s8  ;;  %v4173_v24 = vld [vmem:[#allocation2 + $0xc] sm:$0xf0]  ;;  %v3718_v40 = vld [vmem:[#allocation2 + $0x4] sm:$0xf] }
 0x185   : > { %1746 = vrot.lane.b32.xlu1 %v3879_v25, %s4867_s8  ;;  %v5188_v11 = vpop.permute.xlu2 %2691  ;;  %v3982_v25 = vld [vmem:[#allocation2 + $0x68] sm:$0xf]  ;;  %v3719_v31 = vor.u32 %v4173_v24, %v3718_v40 }
 0x186   : > { %914 = vmatpush.bf16.xpose.msra.mxu3 %v900_v27  ;;  %v4090_v27 = vld [vmem:[#allocation2 + $0x80] sm:$0xf]  ;;  %v3983_v38 = vor.u32 %v4233_v29, %v3982_v25  ;;  %v4167_v29 = vld [vmem:[#allocation2 + $0x38] sm:$0xf0] }
 0x187   : > { %1181 = vmatpush.bf16.msrb.mxu0 %v3767_v28  ;;  %v4258_v28 = vld [vmem:[#allocation2 + $0x88] sm:$0xf0]  ;;  %v888_v43 = vsel %vm862_vm0, %v3719_v31, 0  ;;  %v3695_v31 = vor.u32 %v4167_v29, %v3694_v30 }
 0x188   : > { %v4091_v36 = vor.u32 %v4258_v28, %v4090_v27 }
 0x18b   : > { %1182 = vmatpush.bf16.msrb.mxu0 %v3763_v42  ;;  %v5200_v42 = vpop.permute.xlu0 %1331 }
 0x18c   : > { %1750 = vrot.lane.b32.xlu0 %v3887_v49, %s4867_s8  ;;  %3052 = vrot.lane.b32.xlu2 %v4095_v51, %s4868_s26  ;;  %v4165_v49 = vld [vmem:[#allocation2 + $0x8] sm:$0xf0]  ;;  %v4087_v51 = vor.u32 %v4257_v46, %v4086_v45  ;;  %v4168_v45 = vld [vmem:[#allocation2 + $0x50] sm:$0xf0] }
 0x18d   : > { %1742 = vrot.lane.b32.xlu1 %v3871_v50, %s4867_s8  ;;  %v5198_v35 = vpop.permute.xlu2 %1391  ;;  %v3818_v50 = vld [vmem:[#allocation2 + $0xa8] sm:$0xf] }
 0x18e   : > { %915 = vmatpush.bf16.xpose.msra.mxu3 %v897_v52  ;;  %v5182_v3 = vpop.permute.xlu1 %1333  ;;  %v3819_v52 = vor.u32 %v4196_v47, %v3818_v50  ;;  %v3698_v47 = vld [vmem:[#allocation2 + $0x48] sm:$0xf] }
 0x18f   : > { %1183 = vmatpush.bf16.msrb.mxu0 %v3759_v53  ;;  %v3686_v53 = vld [vmem:[#allocation2] sm:$0xf] }
 0x190   : > { %v3687_v57 = vor.u32 %v4165_v49, %v3686_v53  ;;  %v3699_v49 = vor.u32 %v4168_v45, %v3698_v47  ;;  %v3710_v45 = vld [vmem:[#allocation2 + $0x90] sm:$0xf] }
 0x193   : > { %v5213_v58 = vpop.permute.xlu0 %2038 }
 0x194   : > { %1744 = vrot.lane.b32.xlu0 %v3875_v4, %s4867_s8  ;;  %2401 = vrot.lane.b32.xlu2 %v3991_v6, %s4866_s27  ;;  %v4027_v4 = vor.u32 %v4244_v61, %v4026_v1  ;;  %v3702_v1 = vld [vmem:[#allocation2 + $0x60] sm:$0xf] }
 0x195   : > { %2399 = vrot.lane.b32.xlu1 %v3987_v5, %s4866_s27  ;;  %v5208_v55 = vpop.permute.xlu2 %1335  ;;  %v3890_v5 = vld [vmem:[#allocation2 + $0xb0] sm:$0xf] }
 0x196   : > { %916 = vmatpush.bf16.xpose.msra.mxu3 %v894_v7  ;;  %v5192_v22 = vpop.permute.xlu1 %2040  ;;  %v4212_v7 = vld [vmem:[#allocation2 + $0xb8] sm:$0xf0] }
 0x197   : > { %v3891_v13 = vor.u32 %v4212_v7, %v3890_v5 }
 0x19c   : > { %1740 = vrot.lane.b32.xlu0 %v3867_v18, %s4867_s8  ;;  %2701 = vrot.lane.b32.xlu2 %v4059_v21, %s4868_s26  ;;  %v3691_v18 = vor.u32 %v4166_v15, %v3690_v16  ;;  %v4260_v21 = vld [vmem:[#allocation2 + $0xb8] sm:$0xf0]  ;;  %v4170_v16 = vld [vmem:[#allocation2 + $0x80] sm:$0xf0] }
 0x19d   : > { %3046 = vrot.lane.b32.xlu1 %v4083_v19, %s4868_s26  ;;  %v5219_v6 = vpop.permute.xlu2 %2044  ;;  %v4099_v25 = vor.u32 %v4260_v21, %v4098_v20 }
 0x19e   : > { %917 = vmatpush.bf16.xpose.msra.mxu3 %v891_v23  ;;  %v5221_v10 = vpop.permute.xlu0 %2693 }
 0x19f   : > { %v5206_v44 = vpop.permute.xlu1 %2042 }
 0x1a4   : > { %3050 = vrot.lane.b32.xlu0 %v4091_v36, %s4868_s26  ;;  %1994 = vrot.lane.b32.xlu2 %v3923_v41, %s4866_s27 }
 0x1a5   : > { %2397 = vrot.lane.b32.xlu1 %v3983_v38, %s4866_s27 }
 0x1a6   : > { %918 = vmatpush.bf16.xpose.msra.mxu3 %v888_v43 }
 0x1a7   : > { %v5227_v19 = vpop.permute.xlu2 %2046 }
 0x1ac   : > { %3048 = vrot.lane.b32.xlu0 %v4087_v51, %s4868_s26 }
 0x1ad   : > { %1343 = vrot.lane.b32.xlu1 %v3819_v52, %s4867_s8  ;;  %3748 = vmatmul.msk.bf16.vlgmr.msra.gmra.mxu3 %vm862_vm0, %v3687_v57 }
 0x1ae   : > { %v5230_v23 = vpop.permute.xlu0 %2695 }
 0x1af   : > { %v5215_v59 = vpop.permute.xlu1 %1393 }
 0x1b0   : > { %v1438_v15 = vsel %vm862_vm0, %v5215_v59, 0  ;;  %v1432_v59 = vsel %vm862_vm0, %v5177_v54, 0  ;;  %v1426_v54 = vsel %vm862_vm0, %v5154_v56, 0 }
 0x1b4   : > { %2050 = vrot.lane.b32.xlu0 %v3955_v2, %s4866_s27  ;;  %v3703_v2 = vor.u32 %v4169_v63, %v3702_v1 }
 0x1b5   : > { %2645 = vrot.lane.b32.xlu1 %v4027_v4, %s4868_s26 }
 0x1b6   : > { %v5233_v40 = vpop.permute.xlu2 %1341 }
 0x1b7   : > { %v5223_v12 = vpop.permute.xlu1 %1337 }
 0x1bc   : > { %1752 = vrot.lane.b32.xlu0 %v3891_v13, %s4867_s8 }
 0x1bd   : > { %2403 = vrot.lane.b32.xlu1 %v3995_v14, %s4866_s27  ;;  %3749 = vmatmul.msk.bf16.gmra.mxu3 %vm862_vm0, %v3691_v18  ;;  %v3706_v18 = vld [vmem:[#allocation2 + $0x78] sm:$0xf] }
 0x1be   : > { %v5235_v27 = vpop.permute.xlu0 %1339  ;;  %v5242_v39 = vpop.permute.xlu2 %1986  ;;  %v3707_v20 = vor.u32 %v4170_v16, %v3706_v18 }
 0x1bf   : > { %v1396_v24 = vpop.permute.xlu1 %1395 }
 0x1c0   : > { %v1441_v8 = vsel %vm862_vm0, %v1396_v24, 0  ;;  %v1435_v24 = vsel %vm862_vm0, %v5198_v35, 0  ;;  %v1429_v35 = vsel %vm862_vm0, %v5190_v34, 0 }
 0x1c4   : > { %3054 = vrot.lane.b32.xlu0 %v4099_v25, %s4868_s26 }
 0x1c6   : > { %v5248_v46 = vpop.permute.xlu2 %1990 }
 0x1c7   : > { %v5237_v28 = vpop.permute.xlu1 %2697 }
 0x1cd   : > { %3750 = vmatmul.msk.bf16.gmra.mxu3 %vm862_vm0, %v3695_v31 }
 0x1ce   : > { %v1398_v36 = vpop.permute.xlu0 %1397  ;;  %v5254_v53 = vpop.permute.xlu2 %1992 }
 0x1cf   : > { %v5240_v38 = vpop.permute.xlu1 %2699  ;;  %v1444_v61 = vsel %vm862_vm0, %v1398_v36, 0  ;;  %v4171_v36 = vld [vmem:[#allocation2 + $0x98] sm:$0xf0] }
 0x1d6   : > { %v5244_v41 = vpop.permute.xlu0 %2048  ;;  %v5261_v4 = vpop.permute.xlu2 %2643 }
 0x1d7   : > { %v5246_v43 = vpop.permute.xlu1 %2635 }
 0x1dd   : > { %3751 = vmatmul.msk.bf16.gmra.mxu3 %vm862_vm0, %v3699_v49  ;;  %v3711_v49 = vor.u32 %v4171_v36, %v3710_v45  ;;  %v2743_v36 = vsel %vm862_vm0, %v5237_v28, 0 }
 0x1de   : > { %v1400_v50 = vpop.permute.xlu0 %1399  ;;  %v5273_v14 = vpop.permute.xlu2 %1738 }
 0x1df   : > { %v5251_v51 = vpop.permute.xlu1 %1988  ;;  %v1447_v52 = vsel %vm862_vm0, %v1400_v50, 0 }
 0x1e0   : > { %1449 = vmatpush.bf16.xpose.msrb.mxu1 %v1447_v52 }
 0x1e6   : > { %v5256_v57 = vpop.permute.xlu0 %1984  ;;  %v5282_v29 = vpop.permute.xlu2 %3052 }
 0x1e7   : > { %v5258_v60 = vpop.permute.xlu1 %2641 }
 0x1e8   : > { %1450 = vmatpush.bf16.xpose.msrb.mxu1 %v1444_v61 }
 0x1ed   : > { %3752 = vmatmul.msk.bf16.gmra.mxu3 %vm862_vm0, %v3703_v2 }
 0x1ee   : > { %v5264_v5 = vpop.permute.xlu0 %2637  ;;  %v2402_v47 = vpop.permute.xlu2 %2401 }
 0x1ef   : > { %v5266_v7 = vpop.permute.xlu1 %1748 }
 0x1f0   : > { %1451 = vmatpush.bf16.xpose.msrb.mxu1 %v1441_v8  ;;  %v4172_v8 = vld [vmem:[#allocation2 + $0xb0] sm:$0xf0] }
 0x1f6   : > { %v5269_v9 = vpop.permute.xlu0 %2639  ;;  %v2702_v61 = vpop.permute.xlu2 %2701 }
 0x1f7   : > { %v5271_v13 = vpop.permute.xlu1 %1746  ;;  %v2749_v2 = vsel %vm862_vm0, %v2702_v61, 0 }
 0x1f8   : > { %1452 = vmatpush.bf16.xpose.msrb.mxu1 %v1438_v15  ;;  %v3714_v15 = vld [vmem:[#allocation2 + $0xa8] sm:$0xf] }
 0x1f9   : > { %v3715_v16 = vor.u32 %v4172_v8, %v3714_v15 }
 0x1fd   : > { %3753 = vmatmul.msk.bf16.gmra.mxu3 %vm862_vm0, %v3707_v20  ;;  %v2746_v20 = vsel %vm862_vm0, %v5240_v38, 0 }
 0x1fe   : > { %v1751_v21 = vpop.permute.xlu0 %1750 }
 0x1ff   : > { %v5278_v25 = vpop.permute.xlu1 %1742 }
 0x200   : > { %1453 = vmatpush.bf16.xpose.msrb.mxu1 %v1435_v24 }
 0x206   : > { %v1745_v30 = vpop.permute.xlu0 %1744 }
 0x207   : > { %v2400_v31 = vpop.permute.xlu1 %2399 }
 0x208   : > { %1454 = vmatpush.bf16.xpose.msrb.mxu1 %v1432_v59 }
 0x20d   : > { %3754 = vmatmul.msk.bf16.gmra.mxu3 %vm862_vm0, %v3711_v49 }
 0x20e   : > { %v1741_v50 = vpop.permute.xlu0 %1740 }
 0x20f   : > { %v5287_v52 = vpop.permute.xlu1 %3046 }
 0x210   : > { %1455 = vmatpush.bf16.xpose.msrb.mxu1 %v1429_v35  ;;  %v2740_v35 = vsel %vm862_vm0, %v5230_v23, 0 }
 0x216   : > { %v5291_v63 = vpop.permute.xlu0 %3050 }
 0x217   : > { %v2398_v1 = vpop.permute.xlu1 %2397 }
 0x218   : > { %1456 = vmatpush.bf16.xpose.msrb.mxu1 %v1426_v54 }
 0x21d   : > { %3755 = vmatmul.msk.bf16.gmra.mxu3 %vm862_vm0, %v3715_v16 }
 0x21e   : > { %v5297_v18 = vpop.permute.xlu0 %3048 }
 0x21f   : > { %v5299_v34 = vpop.permute.xlu1 %1343  ;;  %3852 = vmatmul.msk.bf16.vlgmr.msrb.gmra.mxu1 %vm862_vm0, %v5141_v33  ;;  %v2095_v33 = vsel %vm862_vm0, %v5244_v41, 0  ;;  %v2737_v41 = vsel %vm862_vm0, %v5221_v10, 0  ;;  %v2086_v10 = vsel %vm862_vm0, %v5206_v44, 0 }
 0x220   : > { %2751 = vmatpush.bf16.xpose.msra.mxu1 %v2749_v2 }
 0x226   : > { %v2051_v56 = vpop.permute.xlu0 %2050 }
 0x227   : > { %v5305_v24 = vpop.permute.xlu1 %2645  ;;  %v2098_v59 = vsel %vm862_vm0, %v2051_v56, 0 }
 0x228   : > { %2752 = vmatpush.bf16.xpose.msra.mxu1 %v2746_v20  ;;  %2100 = vmatpush.bf16.xpose.msrb.mxu3 %v2098_v59 }
 0x22e   : > { %v1753_v45 = vpop.permute.xlu0 %1752 }
 0x22f   : > { %v2404_v49 = vpop.permute.xlu1 %2403  ;;  %3853 = vmatmul.msk.bf16.gmra.mxu1 %vm862_vm0, %v5200_v42  ;;  %1762 = vmatpush.bf16.msrb.mxu2 %v1753_v45  ;;  %v2092_v42 = vsel %vm862_vm0, %v5227_v19, 0  ;;  %v2089_v19 = vsel %vm862_vm0, %v5219_v6, 0  ;;  %v2731_v6 = vsel %vm862_vm0, %v5156_v0, 0  ;;  %v2728_v0 = vsel %vm862_vm0, %v5162_v17, 0 }
 0x230   : > { %2753 = vmatpush.bf16.xpose.msra.mxu1 %v2743_v36  ;;  %v5314_v38 = vpop.f32.mrf.mxu3  ;;  %2413 = vmatpush.bf16.msra.mxu0 %v2404_v49  ;;  %v2077_v17 = vsel %vm862_vm0, %v5170_v32, 0 }
 0x231   : > { %2101 = vmatpush.bf16.xpose.msrb.mxu3 %v2095_v33  ;;  %960 = vmax.xlane.f32.xlu2 %v5314_v38 }
 0x233   : > { %1763 = vmatpush.bf16.msrb.mxu2 %v1751_v21 }
 0x234   : > { %2414 = vmatpush.bf16.msra.mxu0 %v2402_v47 }
 0x237   : > { %1764 = vmatpush.bf16.msrb.mxu2 %v5266_v7  ;;  %v2734_v7 = vsel %vm862_vm0, %v5188_v11, 0  ;;  %v2083_v11 = vsel %vm862_vm0, %v5192_v22, 0 }
 0x238   : > { %2754 = vmatpush.bf16.xpose.msra.mxu1 %v2740_v35  ;;  %v5322_v28 = vpop.f32.mrf.mxu3  ;;  %2415 = vmatpush.bf16.msra.mxu0 %v2400_v31 }
 0x239   : > { %2102 = vmatpush.bf16.xpose.msrb.mxu3 %v2092_v42  ;;  %962 = vmax.xlane.f32.xlu1 %v5322_v28 }
 0x23b   : > { %1765 = vmatpush.bf16.msrb.mxu2 %v5271_v13  ;;  %v3055_v13 = vpop.permute.xlu0 %3054 }
 0x23c   : > { %2416 = vmatpush.bf16.msra.mxu0 %v2398_v1 }
 0x23f   : > { %3854 = vmatmul.msk.bf16.gmra.mxu1 %vm862_vm0, %v5182_v3  ;;  %1766 = vmatpush.bf16.msrb.mxu2 %v1745_v30 }
 0x240   : > { %2755 = vmatpush.bf16.xpose.msra.mxu1 %v2737_v41  ;;  %v5332_v23 = vpop.f32.mrf.mxu3 }
 0x241   : > { %2103 = vmatpush.bf16.xpose.msrb.mxu3 %v2089_v19  ;;  %964 = vmax.xlane.f32.xlu0 %v5332_v23 }
 0x243   : > { %1767 = vmatpush.bf16.msrb.mxu2 %v5278_v25 }
 0x247   : > { %1768 = vmatpush.bf16.msrb.mxu2 %v1741_v50 }
 0x248   : > { %2756 = vmatpush.bf16.xpose.msra.mxu1 %v2734_v7  ;;  %v5340_v3 = vpop.f32.mrf.mxu3 }
 0x249   : > { %2104 = vmatpush.bf16.xpose.msrb.mxu3 %v2086_v10  ;;  %966 = vmax.xlane.f32.xlu1 %v5340_v3 }
 0x24b   : > { %1769 = vmatpush.bf16.msrb.mxu2 %v5273_v14  ;;  %v2080_v14 = vsel %vm862_vm0, %v5213_v58, 0 }
 0x24f   : > { %3064 = vmatpush.bf16.msra.mxu2 %v3055_v13  ;;  %3855 = vmatmul.msk.bf16.gmra.mxu1 %vm862_vm0, %v5208_v55 }
 0x250   : > { %2757 = vmatpush.bf16.xpose.msra.mxu1 %v2731_v6  ;;  %v5350_v44 = vpop.f32.mrf.mxu3 }
 0x251   : > { %2105 = vmatpush.bf16.xpose.msrb.mxu3 %v2083_v11  ;;  %968 = vmax.xlane.f32.xlu2 %v5350_v44 }
 0x253   : > { %3065 = vmatpush.bf16.msra.mxu2 %v5282_v29 }
 0x257   : > { %3066 = vmatpush.bf16.msra.mxu2 %v5291_v63 }
 0x258   : > { %2758 = vmatpush.bf16.xpose.msra.mxu1 %v2728_v0  ;;  %v5359_v55 = vpop.f32.mrf.mxu3 }
 0x259   : > { %2106 = vmatpush.bf16.xpose.msrb.mxu3 %v2080_v14  ;;  %970 = vmax.xlane.f32.xlu0 %v5359_v55 }
 0x25b   : > { %3067 = vmatpush.bf16.msra.mxu2 %v5297_v18 }
 0x25f   : > { %3068 = vmatpush.bf16.msra.mxu2 %v5287_v52  ;;  %3856 = vmatmul.msk.bf16.gmra.mxu1 %vm862_vm0, %v5223_v12 }
 0x260   : > { %v5368_v22 = vpop.f32.mrf.mxu3 }
 0x261   : > { %2107 = vmatpush.bf16.xpose.msrb.mxu3 %v2077_v17  ;;  %972 = vmax.xlane.f32.xlu2 %v5368_v22 }
 0x268   : > { %3956 = vmatmul.msk.bf16.vlgmr.msrb.gmra.mxu3 %vm862_vm0, %v5148_v37  ;;  %v5373_v58 = vpop.f32.mrf.mxu3 }
 0x269   : > { %974 = vmax.xlane.f32.xlu1 %v5373_v58 }
 0x26f   : > { %3857 = vmatmul.msk.bf16.gmra.mxu1 %vm862_vm0, %v5235_v27  ;;  %v1995_v27 = vpop.permute.xlu2 %1994 }
 0x270   : > { %v5378_v21 = vpop.f32.mrf.mxu3 }
 0x271   : > { %976 = vmax.xlane.f32.xlu0 %v5378_v21 }
 0x278   : > { %3957 = vmatmul.msk.bf16.gmra.mxu3 %vm862_vm0, %v5172_v48  ;;  %v5383_v32 = vpop.f32.mrf.mxu3 }
 0x279   : > { %978 = vmax.xlane.f32.xlu1 %v5383_v32 }
 0x27f   : > { %3858 = vmatmul.msk.bf16.gmra.mxu1 %vm862_vm0, %v5233_v40 }
 0x280   : > { %v5388_v37 = vpop.f32.mrf.mxu3 }
 0x281   : > { %980 = vmax.xlane.f32.xlu0 %v5388_v37 }
 0x288   : > { %3958 = vmatmul.msk.bf16.gmra.mxu3 %vm862_vm0, %v5256_v57  ;;  %v5393_v12 = vpop.f32.mrf.mxu3 }
 0x289   : > { %982 = vmax.xlane.f32.xlu2 %v5393_v12 }
 0x28f   : > { %3859 = vmatmul.msk.bf16.gmra.mxu1 %vm862_vm0, %v5299_v34 }
 0x290   : > { %v5398_v48 = vpop.f32.mrf.mxu3 }
 0x291   : > { %984 = vmax.xlane.f32.xlu0 %v5398_v48 }
 0x298   : > { %3959 = vmatmul.msk.bf16.gmra.mxu3 %vm862_vm0, %v5242_v39  ;;  %v5403_v40 = vpop.f32.mrf.mxu3 }
 0x299   : > { %986 = vmax.xlane.f32.xlu2 %v5403_v40 }
 0x29c   : > { %v5406_v57 = vpop.f32.mrf.mxu1 }
 0x29d   : > { %1498 = vmax.xlane.f32.xlu0 %v5406_v57 }
 0x29f   : > { %4060 = vmatmul.msk.bf16.vlgmr.msra.gmra.mxu1 %vm862_vm0, %v5180_v62 }
 0x2a0   : > { %v5411_v25 = vpop.f32.mrf.mxu3 }
 0x2a1   : > { %988 = vmax.xlane.f32.xlu1 %v5411_v25 }
 0x2a4   : > { %v961_v29 = vpop.xlane.xlu2 %960  ;;  %v5414_v30 = vpop.f32.mrf.mxu1 }
 0x2a5   : > { %v992_v39 = vsub.f32 %v5314_v38, %v961_v29 }
 0x2a7   : > { %v1008_v31 = vmul.f32 1.442695, %v992_v39 }
 0x2a8   : > { %3960 = vmatmul.msk.bf16.gmra.mxu3 %vm862_vm0, %v5251_v51  ;;  %v5419_v47 = vpop.f32.mrf.mxu3 }
 0x2a9   : > { %4373 = vpow2.f32 %v1008_v31  ;;  %1500 = vmax.xlane.f32.xlu1 %v5414_v30  ;;  %990 = vmax.xlane.f32.xlu0 %v5419_v47 }
 0x2ac   : > { %v963_v62 = vpop.xlane.xlu1 %962  ;;  %v5423_v50 = vpop.f32.mrf.mxu1 }
 0x2ad   : > { %v993_v52 = vsub.f32 %v5322_v28, %v963_v62 }
 0x2af   : > { %v5426_v61 = vpop.eup %4373  ;;  %v1010_v63 = vmul.f32 1.442695, %v993_v52  ;;  %4061 = vmatmul.msk.bf16.gmra.mxu1 %vm862_vm0, %v5164_v26 }
 0x2b1   : > { %4375 = vpow2.f32 %v1010_v63  ;;  %1502 = vmax.xlane.f32.xlu1 %v5423_v50  ;;  %1040 = vadd.xlane.f32.xlu0 %v5426_v61 }
 0x2b4   : > { %v965_v51 = vpop.xlane.xlu0 %964  ;;  %v5432_v1 = vpop.f32.mrf.mxu1 }
 0x2b5   : > { %v994_v54 = vsub.f32 %v5332_v23, %v965_v51 }
 0x2b7   : > { %v5435_v2 = vpop.eup %4375  ;;  %v1012_v8 = vmul.f32 1.442695, %v994_v54 }
 0x2b8   : > { %3961 = vmatmul.msk.bf16.gmra.mxu3 %vm862_vm0, %v5248_v46 }
 0x2b9   : > { %4377 = vpow2.f32 %v1012_v8  ;;  %1042 = vadd.xlane.f32.xlu0 %v5435_v2 }
 0x2bc   : > { %v5440_v26 = vpop.f32.mrf.mxu1  ;;  %v967_v36 = vpop.xlane.xlu1 %966 }
 0x2bf   : > { %v5442_v15 = vpop.eup %4377  ;;  %4062 = vmatmul.msk.bf16.gmra.mxu1 %vm862_vm0, %v5246_v43 }
 0x2c1   : > { %1044 = vadd.xlane.f32.xlu0 %v5442_v15 }
 0x2c4   : > { %v5447_v16 = vpop.f32.mrf.mxu1 }
 0x2c8   : > { %3962 = vmatmul.msk.bf16.gmra.mxu3 %vm862_vm0, %v5254_v53  ;;  %v969_v53 = vpop.xlane.xlu2 %968 }
 0x2c9   : > { %v996_v59 = vsub.f32 %v5350_v44, %v969_v53 }
 0x2cb   : > { %v1016_v45 = vmul.f32 1.442695, %v996_v59 }
 0x2cc   : > { %v5451_v18 = vpop.f32.mrf.mxu1  ;;  %v971_v56 = vpop.xlane.xlu0 %970 }
 0x2cd   : > { %4379 = vpow2.f32 %v1016_v45  ;;  %v997_v17 = vsub.f32 %v5359_v55, %v971_v56 }
 0x2cf   : > { %4063 = vmatmul.msk.bf16.gmra.mxu1 %vm862_vm0, %v5264_v5  ;;  %v1018_v29 = vmul.f32 1.442695, %v997_v17 }
 0x2d3   : > { %v5488_v41 = vpop.eup %4379 }
 0x2d4   : > { %v5455_v46 = vpop.f32.mrf.mxu1  ;;  %v973_v42 = vpop.xlane.xlu2 %972 }
 0x2d5   : > { %v998_v19 = vsub.f32 %v5368_v22, %v973_v42 }
 0x2d7   : > { %v1020_v7 = vmul.f32 1.442695, %v998_v19 }
 0x2d8   : > { %3963 = vmatmul.msk.bf16.gmra.mxu3 %vm862_vm0, %v1995_v27 }
 0x2dc   : > { %v5460_v43 = vpop.f32.mrf.mxu1 }
 0x2df   : > { %4064 = vmatmul.msk.bf16.gmra.mxu1 %vm862_vm0, %v5269_v9 }
 0x2e4   : > { %v5462_v34 = vpop.f32.mrf.mxu1  ;;  %v977_v33 = vpop.xlane.xlu0 %976 }
 0x2e5   : > { %v1000_v55 = vsub.f32 %v5378_v21, %v977_v33 }
 0x2e7   : > { %v1024_v52 = vmul.f32 1.442695, %v1000_v55 }
 0x2eb   : > { %v5464_v20 = vpop.f32.mrf.mxu3 }
 0x2ec   : > { %2149 = vmax.xlane.f32.xlu2 %v5464_v20  ;;  %v5473_v9 = vpop.f32.mrf.mxu1 }
 0x2ef   : > { %4065 = vmatmul.msk.bf16.gmra.mxu1 %vm862_vm0, %v5258_v60  ;;  %v995_v60 = vsub.f32 %v5340_v3, %v967_v36  ;;  %v975_v3 = vpop.xlane.xlu1 %974 }
 0x2f1   : > { %v1014_v35 = vmul.f32 1.442695, %v995_v60 }
 0x2f3   : > { %v5469_v5 = vpop.f32.mrf.mxu3  ;;  %4381 = vpow2.f32 %v1014_v35 }
 0x2f4   : > { %1504 = vmax.xlane.f32.xlu2 %v5432_v1  ;;  %2151 = vmax.xlane.f32.xlu1 %v5469_v5  ;;  %v5482_v38 = vpop.f32.mrf.mxu1  ;;  %v981_v23 = vpop.xlane.xlu0 %980  ;;  %4383 = vpow2.f32 %v1020_v7 }
 0x2f5   : > { %4385 = vpow2.f32 %v1018_v29  ;;  %v1002_v51 = vsub.f32 %v5388_v37, %v981_v23 }
 0x2f7   : > { %v979_v11 = vpop.xlane.xlu1 %978  ;;  %v1028_v53 = vmul.f32 1.442695, %v1002_v51 }
 0x2f8   : > { %v1001_v22 = vsub.f32 %v5383_v32, %v979_v11 }
 0x2f9   : > { %v5495_v6 = vpop.eup %4381 }
 0x2fa   : > { %v5503_v44 = vpop.eup %4383  ;;  %v1026_v39 = vmul.f32 1.442695, %v1001_v22 }
 0x2fb   : > { %v5476_v49 = vpop.f32.mrf.mxu3  ;;  %v5523_v63 = vpop.eup %4385 }
 0x2fc   : > { %1506 = vmax.xlane.f32.xlu2 %v5440_v26  ;;  %1510 = vmax.xlane.f32.xlu1 %v5451_v18  ;;  %v5493_v10 = vpop.f32.mrf.mxu1  ;;  %4387 = vpow2.f32 %v1026_v39  ;;  %v983_v45 = vpop.xlane.xlu2 %982 }
 0x2fd   : > { %2153 = vmax.xlane.f32.xlu0 %v5476_v49  ;;  %v1003_v37 = vsub.f32 %v5393_v12, %v983_v45 }
 0x2ff   : > { %4066 = vmatmul.msk.bf16.gmra.mxu1 %vm862_vm0, %v5261_v4  ;;  %v1030_v35 = vmul.f32 1.442695, %v1003_v37 }
 0x303   : > { %v5486_v28 = vpop.f32.mrf.mxu3 }
 0x304   : > { %1508 = vmax.xlane.f32.xlu2 %v5447_v16  ;;  %v985_v13 = vpop.xlane.xlu0 %984  ;;  %v5505_v0 = vpop.f32.mrf.mxu1 }
 0x305   : > { %1048 = vadd.xlane.f32.xlu0 %v5488_v41  ;;  %v1004_v21 = vsub.f32 %v5398_v48, %v985_v13 }
 0x307   : > { %v1032_v36 = vmul.f32 1.442695, %v1004_v21 }
 0x30b   : > { %v5497_v4 = vpop.f32.mrf.mxu3 }
 0x30c   : > { %6506 = vst [vmem:[#allocation20_spill] sm:$0xff] %v5497_v4  ;;  %1046 = vadd.xlane.f32.xlu2 %v5495_v6  ;;  %2157 = vmax.xlane.f32.xlu1 %v5497_v4  ;;  %v5520_v62 = vpop.f32.mrf.mxu1 }
 0x30f   : > { %4067 = vmatmul.msk.bf16.gmra.mxu1 %vm862_vm0, %v5305_v24  ;;  %v999_v24 = vsub.f32 %v5373_v58, %v975_v3  ;;  %v5525_v58 = vpop.eup %4387  ;;  %v987_v3 = vpop.xlane.xlu2 %986 }
 0x310   : > { %v5513_v27 = vpop.xlane.xlu0 %1498  ;;  %v1005_v22 = vsub.f32 %v5403_v40, %v987_v3 }
 0x311   : > { %v1022_v31 = vmul.f32 1.442695, %v999_v24  ;;  %v1530_v40 = vsub.f32 %v5406_v57, %v5513_v27 }
 0x312   : > { %v1034_v39 = vmul.f32 1.442695, %v1005_v22 }
 0x313   : > { %v5507_v14 = vpop.f32.mrf.mxu3  ;;  %4389 = vpow2.f32 %v1022_v31  ;;  %v1546_v51 = vmul.f32 1.442695, %v1530_v40 }
 0x314   : > { %2155 = vmax.xlane.f32.xlu2 %v5486_v28  ;;  %1052 = vadd.xlane.f32.xlu1 %v5503_v44  ;;  %4391 = vpow2.f32 %v1024_v52  ;;  %v5534_v56 = vpop.f32.mrf.mxu1  ;;  %v989_v59 = vpop.xlane.xlu1 %988 }
 0x315   : > { %2159 = vmax.xlane.f32.xlu0 %v5507_v14  ;;  %4393 = vpow2.f32 %v1028_v53 }
 0x319   : > { %v5528_v54 = vpop.eup %4389 }
 0x31a   : > { %v5536_v60 = vpop.eup %4391 }
 0x31b   : > { %v5542_v33 = vpop.eup %4393 }
 0x31c   : > { %1512 = vmax.xlane.f32.xlu2 %v5455_v46  ;;  %1516 = vmax.xlane.f32.xlu1 %v5462_v34  ;;  %v991_v32 = vpop.xlane.xlu0 %990  ;;  %v5544_v42 = vpop.f32.mrf.mxu1 }
 0x31d   : > { %1514 = vmax.xlane.f32.xlu0 %v5460_v43  ;;  %v1501_v23 = vpop.xlane.xlu1 %1500 }
 0x31e   : > { %v1531_v12 = vsub.f32 %v5414_v30, %v1501_v23  ;;  %v1006_v30 = vsub.f32 %v5411_v25, %v989_v59 }
 0x320   : > { %v1548_v29 = vmul.f32 1.442695, %v1531_v12 }
 0x324   : > { %1050 = vadd.xlane.f32.xlu2 %v5523_v63  ;;  %1058 = vadd.xlane.f32.xlu1 %v5525_v58  ;;  %v1041_v8 = vpop.xlane.xlu0 %1040  ;;  %v5563_v55 = vpop.f32.mrf.mxu1 }
 0x325   : > { %1054 = vadd.xlane.f32.xlu0 %v5528_v54  ;;  %4395 = vrcp.f32 %v1041_v8  ;;  %v1503_v21 = vpop.xlane.xlu1 %1502 }
 0x326   : > { %4397 = vpow2.f32 %v1032_v36 }
 0x32b   : > { %v4396_v19 = vpop.eup %4395 }
 0x32c   : > { %1056 = vadd.xlane.f32.xlu2 %v5536_v60  ;;  %1522 = vmax.xlane.f32.xlu1 %v5493_v10  ;;  %v1043_v48 = vpop.xlane.xlu0 %1042  ;;  %v5546_v7 = vpop.eup %4397  ;;  %v5553_v11 = vmul.f32 %v4396_v19, %v5426_v61  ;;  %v1007_v61 = vsub.f32 %v5419_v47, %v991_v32  ;;  %v1532_v47 = vsub.f32 %v5423_v50, %v1503_v21 }
 0x32d   : > { %1518 = vmax.xlane.f32.xlu0 %v5473_v9  ;;  %4399 = vrcp.f32 %v1043_v48  ;;  %v5579_v32 = vpop.f32.mrf.mxu1 }
 0x32e   : > { %4401 = vpow2.f32 %v1030_v35  ;;  %v1038_v52 = vmul.f32 1.442695, %v1007_v61  ;;  %v1550_v57 = vmul.f32 1.442695, %v1532_v47 }
 0x32f   : > { %4403 = vpow2.f32 %v1548_v29 }
 0x330   : > { %4405 = vpow2.f32 %v1034_v39 }
 0x333   : > { %v4400_v13 = vpop.eup %4399 }
 0x334   : > { %1520 = vmax.xlane.f32.xlu2 %v5482_v38  ;;  %1064 = vadd.xlane.f32.xlu1 %v5546_v7  ;;  %v5556_v17 = vmul.f32 %v4400_v13, %v5435_v2  ;;  %v5561_v31 = vpop.eup %4401  ;;  %v1036_v2 = vmul.f32 1.442695, %v1006_v30  ;;  %v1045_v13 = vpop.xlane.xlu0 %1044 }
 0x335   : > { %1060 = vadd.xlane.f32.xlu0 %v5542_v33  ;;  %v5572_v8 = vpop.eup %4403  ;;  %v5591_v50 = vpop.f32.mrf.mxu1 }
 0x336   : > { %v1120_v24 = vpack.c.bf16 %v5556_v17, %v5553_v11  ;;  %v5574_v25 = vpop.eup %4405  ;;  %4407 = vpow2.f32 %v1036_v2  ;;  %6507 = vst [vmem:[#allocation21_spill] sm:$0xff] %v5591_v50 }
 0x337   : > { %4409 = vpow2.f32 %v1038_v52 }
 0x338   : > { %1184 = vmatmul.bf16.vlgmr.msrb.gmra.mxu0 %v1120_v24  ;;  %4411 = vpow2.f32 %v1546_v51 }
 0x339   : > { %4413 = vpow2.f32 %v1550_v57 }
 0x33c   : > { %1062 = vadd.xlane.f32.xlu2 %v5561_v31  ;;  %1528 = vmax.xlane.f32.xlu1 %v5534_v56  ;;  %v5582_v27 = vpop.eup %4407 }
 0x33d   : > { %1524 = vmax.xlane.f32.xlu0 %v5505_v0  ;;  %v5584_v53 = vpop.eup %4409  ;;  %v5598_v45 = vpop.f32.mrf.mxu1 }
 0x33e   : > { %v5586_v59 = vpop.eup %4411 }
 0x33f   : > { %v5593_v36 = vpop.eup %4413 }
 0x344   : > { %1526 = vmax.xlane.f32.xlu2 %v5520_v62  ;;  %1580 = vadd.xlane.f32.xlu1 %v5572_v8 }
 0x345   : > { %1066 = vadd.xlane.f32.xlu0 %v5574_v25  ;;  %v5604_v48 = vpop.f32.mrf.mxu1 }
 0x346   : > { %6508 = vst [vmem:[#allocation22_spill] sm:$0xff] %v5604_v48 }
 0x34c   : > { %1068 = vadd.xlane.f32.xlu2 %v5582_v27  ;;  %1070 = vadd.xlane.f32.xlu1 %v5584_v53 }
 0x34d   : > { %1578 = vadd.xlane.f32.xlu0 %v5586_v59 }
 0x354   : > { %2802 = vmax.xlane.f32.xlu2 %v5563_v55  ;;  %1582 = vadd.xlane.f32.xlu1 %v5593_v36 }
 0x355   : > { %2800 = vmax.xlane.f32.xlu0 %v5544_v42 }
 0x35c   : > { %2804 = vmax.xlane.f32.xlu1 %v5579_v32 }
 0x35d   : > { %2806 = vmax.xlane.f32.xlu0 %v5591_v50 }
 0x35f   : > { %v5602_v37 = vpop.xlane.xlu2 %2149 }
 0x364   : > { %2810 = vmax.xlane.f32.xlu1 %v5604_v48 }
 0x367   : > { %v1505_v35 = vpop.xlane.xlu2 %1504  ;;  %v2152_v3 = vpop.xlane.xlu1 %2151 }
 0x368   : > { %v1533_v19 = vsub.f32 %v5432_v1, %v1505_v35  ;;  %v5618_v1 = vpop.f32.mrf.mxu3 }
 0x36a   : > { %v1552_v23 = vmul.f32 1.442695, %v1533_v19 }
 0x36c   : > { %4415 = vpow2.f32 %v1552_v23 }
 0x36f   : > { %v1507_v12 = vpop.xlane.xlu2 %1506  ;;  %v5614_v30 = vpop.xlane.xlu1 %1510 }
 0x370   : > { %v1534_v22 = vsub.f32 %v5440_v26, %v1507_v12  ;;  %v5612_v39 = vpop.xlane.xlu0 %2153  ;;  %v5626_v51 = vpop.f32.mrf.mxu3 }
 0x371   : > { %6510 = vst [vmem:[#allocation24_spill] sm:$0xff] %v5626_v51 }
 0x372   : > { %v5609_v24 = vpop.eup %4415  ;;  %v1554_v29 = vmul.f32 1.442695, %v1534_v22  ;;  %v4078_v22 = vld [vmem:[#allocation2 + $0x38] sm:$0xf] }
 0x373   : > { %1584 = vadd.xlane.f32.xlu2 %v5609_v24 }
 0x374   : > { %4417 = vpow2.f32 %v1554_v29  ;;  %v4255_v29 = vld [vmem:[#allocation2 + $0x40] sm:$0xf0] }
 0x375   : > { %4419 = vrcp.f32 %v1045_v13 }
 0x377   : > { %v5616_v61 = vpop.xlane.xlu2 %1508 }
 0x378   : > { %v1049_v52 = vpop.xlane.xlu0 %1048 }
 0x37a   : > { %v5620_v40 = vpop.eup %4417 }
 0x37b   : > { %1586 = vadd.xlane.f32.xlu0 %v5620_v40  ;;  %2161 = vmax.xlane.f32.xlu2 %v5618_v1  ;;  %v4420_v21 = vpop.eup %4419 }
 0x37c   : > { %v5632_v19 = vmul.f32 %v4420_v21, %v5442_v15 }
 0x37e   : > { %6511 = vst [vmem:[#allocation25_spill] sm:$0xff] %v5632_v19 }
 0x37f   : > { %v1047_v26 = vpop.xlane.xlu2 %1046  ;;  %v5624_v2 = vpop.xlane.xlu1 %2157 }
 0x380   : > { %6509 = vst [vmem:[#allocation23_spill] sm:$0xff] %v5624_v2  ;;  %4421 = vrcp.f32 %v1047_v26  ;;  %v4079_v26 = vor.u32 %v4255_v29, %v4078_v22  ;;  %v4232_v2 = vld [vmem:[#allocation2 + $0x58] sm:$0xf0] }
 0x383   : > { %2163 = vmax.xlane.f32.xlu2 %v5626_v51 }
 0x386   : > { %v4422_v47 = vpop.eup %4421 }
 0x387   : > { %v5629_v57 = vpop.xlane.xlu2 %2155  ;;  %v1053_v35 = vpop.xlane.xlu1 %1052  ;;  %v5635_v23 = vmul.f32 %v4422_v47, %v5495_v6  ;;  %v2182_v6 = vsub.f32 %v5469_v5, %v2152_v3  ;;  %v3978_v47 = vld [vmem:[#allocation2 + $0x50] sm:$0xf] }
 0x388   : > { %v5637_v13 = vpop.xlane.xlu0 %2159  ;;  %v3979_v22 = vor.u32 %v4232_v2, %v3978_v47 }
 0x389   : > { %6512 = vst [vmem:[#allocation26_spill] sm:$0xff] %v5635_v23  ;;  %v1121_v12 = vpack.c.bf16 %v5635_v23, %v5632_v19  ;;  %v2199_v50 = vmul.f32 1.442695, %v2182_v6 }
 0x38b   : > { %1189 = vmatmul.bf16.gmra.mxu0 %v1121_v12 }
 0x38f   : > { %v1513_v51 = vpop.xlane.xlu2 %1512  ;;  %v5641_v48 = vpop.xlane.xlu1 %1516  ;;  %3044 = vrot.lane.b32.xlu0 %v4079_v26, %s4868_s26 }
 0x390   : > { %v1537_v15 = vsub.f32 %v5455_v46, %v1513_v51  ;;  %v1515_v21 = vpop.xlane.xlu0 %1514 }
 0x392   : > { %v1560_v4 = vmul.f32 1.442695, %v1537_v15 }
 0x394   : > { %4423 = vpow2.f32 %v1560_v4 }
 0x395   : > { %4425 = vrcp.f32 %v1049_v52 }
 0x397   : > { %v1051_v19 = vpop.xlane.xlu2 %1050  ;;  %v1059_v23 = vpop.xlane.xlu1 %1058 }
 0x398   : > { %4427 = vrcp.f32 %v1051_v19  ;;  %v1055_v12 = vpop.xlane.xlu0 %1054 }
 0x399   : > { %4429 = vpow2.f32 %v2199_v50 }
 0x39a   : > { %v5646_v29 = vpop.eup %4423  ;;  %4431 = vrcp.f32 %v1055_v12 }
 0x39b   : > { %1592 = vadd.xlane.f32.xlu1 %v5646_v29  ;;  %2395 = vrot.lane.b32.xlu2 %v3979_v22, %s4866_s27  ;;  %v4426_v46 = vpop.eup %4425 }
 0x39c   : > { %v5653_v4 = vmul.f32 %v4426_v46, %v5488_v41 }
 0x39e   : > { %v4428_v51 = vpop.eup %4427 }
 0x39f   : > { %v5650_v5 = vpop.xlane.xlu1 %1522  ;;  %v5656_v3 = vmul.f32 %v4428_v51, %v5523_v63  ;;  %v5661_v26 = vpop.eup %4429 }
 0x3a0   : > { %v1519_v52 = vpop.xlane.xlu0 %1518  ;;  %v4432_v63 = vpop.eup %4431 }
 0x3a1   : > { %v1540_v2 = vsub.f32 %v5473_v9, %v1519_v52  ;;  %v1122_v19 = vpack.c.bf16 %v5656_v3, %v5653_v4  ;;  %v1057_v9 = vpop.xlane.xlu2 %1056  ;;  %v5670_v22 = vmul.f32 %v4432_v63, %v5528_v54  ;;  %v1538_v52 = vsub.f32 %v5460_v43, %v1515_v21 }
 0x3a3   : > { %v1566_v15 = vmul.f32 1.442695, %v1540_v2  ;;  %1194 = vmatmul.bf16.gmra.mxu0 %v1122_v19  ;;  %2231 = vadd.xlane.f32.xlu1 %v5661_v26  ;;  %6513 = vst [vmem:[#allocation27_spill] sm:$0xff] %v5670_v22 }
 0x3a5   : > { %4433 = vpow2.f32 %v1566_v15  ;;  %v1562_v15 = vmul.f32 1.442695, %v1538_v52 }
 0x3a6   : > { %4435 = vrcp.f32 %v1053_v35 }
 0x3a7   : > { %v5664_v50 = vpop.xlane.xlu1 %1064  ;;  %4437 = vrcp.f32 %v1057_v9 }
 0x3a8   : > { %v1061_v41 = vpop.xlane.xlu0 %1060 }
 0x3a9   : > { %v1521_v54 = vpop.xlane.xlu2 %1520 }
 0x3ab   : > { %v5666_v6 = vpop.eup %4433 }
 0x3ac   : > { %v4436_v47 = vpop.eup %4435  ;;  %1598 = vadd.xlane.f32.xlu1 %v5666_v6 }
 0x3ad   : > { %v5673_v46 = vmul.f32 %v4436_v47, %v5503_v44  ;;  %v5682_v44 = vpop.f32.mrf.mxu1  ;;  %v2181_v47 = vsub.f32 %v5464_v20, %v5602_v37  ;;  %v4438_v43 = vpop.eup %4437 }
 0x3af   : > { %v1123_v35 = vpack.c.bf16 %v5670_v22, %v5673_v46  ;;  %v5679_v2 = vpop.xlane.xlu1 %1528 }
 0x3b0   : > { %v1525_v51 = vpop.xlane.xlu0 %1524 }
 0x3b1   : > { %v1543_v12 = vsub.f32 %v5505_v0, %v1525_v51  ;;  %v1535_v51 = vsub.f32 %v5447_v16, %v5616_v61 }
 0x3b3   : > { %v1572_v19 = vmul.f32 1.442695, %v1543_v12  ;;  %1199 = vmatmul.bf16.gmra.mxu0 %v1123_v35  ;;  %v5693_v35 = vmul.f32 %v4438_v43, %v5536_v60  ;;  %v1541_v60 = vsub.f32 %v5482_v38, %v1521_v54 }
 0x3b5   : > { %4439 = vpow2.f32 %v1572_v19  ;;  %v1185_v63 = vpop.f32.mrf.mxu0  ;;  %6514 = vst [vmem:[#allocation28_spill] sm:$0xff] %v5693_v35  ;;  %v1063_v19 = vpop.xlane.xlu2 %1062 }
 0x3b6   : > { %4441 = vrcp.f32 %v1059_v23  ;;  %1225 = vst.msk [vmem:[#allocation3] sm:$0xff] %vm862_vm0, %v1185_v63  ;;  %v2197_v23 = vmul.f32 1.442695, %v2181_v47  ;;  %v1556_v63 = vmul.f32 1.442695, %v1535_v51 }
 0x3b7   : > { %4443 = vpow2.f32 %v1562_v15  ;;  %v1581_v12 = vpop.xlane.xlu1 %1580  ;;  %v1568_v47 = vmul.f32 1.442695, %v1541_v60 }
 0x3b8   : > { %v1067_v0 = vpop.xlane.xlu0 %1066  ;;  %4445 = vrcp.f32 %v1581_v12 }
 0x3b9   : > { %2812 = vmax.xlane.f32.xlu0 %v5682_v44  ;;  %4447 = vpow2.f32 %v2197_v23 }
 0x3bb   : > { %v5687_v21 = vpop.eup %4439 }
 0x3bc   : > { %v4442_v9 = vpop.eup %4441  ;;  %1604 = vadd.xlane.f32.xlu1 %v5687_v21 }
 0x3bd   : > { %v1187_v52 = vpop.f32.mrf.mxu0  ;;  %v5697_v20 = vmul.f32 %v4442_v9, %v5525_v58  ;;  %v5699_v37 = vpop.eup %4443  ;;  %v1536_v58 = vsub.f32 %v5451_v18, %v5614_v30 }
 0x3be   : > { %1226 = vst.msk [vmem:[#allocation3 + $0x8] sm:$0xff] %vm862_vm0, %v1187_v52  ;;  %v4446_v61 = vpop.eup %4445  ;;  %v5717_v12 = vpop.xlane.xlu2 %1526 }
 0x3bf   : > { %v1124_v16 = vpack.c.bf16 %v5697_v20, %v5693_v35  ;;  %v5708_v43 = vpop.eup %4447  ;;  %v1558_v23 = vmul.f32 1.442695, %v1536_v58  ;;  %v5715_v54 = vmul.f32 %v4446_v61, %v5572_v8  ;;  %v5727_v52 = vpop.f32.mrf.mxu1 }
 0x3c0   : > { %v1579_v15 = vpop.xlane.xlu0 %1578 }
 0x3c1   : > { %1594 = vadd.xlane.f32.xlu0 %v5699_v37  ;;  %4449 = vrcp.f32 %v1579_v15  ;;  %v4074_v15 = vld [vmem:[#allocation2 + $0x20] sm:$0xf] }
 0x3c2   : > { %4451 = vrcp.f32 %v1063_v19 }
 0x3c3   : > { %1204 = vmatmul.bf16.gmra.mxu0 %v1124_v16  ;;  %4453 = vpow2.f32 %v1556_v63  ;;  %v4254_v63 = vld [vmem:[#allocation2 + $0x28] sm:$0xf0] }
 0x3c4   : > { %2808 = vmax.xlane.f32.xlu2 %v5598_v45  ;;  %4455 = vrcp.f32 %v1061_v41  ;;  %v4075_v58 = vor.u32 %v4254_v63, %v4074_v15 }
 0x3c5   : > { %4457 = vpow2.f32 %v1568_v47  ;;  %v1071_v47 = vpop.xlane.xlu1 %1070 }
 0x3c6   : > { %4459 = vpow2.f32 %v1558_v23 }
 0x3c7   : > { %v4450_v9 = vpop.eup %4449  ;;  %4461 = vrcp.f32 %v1067_v0  ;;  %v5744_v61 = vpop.f32.mrf.mxu1  ;;  %v1542_v0 = vsub.f32 %v5493_v10, %v5650_v5  ;;  %v2183_v10 = vsub.f32 %v5476_v49, %v5612_v39  ;;  %v2184_v39 = vsub.f32 %v5486_v28, %v5629_v57 }
 0x3c8   : > { %v5712_v38 = vmul.f32 %v4450_v9, %v5586_v59  ;;  %v4452_v51 = vpop.eup %4451  ;;  %4463 = vrcp.f32 %v5664_v50  ;;  %v1545_v57 = vsub.f32 %v5534_v56, %v5679_v2 }
 0x3c9   : > { %2229 = vadd.xlane.f32.xlu0 %v5708_v43  ;;  %v5719_v18 = vpop.eup %4453  ;;  %v5725_v59 = vmul.f32 %v4452_v51, %v5561_v31  ;;  %v1069_v31 = vpop.xlane.xlu2 %1068  ;;  %v1570_v50 = vmul.f32 1.442695, %v1542_v0 }
 0x3ca   : > { %v1690_v30 = vpack.c.bf16 %v5715_v54, %v5712_v38  ;;  %v4456_v41 = vpop.eup %4455 }
 0x3cb   : > { %6515 = vst [vmem:[#allocation29_spill] sm:$0xff] %v5725_v59  ;;  %v5730_v8 = vmul.f32 %v4456_v41, %v5542_v33  ;;  %v5732_v19 = vpop.eup %4457  ;;  %v1539_v33 = vsub.f32 %v5462_v34, %v5641_v48  ;;  %v5753_v48 = vpop.f32.mrf.mxu3 }
 0x3cc   : > { %1588 = vadd.xlane.f32.xlu2 %v5719_v18  ;;  %1770 = vmatmul.bf16.vlgmr.msrb.gmra.mxu2 %v1690_v30  ;;  %v5737_v60 = vpop.eup %4459 }
 0x3cd   : > { %6516 = vst [vmem:[#allocation30_spill] sm:$0xff] %v5730_v8  ;;  %v1125_v16 = vpack.c.bf16 %v5725_v59, %v5730_v8  ;;  %v1564_v9 = vmul.f32 1.442695, %v1539_v33  ;;  %v4462_v23 = vpop.eup %4461  ;;  %v1583_v5 = vpop.xlane.xlu1 %1582 }
 0x3ce   : > { %v4464_v51 = vpop.eup %4463  ;;  %v5751_v34 = vmul.f32 %v4462_v23, %v5574_v25 }
 0x3cf   : > { %4465 = vpow2.f32 %v1564_v9  ;;  %v5756_v41 = vmul.f32 %v4464_v51, %v5546_v7  ;;  %v2201_v7 = vmul.f32 1.442695, %v2183_v10  ;;  %v2203_v51 = vmul.f32 1.442695, %v2184_v39 }
 0x3d0   : > { %6517 = vst [vmem:[#allocation31_spill] sm:$0xff] %v5751_v34  ;;  %4467 = vpow2.f32 %v1570_v50 }
 0x3d1   : > { %1600 = vadd.xlane.f32.xlu0 %v5732_v19  ;;  %v2803_v30 = vpop.xlane.xlu2 %2802  ;;  %6518 = vst [vmem:[#allocation32_spill] sm:$0xff] %v5756_v41  ;;  %v1126_v15 = vpack.c.bf16 %v5751_v34, %v5756_v41  ;;  %4469 = vrcp.f32 %v1069_v31  ;;  %v4253_v41 = vld [vmem:[#allocation2 + $0x10] sm:$0xf0] }
 0x3d2   : > { %4471 = vrcp.f32 %v1071_v47 }
 0x3d3   : > { %1209 = vmatmul.bf16.gmra.mxu0 %v1125_v16  ;;  %4473 = vrcp.f32 %v1583_v5  ;;  %v2801_v16 = vpop.xlane.xlu0 %2800  ;;  %v5768_v33 = vpop.f32.mrf.mxu3 }
 0x3d4   : > { %1590 = vadd.xlane.f32.xlu2 %v5737_v60 }
 0x3d5   : > { %3042 = vrot.lane.b32.xlu1 %v4075_v58, %s4868_s26  ;;  %v5763_v63 = vpop.eup %4465 }
 0x3d6   : > { %v5766_v58 = vpop.eup %4467 }
 0x3d7   : > { %v4470_v9 = vpop.eup %4469 }
 0x3d8   : > { %v4472_v49 = vpop.eup %4471  ;;  %v5775_v23 = vmul.f32 %v4470_v9, %v5582_v27 }
 0x3d9   : > { %2816 = vmax.xlane.f32.xlu0 %v5744_v61  ;;  %v4474_v31 = vpop.eup %4473  ;;  %v5778_v0 = vmul.f32 %v4472_v49, %v5584_v53  ;;  %v2805_v49 = vpop.xlane.xlu1 %2804 }
 0x3da   : > { %6519 = vst [vmem:[#allocation33_spill] sm:$0xff] %v5775_v23 }
 0x3db   : > { %6520 = vst [vmem:[#allocation34_spill] sm:$0xff] %v5778_v0  ;;  %v5794_v5 = vpop.xlane.xlu0 %2806  ;;  %v1127_v53 = vpack.c.bf16 %v5778_v0, %v5775_v23 }
 0x3dc   : > { %2814 = vmax.xlane.f32.xlu2 %v5727_v52 }
 0x3e1   : > { %2165 = vmax.xlane.f32.xlu0 %v5753_v48  ;;  %v5820_v0 = vpop.xlane.xlu1 %2810 }
 0x3e3   : > { %1214 = vmatmul.bf16.gmra.mxu0 %v1126_v15  ;;  %v5783_v15 = vmul.f32 %v4474_v31, %v5593_v36  ;;  %v2833_v36 = vsub.f32 %v5563_v55, %v2803_v30  ;;  %v3974_v31 = vld [vmem:[#allocation2 + $0x38] sm:$0xf] }
 0x3e4   : > { %1596 = vadd.xlane.f32.xlu2 %v5763_v63 }
 0x3e6   : > { %v1585_v25 = vpop.xlane.xlu2 %1584 }
 0x3e7   : > { %4475 = vrcp.f32 %v1585_v25  ;;  %v2850_v25 = vmul.f32 1.442695, %v2833_v36 }
 0x3e8   : > { %4477 = vpow2.f32 %v2201_v7  ;;  %v1576_v7 = vmul.f32 1.442695, %v1545_v57  ;;  %v2832_v57 = vsub.f32 %v5544_v42, %v2801_v16 }
 0x3e9   : > { %2167 = vmax.xlane.f32.xlu0 %v5768_v33  ;;  %4479 = vpow2.f32 %v2203_v51 }
 0x3ea   : > { %4481 = vpow2.f32 %v1576_v7  ;;  %v2848_v7 = vmul.f32 1.442695, %v2832_v57  ;;  %v4230_v57 = vld [vmem:[#allocation2 + $0x28] sm:$0xf0] }
 0x3eb   : > { %4483 = vpow2.f32 %v2850_v25 }
 0x3ec   : > { %1602 = vadd.xlane.f32.xlu2 %v5766_v58  ;;  %4485 = vpow2.f32 %v2848_v7 }
 0x3ed   : > { %v4476_v47 = vpop.eup %4475 }
 0x3ee   : > { %v5780_v50 = vpop.xlane.xlu2 %2161  ;;  %v5786_v10 = vmul.f32 %v4476_v47, %v5609_v24  ;;  %v5788_v28 = vpop.eup %4477  ;;  %v4231_v47 = vld [vmem:[#allocation2 + $0x40] sm:$0xf0] }
 0x3ef   : > { %v5800_v24 = vpop.f32.mrf.mxu1  ;;  %v5804_v2 = vpop.eup %4479  ;;  %v3975_v36 = vor.u32 %v4231_v47, %v3974_v31  ;;  %v3970_v47 = vld [vmem:[#allocation2 + $0x20] sm:$0xf] }
 0x3f0   : > { %v1691_v27 = vpack.c.bf16 %v5786_v10, %v5783_v15  ;;  %v5806_v9 = vpop.xlane.xlu0 %1586  ;;  %v5809_v39 = vpop.eup %4481 }
 0x3f1   : > { %2233 = vadd.xlane.f32.xlu0 %v5788_v28  ;;  %v5814_v51 = vpop.eup %4483 }
 0x3f2   : > { %1775 = vmatmul.bf16.gmra.mxu2 %v1691_v27 }
 0x3f3   : > { %1219 = vmatmul.bf16.gmra.mxu0 %v1127_v53  ;;  %v2834_v53 = vsub.f32 %v5579_v32, %v2805_v49  ;;  %v5827_v32 = vpop.f32.mrf.mxu3  ;;  %v5830_v49 = vpop.eup %4485 }
 0x3f5   : > { %v2852_v25 = vmul.f32 1.442695, %v2834_v53 }
 0x3f6   : > { %v5802_v56 = vpop.xlane.xlu2 %2163 }
 0x3f7   : > { %v5811_v55 = vpop.f32.mrf.mxu1  ;;  %4487 = vpow2.f32 %v2852_v25 }
 0x3f9   : > { %2235 = vadd.xlane.f32.xlu0 %v5804_v2 }
 0x3fb   : > { %v5841_v7 = vpop.f32.mrf.mxu3 }
 0x3fe   : > { %v2396_v30 = vpop.permute.xlu2 %2395 }
 0x3ff   : > { %1608 = vadd.xlane.f32.xlu1 %v5809_v39  ;;  %2417 = vmatpush.bf16.msra.mxu0 %v2396_v30  ;;  %v4070_v30 = vld [vmem:[#allocation2 + $0x8] sm:$0xf]  ;;  %v5823_v23 = vpop.f32.mrf.mxu1 }
 0x400   : > { %v4071_v16 = vor.u32 %v4253_v41, %v4070_v30  ;;  %v2186_v41 = vsub.f32 %v5507_v14, %v5637_v13 }
 0x401   : > { %v3045_v27 = vpop.permute.xlu0 %3044  ;;  %2882 = vadd.xlane.f32.xlu0 %v5814_v51 }
 0x402   : > { %3069 = vmatpush.bf16.msra.mxu2 %v3045_v27  ;;  %v5835_v27 = vpop.eup %4487  ;;  %v2207_v25 = vmul.f32 1.442695, %v2186_v41 }
 0x404   : > { %2393 = vrot.lane.b32.xlu2 %v3975_v36, %s4866_s27  ;;  %v3971_v36 = vor.u32 %v4230_v57, %v3970_v47 }
 0x407   : > { %2818 = vmax.xlane.f32.xlu1 %v5800_v24  ;;  %v5861_v41 = vpop.f32.mrf.mxu1 }
 0x408   : > { %v1190_v42 = vpop.f32.mrf.mxu0 }
 0x409   : > { %1227 = vst.msk [vmem:[#allocation3 + $0x10] sm:$0xff] %vm862_vm0, %v1190_v42  ;;  %2822 = vmax.xlane.f32.xlu0 %v5823_v23 }
 0x40c   : > { %3040 = vrot.lane.b32.xlu2 %v4071_v16, %s4868_s26  ;;  %v5846_v16 = vpop.f32.mrf.mxu3 }
 0x40e   : > { %v5832_v31 = vpop.xlane.xlu1 %1592 }
 0x40f   : > { %2880 = vadd.xlane.f32.xlu1 %v5830_v49 }
 0x410   : > { %v1192_v53 = vpop.f32.mrf.mxu0 }
 0x411   : > { %1228 = vst.msk [vmem:[#allocation3 + $0x18] sm:$0xff] %vm862_vm0, %v1192_v53  ;;  %2884 = vadd.xlane.f32.xlu0 %v5835_v27  ;;  %v1659_v53 = vadd.f32 %v5715_v54, %v5556_v17 }
 0x414   : > { %2391 = vrot.lane.b32.xlu2 %v3971_v36, %s4866_s27  ;;  %v5864_v17 = vpop.f32.mrf.mxu3 }
 0x416   : > { %v2232_v30 = vpop.xlane.xlu1 %2231 }
 0x417   : > { %4489 = vrcp.f32 %v2232_v30  ;;  %2820 = vmax.xlane.f32.xlu1 %v5811_v55 }
 0x418   : > { %4491 = vpow2.f32 %v2207_v25  ;;  %v1544_v25 = vsub.f32 %v5520_v62, %v5717_v12 }
 0x419   : > { %2169 = vmax.xlane.f32.xlu0 %v5827_v32 }
 0x41d   : > { %v4490_v42 = vpop.eup %4489 }
 0x41e   : > { %v5851_v14 = vmul.f32 %v4490_v42, %v5661_v26  ;;  %v5854_v13 = vpop.eup %4491 }
 0x41f   : > { %2171 = vmax.xlane.f32.xlu1 %v5841_v7  ;;  %v5878_v59 = vpop.xlane.xlu1 %1598 }
 0x420   : > { %v5857_v47 = vadd.f32 %v5851_v14, %v1659_v53  ;;  %v1195_v57 = vpop.f32.mrf.mxu0  ;;  %v1574_v53 = vmul.f32 1.442695, %v1544_v25 }
 0x421   : > { %1229 = vst.msk [vmem:[#allocation3 + $0x20] sm:$0xff] %vm862_vm0, %v1195_v57  ;;  %2239 = vadd.xlane.f32.xlu0 %v5854_v13  ;;  %v5872_v57 = vpop.f32.mrf.mxu1 }
 0x427   : > { %2824 = vmax.xlane.f32.xlu1 %v5861_v41 }
 0x428   : > { %v1197_v26 = vpop.f32.mrf.mxu0 }
 0x429   : > { %1230 = vst.msk [vmem:[#allocation3 + $0x28] sm:$0xff] %vm862_vm0, %v1197_v26  ;;  %2175 = vmax.xlane.f32.xlu0 %v5864_v17 }
 0x42c   : > { %v2813_v54 = vpop.xlane.xlu0 %2812 }
 0x42d   : > { %v2838_v36 = vsub.f32 %v5682_v44, %v2813_v54 }
 0x42f   : > { %v2860_v30 = vmul.f32 1.442695, %v2838_v36  ;;  %v2187_v36 = vsub.f32 %v5618_v1, %v5780_v50 }
 0x430   : > { %v1200_v42 = vpop.f32.mrf.mxu0 }
 0x431   : > { %4493 = vpow2.f32 %v2860_v30  ;;  %1231 = vst.msk [vmem:[#allocation3 + $0x30] sm:$0xff] %vm862_vm0, %v1200_v42  ;;  %v5888_v30 = vpop.f32.mrf.mxu1  ;;  %v2209_v42 = vmul.f32 1.442695, %v2187_v36 }
 0x432   : > { %4495 = vpow2.f32 %v1574_v53  ;;  %6521 = vst [vmem:[#allocation35_spill] sm:$0xff] %v5888_v30 }
 0x434   : > { %v5874_v34 = vpop.xlane.xlu0 %1594 }
 0x437   : > { %v5876_v26 = vpop.eup %4493  ;;  %v2809_v8 = vpop.xlane.xlu2 %2808 }
 0x438   : > { %v2836_v44 = vsub.f32 %v5598_v45, %v2809_v8  ;;  %v1202_v54 = vpop.f32.mrf.mxu0  ;;  %2892 = vadd.xlane.f32.xlu0 %v5876_v26  ;;  %v5883_v12 = vpop.eup %4495 }
 0x439   : > { %1232 = vst.msk [vmem:[#allocation3 + $0x38] sm:$0xff] %vm862_vm0, %v1202_v54  ;;  %v5891_v45 = vpop.xlane.xlu1 %1604  ;;  %v1658_v54 = vadd.f32 %v5712_v38, %v5553_v11 }
 0x43a   : > { %v2856_v62 = vmul.f32 1.442695, %v2836_v44 }
 0x43c   : > { %4497 = vpow2.f32 %v2856_v62  ;;  %v2230_v25 = vpop.xlane.xlu0 %2229 }
 0x43d   : > { %4499 = vrcp.f32 %v2230_v25  ;;  %1606 = vadd.xlane.f32.xlu2 %v5883_v12 }
 0x43e   : > { %4501 = vrcp.f32 %v5806_v9 }
 0x43f   : > { %v1589_v8 = vpop.xlane.xlu2 %1588 }
 0x440   : > { %4503 = vrcp.f32 %v1589_v8  ;;  %v1205_v53 = vpop.f32.mrf.mxu0  ;;  %2828 = vmax.xlane.f32.xlu0 %v5888_v30 }
 0x441   : > { %1233 = vst.msk [vmem:[#allocation3 + $0x40] sm:$0xff] %vm862_vm0, %v1205_v53  ;;  %4505 = vpow2.f32 %v2209_v42 }
 0x442   : > { %v5895_v1 = vpop.eup %4497 }
 0x443   : > { %6522 = vst [vmem:[#allocation36_spill] sm:$0xff] %v5895_v1  ;;  %v4500_v50 = vpop.eup %4499  ;;  %2888 = vadd.xlane.f32.xlu1 %v5895_v1 }
 0x444   : > { %v4502_v44 = vpop.eup %4501  ;;  %v5901_v9 = vmul.f32 %v4500_v50, %v5708_v43  ;;  %v1601_v62 = vpop.xlane.xlu0 %1600 }
 0x445   : > { %v5909_v22 = vmul.f32 %v4502_v44, %v5620_v40  ;;  %v3966_v44 = vld [vmem:[#allocation2 + $0x8] sm:$0xf] }
 0x446   : > { %v4504_v36 = vpop.eup %4503  ;;  %v5904_v25 = vadd.f32 %v5901_v9, %v1658_v54  ;;  %v4229_v54 = vld [vmem:[#allocation2 + $0x10] sm:$0xf0] }
 0x447   : > { %v3043_v53 = vpop.permute.xlu1 %3042  ;;  %v1591_v35 = vpop.xlane.xlu2 %1590  ;;  %6523 = vst [vmem:[#allocation37_spill] sm:$0xff] %v5909_v22  ;;  %v5912_v30 = vmul.f32 %v4504_v36, %v5719_v18 }
 0x448   : > { %3070 = vmatpush.bf16.msra.mxu2 %v3043_v53  ;;  %v1207_v11 = vpop.f32.mrf.mxu0  ;;  %v5917_v38 = vpop.eup %4505  ;;  %4507 = vrcp.f32 %v1591_v35 }
 0x449   : > { %1234 = vst.msk [vmem:[#allocation3 + $0x48] sm:$0xff] %vm862_vm0, %v1207_v11  ;;  %v1692_v43 = vpack.c.bf16 %v5912_v30, %v5909_v22  ;;  %4509 = vrcp.f32 %v5832_v31  ;;  %v3967_v11 = vor.u32 %v4229_v54, %v3966_v44 }
 0x44b   : > { %1780 = vmatmul.bf16.gmra.mxu2 %v1692_v43  ;;  %2241 = vadd.xlane.f32.xlu1 %v5917_v38 }
 0x44c   : > { %v5920_v42 = vpop.xlane.xlu0 %2816 }
 0x44e   : > { %v4508_v36 = vpop.eup %4507 }
 0x44f   : > { %v2815_v40 = vpop.xlane.xlu2 %2814  ;;  %v4510_v8 = vpop.eup %4509  ;;  %v5929_v35 = vmul.f32 %v4508_v36, %v5737_v60 }
 0x450   : > { %v2839_v18 = vsub.f32 %v5727_v52, %v2815_v40  ;;  %v1210_v50 = vpop.f32.mrf.mxu0  ;;  %v5932_v52 = vmul.f32 %v4510_v8, %v5646_v29  ;;  %v5942_v8 = vpop.f32.mrf.mxu1 }
 0x451   : > { %1235 = vst.msk [vmem:[#allocation3 + $0x50] sm:$0xff] %vm862_vm0, %v1210_v50 }
 0x452   : > { %v2862_v53 = vmul.f32 1.442695, %v2839_v18  ;;  %6524 = vst [vmem:[#allocation38_spill] sm:$0xff] %v5932_v52  ;;  %v1693_v18 = vpack.c.bf16 %v5932_v52, %v5929_v35 }
 0x453   : > { %6525 = vst [vmem:[#allocation39_spill] sm:$0xff] %v5942_v8 }
 0x454   : > { %4511 = vpow2.f32 %v2862_v53  ;;  %v5925_v43 = vpop.xlane.xlu0 %2165 }
 0x455   : > { %2389 = vrot.lane.b32.xlu2 %v3967_v11, %s4866_s27 }
 0x457   : > { %v1597_v31 = vpop.xlane.xlu2 %1596 }
 0x458   : > { %v1212_v40 = vpop.f32.mrf.mxu0  ;;  %4513 = vrcp.f32 %v1597_v31 }
 0x459   : > { %1236 = vst.msk [vmem:[#allocation3 + $0x58] sm:$0xff] %vm862_vm0, %v1212_v40  ;;  %4515 = vrcp.f32 %v5874_v34 }
 0x45a   : > { %v5937_v50 = vpop.eup %4511  ;;  %4517 = vrcp.f32 %v1601_v62 }
 0x45b   : > { %1785 = vmatmul.bf16.gmra.mxu2 %v1693_v18  ;;  %2894 = vadd.xlane.f32.xlu1 %v5937_v50 }
 0x45c   : > { %v2168_v44 = vpop.xlane.xlu0 %2167 }
 0x45d   : > { %v2190_v53 = vsub.f32 %v5768_v33, %v2168_v44 }
 0x45e   : > { %v4514_v29 = vpop.eup %4513 }
 0x45f   : > { %v1603_v60 = vpop.xlane.xlu2 %1602  ;;  %v4516_v36 = vpop.eup %4515  ;;  %v5947_v40 = vmul.f32 %v4514_v29, %v5763_v63  ;;  %v2215_v34 = vmul.f32 1.442695, %v2190_v53 }
 0x460   : > { %v1215_v54 = vpop.f32.mrf.mxu0  ;;  %v5950_v18 = vmul.f32 %v4516_v36, %v5699_v37  ;;  %v6527_v37 = vld [vmem:[#allocation21_spill] sm:$0xff] }
 0x461   : > { %1237 = vst.msk [vmem:[#allocation3 + $0x60] sm:$0xff] %vm862_vm0, %v1215_v54  ;;  %4519 = vpow2.f32 %v2215_v34  ;;  %v2835_v33 = vsub.f32 %v6527_v37, %v5794_v5  ;;  %v6529_v34 = vld [vmem:[#allocation20_spill] sm:$0xff] }
 0x462   : > { %6526 = vst [vmem:[#allocation40_spill] sm:$0xff] %v5950_v18  ;;  %v1694_v54 = vpack.c.bf16 %v5947_v40, %v5950_v18  ;;  %v6530_v18 = vld [vmem:[#allocation26_spill] sm:$0xff] }
 0x463   : > { %2830 = vmax.xlane.f32.xlu1 %v5942_v8  ;;  %v5955_v8 = vpop.f32.mrf.mxu3  ;;  %v1661_v5 = vadd.f32 %v5786_v10, %v6530_v18 }
 0x464   : > { %v2234_v11 = vpop.xlane.xlu0 %2233 }
 0x467   : > { %v2394_v31 = vpop.permute.xlu2 %2393 }
 0x468   : > { %v1217_v52 = vpop.f32.mrf.mxu0  ;;  %2418 = vmatpush.bf16.msra.mxu0 %v2394_v31  ;;  %v6528_v31 = vld [vmem:[#allocation23_spill] sm:$0xff] }
 0x469   : > { %1238 = vst.msk [vmem:[#allocation3 + $0x68] sm:$0xff] %vm862_vm0, %v1217_v52  ;;  %v4518_v52 = vpop.eup %4517 }
 0x46a   : > { %v5962_v36 = vpop.eup %4519 }
 0x46b   : > { %1790 = vmatmul.bf16.gmra.mxu2 %v1694_v54  ;;  %2177 = vmax.xlane.f32.xlu1 %v5955_v8  ;;  %v2185_v54 = vsub.f32 %v6529_v34, %v6528_v31 }
 0x46c   : > { %v2236_v63 = vpop.xlane.xlu0 %2235 }
 0x46d   : > { %4521 = vrcp.f32 %v2236_v63  ;;  %v2854_v63 = vmul.f32 1.442695, %v2835_v33  ;;  %v2205_v22 = vmul.f32 1.442695, %v2185_v54 }
 0x46e   : > { %4523 = vrcp.f32 %v5878_v59 }
 0x46f   : > { %v3041_v44 = vpop.permute.xlu2 %3040 }
 0x470   : > { %v1220_v29 = vpop.f32.mrf.mxu0  ;;  %3071 = vmatpush.bf16.msra.mxu2 %v3041_v44 }
 0x471   : > { %1239 = vst.msk [vmem:[#allocation3 + $0x70] sm:$0xff] %vm862_vm0, %v1220_v29  ;;  %v5975_v29 = vmul.f32 %v4518_v52, %v5732_v19 }
 0x472   : > { %v5964_v62 = vpop.xlane.xlu1 %1608 }
 0x473   : > { %v4522_v53 = vpop.eup %4521  ;;  %2247 = vadd.xlane.f32.xlu1 %v5962_v36 }
 0x474   : > { %v4524_v59 = vpop.eup %4523  ;;  %v2883_v37 = vpop.xlane.xlu0 %2882  ;;  %v5972_v44 = vmul.f32 %v4522_v53, %v5804_v2 }
 0x475   : > { %4525 = vrcp.f32 %v2883_v37  ;;  %v5981_v31 = vmul.f32 %v4524_v59, %v5666_v6 }
 0x476   : > { %v5978_v1 = vadd.f32 %v5972_v44, %v1661_v5  ;;  %4527 = vpow2.f32 %v2854_v63  ;;  %v6531_v63 = vld [vmem:[#allocation22_spill] sm:$0xff] }
 0x477   : > { %v2392_v33 = vpop.permute.xlu2 %2391  ;;  %v1695_v10 = vpack.c.bf16 %v5975_v29, %v5981_v31  ;;  %4529 = vpow2.f32 %v2205_v22  ;;  %v2837_v59 = vsub.f32 %v6531_v63, %v5820_v0 }
 0x478   : > { %v1222_v34 = vpop.f32.mrf.mxu0  ;;  %2419 = vmatpush.bf16.msra.mxu0 %v2392_v33  ;;  %4531 = vrcp.f32 %v1603_v60 }
 0x479   : > { %1240 = vst.msk [vmem:[#allocation3 + $0x78] sm:$0xff] %vm862_vm0, %v1222_v34  ;;  %4533 = vrcp.f32 %v5891_v45  ;;  %v2858_v37 = vmul.f32 1.442695, %v2837_v59 }
 0x47a   : > { %v2819_v2 = vpop.xlane.xlu1 %2818  ;;  %4535 = vrcp.f32 %v2234_v11 }
 0x47b   : > { %v4526_v18 = vpop.eup %4525  ;;  %v2841_v19 = vsub.f32 %v5800_v24, %v2819_v2  ;;  %1795 = vmatmul.bf16.gmra.mxu2 %v1695_v10  ;;  %v2189_v24 = vsub.f32 %v5753_v48, %v5925_v43 }
 0x47c   : > { %v5988_v52 = vmul.f32 %v4526_v18, %v5814_v51  ;;  %v2823_v6 = vpop.xlane.xlu0 %2822  ;;  %v5990_v53 = vpop.eup %4527 }
 0x47d   : > { %v2866_v54 = vmul.f32 1.442695, %v2841_v19  ;;  %v6000_v60 = vpop.eup %4529  ;;  %v2213_v11 = vmul.f32 1.442695, %v2189_v24  ;;  %v2843_v43 = vsub.f32 %v5823_v23, %v2823_v6 }
 0x47e   : > { %v2961_v22 = vadd.f32 %v5988_v52, %v5857_v47  ;;  %2886 = vadd.xlane.f32.xlu2 %v5990_v53  ;;  %v4532_v5 = vpop.eup %4531 }
 0x47f   : > { %4537 = vpow2.f32 %v2866_v54  ;;  %v4534_v45 = vpop.eup %4533  ;;  %v6009_v48 = vmul.f32 %v4532_v5, %v5766_v58  ;;  %v6532_v58 = vld [vmem:[#allocation25_spill] sm:$0xff]  ;;  %v2870_v23 = vmul.f32 1.442695, %v2843_v43 }
 0x480   : > { %v3211_v51 = vmul.f32 0.25, %v2961_v22  ;;  %v4536_v47 = vpop.eup %4535  ;;  %v6015_v10 = vmul.f32 %v4534_v45, %v5687_v21  ;;  %v1660_v54 = vadd.f32 %v5783_v15, %v6532_v58 }
 0x481   : > { %v6018_v2 = vmul.f32 %v4536_v47, %v5788_v28 }
 0x482   : > { %3227 = vst [vmem:[%s6003_s30 + $0x8] sm:$0xff] %v3211_v51  ;;  %v2881_v0 = vpop.xlane.xlu1 %2880  ;;  %v1696_v19 = vpack.c.bf16 %v6015_v10, %v6009_v48 }
 0x483   : > { %4539 = vrcp.f32 %v2881_v0  ;;  %v2311_v24 = vadd.f32 %v6018_v2, %v1660_v54  ;;  %v1663_v54 = vadd.f32 %v5912_v30, %v5656_v3 }
 0x484   : > { %v2885_v33 = vpop.xlane.xlu0 %2884 }
 0x485   : > { %v6006_v34 = vpop.eup %4537  ;;  %4541 = vrcp.f32 %v2885_v33 }
 0x486   : > { %4543 = vpow2.f32 %v2858_v37  ;;  %2898 = vadd.xlane.f32.xlu0 %v6006_v34  ;;  %2237 = vadd.xlane.f32.xlu2 %v6000_v60 }
 0x487   : > { %4545 = vpow2.f32 %v2213_v11 }
 0x488   : > { %4547 = vpow2.f32 %v2870_v23 }
 0x489   : > { %v4540_v18 = vpop.eup %4539 }
 0x48a   : > { %v6025_v63 = vmul.f32 %v4540_v18, %v5830_v49  ;;  %v2821_v59 = vpop.xlane.xlu1 %2820 }
 0x48b   : > { %v4542_v22 = vpop.eup %4541  ;;  %1800 = vmatmul.bf16.gmra.mxu2 %v1696_v19 }
 0x48c   : > { %v6027_v21 = vpop.eup %4543  ;;  %v2960_v28 = vadd.f32 %v6025_v63, %v5904_v25  ;;  %v2170_v6 = vpop.xlane.xlu0 %2169  ;;  %v6033_v51 = vmul.f32 %v4542_v22, %v5835_v27 }
 0x48d   : > { %v6035_v15 = vpop.eup %4545  ;;  %v2191_v49 = vsub.f32 %v5827_v32, %v2170_v6  ;;  %v6533_v32 = vld [vmem:[#allocation24_spill] sm:$0xff] }
 0x48e   : > { %v3210_v5 = vmul.f32 0.25, %v2960_v28  ;;  %2245 = vadd.xlane.f32.xlu0 %v6035_v15  ;;  %2890 = vadd.xlane.f32.xlu2 %v6027_v21  ;;  %v2962_v37 = vadd.f32 %v6033_v51, %v2311_v24  ;;  %v6043_v11 = vpop.eup %4547  ;;  %v2188_v47 = vsub.f32 %v6533_v32, %v5802_v56  ;;  %v2840_v28 = vsub.f32 %v5744_v61, %v5920_v42 }
 0x48f   : > { %v2217_v25 = vmul.f32 1.442695, %v2191_v49 }
 0x490   : > { %3226 = vst [vmem:[%s6003_s30] sm:$0xff] %v3210_v5  ;;  %v3212_v0 = vmul.f32 0.25, %v2962_v37  ;;  %v2211_v43 = vmul.f32 1.442695, %v2188_v47  ;;  %v2864_v24 = vmul.f32 1.442695, %v2840_v28  ;;  %v2342_v28 = vpack.c.bf16 %v5972_v44, %v6018_v2 }
 0x491   : > { %4549 = vpow2.f32 %v2217_v25  ;;  %v6079_v25 = vpop.f32.mrf.mxu3 }
 0x492   : > { %v2172_v45 = vpop.xlane.xlu1 %2171  ;;  %3228 = vst [vmem:[%s6003_s30 + $0x10] sm:$0xff] %v3212_v0 }
 0x493   : > { %v2192_v0 = vsub.f32 %v5841_v7, %v2172_v45  ;;  %v6534_v7 = vpack.c.bf16 %v5851_v14, %v5901_v9 }
 0x494   : > { %v2240_v27 = vpop.xlane.xlu0 %2239 }
 0x495   : > { %4551 = vrcp.f32 %v2240_v27 }
 0x496   : > { %2902 = vadd.xlane.f32.xlu0 %v6043_v11  ;;  %2826 = vmax.xlane.f32.xlu2 %v5872_v57  ;;  %4553 = vpow2.f32 %v2211_v43 }
 0x497   : > { %v6049_v33 = vpop.eup %4549 }
 0x498   : > { %2249 = vadd.xlane.f32.xlu1 %v6049_v33 }
 0x49a   : > { %v2825_v18 = vpop.xlane.xlu1 %2824 }
 0x49b   : > { %v4552_v19 = vpop.eup %4551  ;;  %v2844_v58 = vsub.f32 %v5861_v41, %v2825_v18 }
 0x49c   : > { %v2176_v22 = vpop.xlane.xlu0 %2175  ;;  %v6056_v23 = vmul.f32 %v4552_v19, %v5854_v13  ;;  %v6065_v3 = vpop.eup %4553 }
 0x49d   : > { %v2872_v56 = vmul.f32 1.442695, %v2844_v58  ;;  %v2194_v41 = vsub.f32 %v5864_v17, %v2176_v22  ;;  %v2842_v17 = vsub.f32 %v5811_v55, %v2821_v59  ;;  %v2219_v55 = vmul.f32 1.442695, %v2192_v0 }
 0x49e   : > { %2173 = vmax.xlane.f32.xlu2 %v5846_v16  ;;  %v6062_v6 = vadd.f32 %v6056_v23, %v1663_v54  ;;  %v1664_v54 = vadd.f32 %v5929_v35, %v5673_v46 }
 0x49f   : > { %4555 = vpow2.f32 %v2872_v56  ;;  %v2223_v49 = vmul.f32 1.442695, %v2194_v41  ;;  %v2868_v5 = vmul.f32 1.442695, %v2842_v17  ;;  %v2992_v56 = vpack.c.bf16 %v5988_v52, %v6025_v63 }
 0x4a0   : > { %4557 = vpow2.f32 %v2864_v24 }
 0x4a1   : > { %4559 = vpow2.f32 %v2223_v49 }
 0x4a2   : > { %4561 = vrcp.f32 %v5964_v62 }
 0x4a5   : > { %v6067_v30 = vpop.eup %4555 }
 0x4a6   : > { %2904 = vadd.xlane.f32.xlu0 %v6067_v30  ;;  %2243 = vadd.xlane.f32.xlu2 %v6065_v3  ;;  %v6071_v61 = vpop.eup %4557 }
 0x4a7   : > { %v6073_v13 = vpop.eup %4559 }
 0x4a8   : > { %v4562_v37 = vpop.eup %4561 }
 0x4a9   : > { %v6087_v62 = vmul.f32 %v4562_v37, %v5809_v39 }
 0x4ab   : > { %v2893_v18 = vpop.xlane.xlu0 %2892 }
 0x4ae   : > { %2255 = vadd.xlane.f32.xlu0 %v6073_v13  ;;  %2896 = vadd.xlane.f32.xlu2 %v6071_v61 }
 0x4b0   : > { %v1607_v42 = vpop.xlane.xlu2 %1606 }
 0x4b1   : > { %4563 = vrcp.f32 %v1607_v42 }
 0x4b2   : > { %4565 = vpow2.f32 %v2868_v5 }
 0x4b3   : > { %4567 = vpow2.f32 %v2219_v55  ;;  %v2829_v0 = vpop.xlane.xlu0 %2828 }
 0x4b4   : > { %4569 = vrcp.f32 %v2893_v18 }
 0x4b6   : > { %v2889_v27 = vpop.xlane.xlu1 %2888  ;;  %2179 = vmax.xlane.f32.xlu2 %v6079_v25 }
 0x4b7   : > { %v4564_v32 = vpop.eup %4563 }
 0x4b8   : > { %v2390_v47 = vpop.permute.xlu2 %2389  ;;  %v6084_v43 = vmul.f32 %v4564_v32, %v5883_v12  ;;  %v6094_v45 = vpop.eup %4565 }
 0x4b9   : > { %2420 = vmatpush.bf16.msra.mxu0 %v2390_v47  ;;  %v6097_v39 = vpop.eup %4567 }
 0x4ba   : > { %v1697_v59 = vpack.c.bf16 %v6087_v62, %v6084_v43  ;;  %v4570_v19 = vpop.eup %4569 }
 0x4bb   : > { %v6106_v9 = vmul.f32 %v4570_v19, %v5876_v26 }
 0x4bc   : > { %1805 = vmatmul.bf16.gmra.mxu2 %v1697_v59  ;;  %2421 = vmatmul.bf16.vlgmr.msra.gmra.mxu0 %v6534_v7 }
 0x4be   : > { %v2242_v12 = vpop.xlane.xlu1 %2241  ;;  %2900 = vadd.xlane.f32.xlu2 %v6094_v45 }
 0x4bf   : > { %4571 = vrcp.f32 %v2242_v12 }
 0x4c5   : > { %v4572_v58 = vpop.eup %4571 }
 0x4c6   : > { %2251 = vadd.xlane.f32.xlu2 %v6097_v39  ;;  %v6103_v14 = vmul.f32 %v4572_v58, %v5917_v38  ;;  %v6115_v38 = vpop.f32.mrf.mxu2 }
 0x4c8   : > { %v2315_v22 = vadd.f32 %v6103_v14, %v1664_v54 }
 0x4ca   : > { %v2966_v41 = vadd.f32 %v6106_v9, %v2315_v22 }
 0x4cc   : > { %2426 = vmatmul.bf16.gmra.mxu0 %v2342_v28  ;;  %3072 = vmatmul.bf16.vlgmr.msra.gmra.mxu2 %v2992_v56  ;;  %v3216_v46 = vmul.f32 0.25, %v2966_v41  ;;  %v6535_v41 = vld [vmem:[#allocation37_spill] sm:$0xff] }
 0x4ce   : > { %v2895_v35 = vpop.xlane.xlu1 %2894  ;;  %3232 = vst [vmem:[%s6003_s30 + $0x30] sm:$0xff] %v3216_v46  ;;  %v6124_v44 = vpop.f32.mrf.mxu2 }
 0x4cf   : > { %4573 = vrcp.f32 %v2895_v35 }
 0x4d5   : > { %v4574_v26 = vpop.eup %4573 }
 0x4d6   : > { %v6117_v24 = vpop.xlane.xlu1 %2830  ;;  %v6120_v49 = vmul.f32 %v4574_v26, %v5937_v50  ;;  %v6127_v42 = vpop.f32.mrf.mxu2 }
 0x4d8   : > { %v2995_v52 = vpack.c.bf16 %v6120_v49, %v6106_v9 }
 0x4de   : > { %v2178_v2 = vpop.xlane.xlu1 %2177  ;;  %v1778_v37 = vpop.f32.mrf.mxu2 }
 0x4df   : > { %v2195_v63 = vsub.f32 %v5955_v8, %v2178_v2  ;;  %v6536_v2 = vld [vmem:[#allocation36_spill] sm:$0xff] }
 0x4e1   : > { %v2225_v17 = vmul.f32 1.442695, %v2195_v63 }
 0x4e3   : > { %4575 = vpow2.f32 %v2225_v17 }
 0x4e6   : > { %v2248_v50 = vpop.xlane.xlu1 %2247  ;;  %v6132_v55 = vpop.f32.mrf.mxu2 }
 0x4e9   : > { %v6129_v5 = vpop.eup %4575 }
 0x4ea   : > { %2257 = vadd.xlane.f32.xlu0 %v6129_v5 }
 0x4ee   : > { %v6150_v46 = vpop.f32.mrf.mxu2 }
 0x4f1   : > { %v2887_v32 = vpop.xlane.xlu2 %2886 }
 0x4f2   : > { %4577 = vrcp.f32 %v2887_v32 }
 0x4f3   : > { %4579 = vrcp.f32 %v2248_v50 }
 0x4f4   : > { %4581 = vrcp.f32 %v2889_v27  ;;  %v1667_v27 = vadd.f32 %v5947_v40, %v5697_v20 }
 0x4f8   : > { %v4578_v47 = vpop.eup %4577 }
 0x4f9   : > { %v2899_v8 = vpop.xlane.xlu0 %2898  ;;  %v2238_v59 = vpop.xlane.xlu2 %2237  ;;  %v2931_v18 = vmul.f32 %v4578_v47, %v5990_v53 }
 0x4fa   : > { %v4580_v7 = vpop.eup %4579  ;;  %4583 = vrcp.f32 %v2899_v8  ;;  %v6160_v47 = vpop.f32.mrf.mxu2 }
 0x4fb   : > { %4585 = vrcp.f32 %v2238_v59  ;;  %v2963_v12 = vadd.f32 %v2931_v18, %v5978_v1  ;;  %v2993_v19 = vpack.c.bf16 %v2931_v18, %v6033_v51  ;;  %v6138_v54 = vmul.f32 %v4580_v7, %v5962_v36  ;;  %v4582_v22 = vpop.eup %4581  ;;  %v6537_v18 = vld [vmem:[#allocation35_spill] sm:$0xff] }
 0x4fc   : > { %v1662_v36 = vadd.f32 %v6535_v41, %v5653_v4  ;;  %v2932_v63 = vmul.f32 %v4582_v22, %v6536_v2  ;;  %v2846_v7 = vsub.f32 %v6537_v18, %v2829_v0 }
 0x4fd   : > { %3077 = vmatmul.bf16.gmra.mxu2 %v2993_v19  ;;  %v3213_v58 = vmul.f32 0.25, %v2963_v12  ;;  %v2318_v51 = vadd.f32 %v6138_v54, %v1667_v27  ;;  %v6538_v27 = vld [vmem:[#allocation39_spill] sm:$0xff] }
 0x4fe   : > { %1833 = vrot.lane.b32.xlu0 %v1778_v37, %s4868_s26  ;;  %v2876_v19 = vmul.f32 1.442695, %v2846_v7 }
 0x4ff   : > { %3229 = vst [vmem:[%s6003_s30 + $0x18] sm:$0xff] %v3213_v58 }
 0x500   : > { %v4584_v53 = vpop.eup %4583 }
 0x501   : > { %v4586_v56 = vpop.eup %4585  ;;  %v2891_v28 = vpop.xlane.xlu2 %2890  ;;  %v6145_v1 = vmul.f32 %v4584_v53, %v6006_v34 }
 0x502   : > { %v2281_v35 = vmul.f32 %v4586_v56, %v6000_v60  ;;  %4587 = vrcp.f32 %v2891_v28  ;;  %v6171_v53 = vpop.f32.mrf.mxu2  ;;  %v2246_v28 = vpop.xlane.xlu0 %2245 }
 0x503   : > { %v2969_v20 = vadd.f32 %v6145_v1, %v2318_v51 }
 0x504   : > { %v2313_v40 = vadd.f32 %v2281_v35, %v1662_v36  ;;  %v2343_v26 = vpack.c.bf16 %v6056_v23, %v2281_v35  ;;  %v6539_v35 = vld [vmem:[#allocation27_spill] sm:$0xff] }
 0x505   : > { %v3219_v34 = vmul.f32 0.25, %v2969_v20  ;;  %v6540_v20 = vld [vmem:[#allocation38_spill] sm:$0xff] }
 0x506   : > { %2431 = vmatmul.bf16.gmra.mxu0 %v2343_v26  ;;  %v2964_v17 = vadd.f32 %v2932_v63, %v2313_v40  ;;  %v1665_v40 = vadd.f32 %v6540_v20, %v6539_v35 }
 0x507   : > { %3235 = vst [vmem:[%s6003_s30 + $0x48] sm:$0xff] %v3219_v34 }
 0x508   : > { %v3214_v37 = vmul.f32 0.25, %v2964_v17  ;;  %v4588_v4 = vpop.eup %4587 }
 0x509   : > { %v2827_v50 = vpop.xlane.xlu2 %2826  ;;  %v2933_v60 = vmul.f32 %v4588_v4, %v6027_v21  ;;  %v6542_v4 = vld [vmem:[#allocation40_spill] sm:$0xff] }
 0x50a   : > { %v2845_v32 = vsub.f32 %v5872_v57, %v2827_v50  ;;  %3230 = vst [vmem:[%s6003_s30 + $0x20] sm:$0xff] %v3214_v37  ;;  %v6541_v37 = vld [vmem:[#allocation28_spill] sm:$0xff] }
 0x50b   : > { %v2965_v23 = vadd.f32 %v2933_v60, %v6062_v6  ;;  %v2994_v59 = vpack.c.bf16 %v2933_v60, %v2932_v63  ;;  %v2847_v6 = vsub.f32 %v6538_v27, %v6117_v24  ;;  %v1666_v50 = vadd.f32 %v6542_v4, %v6541_v37  ;;  %v2250_v60 = vpop.xlane.xlu1 %2249 }
 0x50c   : > { %v2874_v8 = vmul.f32 1.442695, %v2845_v32 }
 0x50d   : > { %3082 = vmatmul.bf16.gmra.mxu2 %v2994_v59  ;;  %v3215_v12 = vmul.f32 0.25, %v2965_v23  ;;  %v2878_v56 = vmul.f32 1.442695, %v2847_v6  ;;  %v6543_v6 = vld [vmem:[#allocation30_spill] sm:$0xff] }
 0x50e   : > { %4589 = vpow2.f32 %v2874_v8 }
 0x50f   : > { %3231 = vst [vmem:[%s6003_s30 + $0x28] sm:$0xff] %v3215_v12  ;;  %4591 = vpow2.f32 %v2876_v19  ;;  %v2903_v12 = vpop.xlane.xlu0 %2902 }
 0x511   : > { %v2174_v58 = vpop.xlane.xlu2 %2173 }
 0x512   : > { %v2193_v22 = vsub.f32 %v5846_v16, %v2174_v58  ;;  %v6182_v16 = vpop.f32.mrf.mxu2 }
 0x514   : > { %v6166_v57 = vpop.eup %4589  ;;  %v2221_v21 = vmul.f32 1.442695, %v2193_v22 }
 0x515   : > { %2906 = vadd.xlane.f32.xlu1 %v6166_v57  ;;  %v6173_v51 = vpop.eup %4591 }
 0x516   : > { %4593 = vpow2.f32 %v2221_v21 }
 0x519   : > { %v2244_v0 = vpop.xlane.xlu2 %2243 }
 0x51a   : > { %4595 = vrcp.f32 %v2244_v0  ;;  %v6195_v23 = vpop.f32.mrf.mxu2  ;;  %v1668_v0 = vadd.f32 %v5981_v31, %v6543_v6 }
 0x51b   : > { %4597 = vrcp.f32 %v2246_v28 }
 0x51c   : > { %v6175_v41 = vpop.eup %4593  ;;  %4599 = vpow2.f32 %v2878_v56 }
 0x51d   : > { %2908 = vadd.xlane.f32.xlu1 %v6173_v51  ;;  %2253 = vadd.xlane.f32.xlu2 %v6175_v41 }
 0x51e   : > { %3087 = vmatmul.bf16.gmra.mxu2 %v2995_v52 }
 0x520   : > { %v4596_v24 = vpop.eup %4595 }
 0x521   : > { %v2897_v36 = vpop.xlane.xlu2 %2896  ;;  %v2284_v26 = vmul.f32 %v4596_v24, %v6065_v3  ;;  %v4598_v2 = vpop.eup %4597 }
 0x522   : > { %4601 = vrcp.f32 %v2897_v36  ;;  %v6187_v63 = vpop.eup %4599  ;;  %v2285_v52 = vmul.f32 %v4598_v2, %v6035_v15  ;;  %v6544_v2 = vld [vmem:[#allocation29_spill] sm:$0xff] }
 0x523   : > { %v2316_v34 = vadd.f32 %v2284_v26, %v1665_v40  ;;  %v2344_v17 = vpack.c.bf16 %v2284_v26, %v6103_v14  ;;  %4603 = vrcp.f32 %v2250_v60 }
 0x524   : > { %v2317_v18 = vadd.f32 %v2285_v52, %v1666_v50 }
 0x525   : > { %2910 = vadd.xlane.f32.xlu2 %v6187_v63  ;;  %2436 = vmatmul.bf16.gmra.mxu0 %v2344_v17  ;;  %v2967_v9 = vadd.f32 %v6120_v49, %v2316_v34  ;;  %v1669_v34 = vadd.f32 %v5975_v29, %v6544_v2  ;;  %v6547_v2 = vld [vmem:[#allocation32_spill] sm:$0xff] }
 0x527   : > { %v3217_v32 = vmul.f32 0.25, %v2967_v9 }
 0x528   : > { %v4602_v3 = vpop.eup %4601 }
 0x529   : > { %v2180_v8 = vpop.xlane.xlu2 %2179  ;;  %3233 = vst [vmem:[%s6003_s30 + $0x38] sm:$0xff] %v3217_v32  ;;  %v2936_v59 = vmul.f32 %v4602_v3, %v6071_v61  ;;  %v4604_v22 = vpop.eup %4603  ;;  %v2345_v61 = vpack.c.bf16 %v6138_v54, %v2285_v52 }
 0x52a   : > { %v2196_v14 = vsub.f32 %v6079_v25, %v2180_v8  ;;  %v6204_v25 = vpop.f32.mrf.mxu2 }
 0x52b   : > { %v2996_v15 = vpack.c.bf16 %v6145_v1, %v2936_v59  ;;  %v2968_v7 = vadd.f32 %v2936_v59, %v2317_v18  ;;  %v2287_v1 = vmul.f32 %v4604_v22, %v6049_v33 }
 0x52c   : > { %v2227_v49 = vmul.f32 1.442695, %v2196_v14 }
 0x52d   : > { %v3218_v19 = vmul.f32 0.25, %v2968_v7  ;;  %v2319_v20 = vadd.f32 %v2287_v1, %v1668_v0 }
 0x52e   : > { %4605 = vpow2.f32 %v2227_v49  ;;  %3092 = vmatmul.bf16.gmra.mxu2 %v2996_v15 }
 0x52f   : > { %4607 = vrcp.f32 %v2903_v12  ;;  %3234 = vst [vmem:[%s6003_s30 + $0x40] sm:$0xff] %v3218_v19 }
 0x531   : > { %v2901_v58 = vpop.xlane.xlu2 %2900 }
 0x532   : > { %4609 = vrcp.f32 %v2901_v58  ;;  %v6217_v26 = vpop.f32.mrf.mxu2  ;;  %v6545_v58 = vld [vmem:[#allocation31_spill] sm:$0xff] }
 0x533   : > { %v1671_v22 = vadd.f32 %v6015_v10, %v6545_v58 }
 0x534   : > { %v6202_v21 = vpop.eup %4605 }
 0x535   : > { %2259 = vadd.xlane.f32.xlu1 %v6202_v21  ;;  %v4608_v27 = vpop.eup %4607  ;;  %2441 = vmatmul.bf16.gmra.mxu0 %v2345_v61 }
 0x536   : > { %v2939_v35 = vmul.f32 %v4608_v27, %v6043_v11 }
 0x538   : > { %v4610_v56 = vpop.eup %4609 }
 0x539   : > { %v6211_v28 = vpop.f32.mrf.mxu0  ;;  %v2252_v24 = vpop.xlane.xlu2 %2251  ;;  %v2938_v36 = vmul.f32 %v4610_v56, %v6094_v45 }
 0x53a   : > { %4611 = vrcp.f32 %v2252_v24  ;;  %v6227_v37 = vpop.f32.mrf.mxu2 }
 0x53b   : > { %v2997_v54 = vpack.c.bf16 %v2939_v35, %v2938_v36  ;;  %v2970_v40 = vadd.f32 %v2938_v36, %v2319_v20  ;;  %v6546_v20 = vld [vmem:[#allocation33_spill] sm:$0xff] }
 0x53d   : > { %1831 = vrot.lane.b32.xlu2 %v6127_v42, %s4868_s26  ;;  %v3220_v33 = vmul.f32 0.25, %v2970_v40 }
 0x53e   : > { %3097 = vmatmul.bf16.gmra.mxu2 %v2997_v54  ;;  %v1672_v54 = vadd.f32 %v6084_v43, %v6546_v20 }
 0x53f   : > { %3236 = vst [vmem:[%s6003_s30 + $0x50] sm:$0xff] %v3220_v33 }
 0x540   : > { %v4612_v31 = vpop.eup %4611 }
 0x541   : > { %v6222_v45 = vpop.f32.mrf.mxu0  ;;  %v2288_v11 = vmul.f32 %v4612_v31, %v6097_v39  ;;  %v2905_v39 = vpop.xlane.xlu0 %2904 }
 0x542   : > { %v6231_v29 = vpop.f32.mrf.mxu2 }
 0x543   : > { %v2320_v17 = vadd.f32 %v2288_v11, %v1669_v34  ;;  %v2346_v9 = vpack.c.bf16 %v2288_v11, %v2287_v1  ;;  %v1670_v34 = vadd.f32 %v6009_v48, %v6547_v2 }
 0x545   : > { %1837 = vrot.lane.b32.xlu2 %v6150_v46, %s4868_s26  ;;  %v2971_v42 = vadd.f32 %v2939_v35, %v2320_v17  ;;  %2446 = vmatmul.bf16.gmra.mxu0 %v2346_v9 }
 0x547   : > { %v3221_v52 = vmul.f32 0.25, %v2971_v42 }
 0x549   : > { %3237 = vst [vmem:[%s6003_s30 + $0x58] sm:$0xff] %v3221_v52  ;;  %v2427_v4 = vpop.f32.mrf.mxu0  ;;  %v2256_v46 = vpop.xlane.xlu0 %2255 }
 0x54a   : > { %v6236_v32 = vpop.f32.mrf.mxu2  ;;  %4613 = vrcp.f32 %v2256_v46 }
 0x54b   : > { %4615 = vrcp.f32 %v2905_v39 }
 0x54e   : > { %2482 = vrot.lane.b32.xlu1 %v2427_v4, %s4866_s27 }
 0x550   : > { %v4614_v15 = vpop.eup %4613 }
 0x551   : > { %v2429_v50 = vpop.f32.mrf.mxu0  ;;  %v2290_v12 = vmul.f32 %v4614_v15, %v6073_v13  ;;  %v4616_v19 = vpop.eup %4615 }
 0x552   : > { %2484 = vrot.lane.b32.xlu0 %v2429_v50, %s4866_s27  ;;  %v6240_v3 = vpop.f32.mrf.mxu2  ;;  %v2940_v6 = vmul.f32 %v4616_v19, %v6067_v30 }
 0x553   : > { %v2322_v0 = vadd.f32 %v2290_v12, %v1671_v22 }
 0x556   : > { %1835 = vrot.lane.b32.xlu1 %v6132_v55, %s4868_s26 }
 0x55a   : > { %v6242_v8 = vpop.f32.mrf.mxu2 }
 0x55d   : > { %v2258_v60 = vpop.xlane.xlu0 %2257 }
 0x55e   : > { %1839 = vrot.lane.b32.xlu1 %v6160_v47, %s4868_s26 }
 0x562   : > { %v6245_v59 = vpop.f32.mrf.mxu2 }
 0x570   : > { %v1834_v14 = vpop.permute.xlu0 %1833 }
 0x571   : > { %1879 = vst.msk [vmem:[#allocation3 + $0x18] sm:$0xff] %vm1875_vm1, %v1834_v14 }
 0x580   : > { %v3078_v18 = vpop.f32.mrf.mxu2 }
 0x581   : > { %3133 = vrot.lane.b32.xlu2 %v3078_v18, %s4867_s8 }
 0x583   : > { %v2432_v55 = vpop.f32.mrf.mxu0 }
 0x584   : > { %2486 = vrot.lane.b32.xlu0 %v2432_v55, %s4866_s27  ;;  %v6548_v55 = vld [vmem:[#allocation34_spill] sm:$0xff] }
 0x588   : > { %v3080_v47 = vpop.f32.mrf.mxu2  ;;  %v2907_v49 = vpop.xlane.xlu1 %2906 }
 0x589   : > { %4617 = vrcp.f32 %v2907_v49  ;;  %1841 = vrot.lane.b32.xlu2 %v6171_v53, %s4868_s26 }
 0x58a   : > { %4619 = vrcp.f32 %v2258_v60 }
 0x58b   : > { %v2434_v7 = vpop.f32.mrf.mxu0 }
 0x58c   : > { %3135 = vrot.lane.b32.xlu0 %v3080_v47, %s4867_s8  ;;  %2488 = vrot.lane.b32.xlu1 %v2434_v7, %s4866_s27  ;;  %v1673_v47 = vadd.f32 %v6087_v62, %v6548_v55 }
 0x58f   : > { %v4618_v61 = vpop.eup %4617 }
 0x590   : > { %v2909_v1 = vpop.xlane.xlu1 %2908  ;;  %v2254_v27 = vpop.xlane.xlu2 %2253  ;;  %v2941_v53 = vmul.f32 %v4618_v61, %v6166_v57 }
 0x591   : > { %v4620_v56 = vpop.eup %4619  ;;  %v3083_v24 = vpop.f32.mrf.mxu2  ;;  %4621 = vrcp.f32 %v2909_v1 }
 0x592   : > { %4623 = vrcp.f32 %v2254_v27  ;;  %3137 = vrot.lane.b32.xlu2 %v3083_v24, %s4867_s8  ;;  %v2998_v13 = vpack.c.bf16 %v2941_v53, %v2940_v6  ;;  %v2973_v36 = vadd.f32 %v2941_v53, %v2322_v0  ;;  %v2291_v10 = vmul.f32 %v4620_v56, %v6129_v5  ;;  %v4266_v53 = vld [vmem:[#allocation10 + $0x28] sm:$0xff]  ;;  %v4265_v56 = vld [vmem:[#allocation10 + $0x20] sm:$0xff] }
 0x594   : > { %3102 = vmatmul.bf16.gmra.mxu2 %v2998_v13  ;;  %v3223_v35 = vmul.f32 0.25, %v2973_v36  ;;  %v2323_v31 = vadd.f32 %v2291_v10, %v1672_v54  ;;  %v4263_v13 = vld [vmem:[#allocation10 + $0x10] sm:$0xff]  ;;  %v4262_v36 = vld [vmem:[#allocation10 + $0x8] sm:$0xff] }
 0x596   : > { %3239 = vst [vmem:[%s6003_s30 + $0x68] sm:$0xff] %v3223_v35 }
 0x597   : > { %v4622_v30 = vpop.eup %4621 }
 0x598   : > { %v4624_v57 = vpop.eup %4623  ;;  %v2911_v40 = vpop.xlane.xlu2 %2910  ;;  %v2942_v33 = vmul.f32 %v4622_v30, %v6173_v51 }
 0x599   : > { %v3085_v11 = vpop.f32.mrf.mxu2  ;;  %4625 = vrcp.f32 %v2911_v40  ;;  %v2289_v17 = vmul.f32 %v4624_v57, %v6175_v41 }
 0x59a   : > { %1845 = vrot.lane.b32.xlu2 %v6195_v23, %s4868_s26  ;;  %v2974_v43 = vadd.f32 %v2942_v33, %v2323_v31 }
 0x59b   : > { %v2321_v5 = vadd.f32 %v2289_v17, %v1670_v34  ;;  %v2347_v9 = vpack.c.bf16 %v2290_v12, %v2289_v17 }
 0x59c   : > { %v3224_v42 = vmul.f32 0.25, %v2974_v43 }
 0x59d   : > { %2451 = vmatmul.bf16.gmra.mxu0 %v2347_v9  ;;  %v2972_v52 = vadd.f32 %v2940_v6, %v2321_v5 }
 0x59e   : > { %3240 = vst [vmem:[%s6003_s30 + $0x70] sm:$0xff] %v3224_v42 }
 0x59f   : > { %v4626_v51 = vpop.eup %4625  ;;  %v3222_v4 = vmul.f32 0.25, %v2972_v52 }
 0x5a0   : > { %v1832_v50 = vpop.permute.xlu2 %1831  ;;  %v2943_v48 = vmul.f32 %v4626_v51, %v6187_v63 }
 0x5a1   : > { %3238 = vst [vmem:[%s6003_s30 + $0x60] sm:$0xff] %v3222_v4  ;;  %v3088_v39 = vpop.f32.mrf.mxu2 }
 0x5a2   : > { %1878 = vst.msk [vmem:[#allocation3 + $0x10] sm:$0xff] %vm1875_vm1, %v1832_v50  ;;  %3141 = vrot.lane.b32.xlu2 %v3088_v39, %s4867_s8  ;;  %v2999_v41 = vpack.c.bf16 %v2943_v48, %v2942_v33  ;;  %v2437_v23 = vpop.f32.mrf.mxu0 }
 0x5a3   : > { %2490 = vrot.lane.b32.xlu0 %v2437_v23, %s4866_s27 }
 0x5a4   : > { %3107 = vmatmul.bf16.gmra.mxu2 %v2999_v41 }
 0x5a8   : > { %v2260_v46 = vpop.xlane.xlu1 %2259  ;;  %v1838_v60 = vpop.permute.xlu2 %1837 }
 0x5a9   : > { %v3090_v14 = vpop.f32.mrf.mxu2  ;;  %4627 = vrcp.f32 %v2260_v46  ;;  %1881 = vst.msk [vmem:[#allocation3 + $0x28] sm:$0xff] %vm1875_vm1, %v1838_v60 }
 0x5aa   : > { %1849 = vrot.lane.b32.xlu2 %v6217_v26, %s4868_s26  ;;  %v2439_v63 = vpop.f32.mrf.mxu0 }
 0x5ab   : > { %3139 = vrot.lane.b32.xlu0 %v3085_v11, %s4867_s8  ;;  %2492 = vrot.lane.b32.xlu1 %v2439_v63, %s4866_s27 }
 0x5af   : > { %v4628_v18 = vpop.eup %4627 }
 0x5b0   : > { %v2292_v49 = vmul.f32 %v4628_v18, %v6202_v21 }
 0x5b1   : > { %v3093_v15 = vpop.f32.mrf.mxu2 }
 0x5b2   : > { %3145 = vrot.lane.b32.xlu2 %v3093_v15, %s4867_s8  ;;  %v2324_v7 = vadd.f32 %v2292_v49, %v1673_v47  ;;  %v2348_v12 = vpack.c.bf16 %v2292_v49, %v2291_v10  ;;  %v2442_v19 = vpop.f32.mrf.mxu0 }
 0x5b3   : > { %2494 = vrot.lane.b32.xlu0 %v2442_v19, %s4866_s27  ;;  %1843 = vrot.lane.b32.xlu1 %v6182_v16, %s4868_s26 }
 0x5b4   : > { %v2975_v26 = vadd.f32 %v2943_v48, %v2324_v7  ;;  %2456 = vmatmul.bf16.gmra.mxu0 %v2348_v12 }
 0x5b6   : > { %v3225_v58 = vmul.f32 0.25, %v2975_v26 }
 0x5b8   : > { %3241 = vst [vmem:[%s6003_s30 + $0x78] sm:$0xff] %v3225_v58 }
 0x5b9   : > { %v3095_v22 = vpop.f32.mrf.mxu2 }
 0x5ba   : > { %1853 = vrot.lane.b32.xlu2 %v6231_v29, %s4868_s26  ;;  %v2444_v62 = vpop.f32.mrf.mxu0  ;;  %v4268_v29 = vld [vmem:[#allocation10 + $0x38] sm:$0xff] }
 0x5bb   : > { %3143 = vrot.lane.b32.xlu0 %v3090_v14, %s4867_s8  ;;  %2496 = vrot.lane.b32.xlu1 %v2444_v62, %s4866_s27 }
 0x5bc   : > { %4271 = vmatpush.bf16.msra.mxu3 %v4268_v29  ;;  %3334 = vmatpush.bf16.msrb.mxu0 %v4268_v29 }
 0x5c0   : > { %v2483_v21 = vpop.permute.xlu1 %2482 }
 0x5c1   : > { %2529 = vst.msk [vmem:[#allocation3 + $0x10] sm:$0xff] %vm2526_vm2, %v2483_v21  ;;  %v3098_v61 = vpop.f32.mrf.mxu2 }
 0x5c2   : > { %3149 = vrot.lane.b32.xlu2 %v3098_v61, %s4867_s8  ;;  %v2447_v16 = vpop.f32.mrf.mxu0 }
 0x5c3   : > { %1847 = vrot.lane.b32.xlu1 %v6204_v25, %s4868_s26  ;;  %2498 = vrot.lane.b32.xlu0 %v2447_v16, %s4866_s27  ;;  %v4267_v25 = vld [vmem:[#allocation10 + $0x30] sm:$0xff] }
 0x5c4   : > { %v2485_v1 = vpop.permute.xlu0 %2484  ;;  %4272 = vmatpush.bf16.msra.mxu3 %v4267_v25  ;;  %3335 = vmatpush.bf16.msrb.mxu0 %v4267_v25 }
 0x5c5   : > { %2530 = vst.msk [vmem:[#allocation3 + $0x18] sm:$0xff] %vm2526_vm2, %v2485_v1 }
 0x5c8   : > { %v1836_v27 = vpop.permute.xlu1 %1835  ;;  %4273 = vmatpush.bf16.msra.mxu3 %v4266_v53  ;;  %3336 = vmatpush.bf16.msrb.mxu0 %v4266_v53 }
 0x5c9   : > { %1880 = vst.msk [vmem:[#allocation3 + $0x20] sm:$0xff] %vm1875_vm1, %v1836_v27  ;;  %v3100_v17 = vpop.f32.mrf.mxu2 }
 0x5ca   : > { %1857 = vrot.lane.b32.xlu2 %v6240_v3, %s4868_s26  ;;  %v2449_v6 = vpop.f32.mrf.mxu0  ;;  %v4264_v3 = vld [vmem:[#allocation10 + $0x18] sm:$0xff] }
 0x5cb   : > { %3147 = vrot.lane.b32.xlu0 %v3095_v22, %s4867_s8  ;;  %2500 = vrot.lane.b32.xlu1 %v2449_v6, %s4866_s27 }
 0x5cc   : > { %4274 = vmatpush.bf16.msra.mxu3 %v4265_v56  ;;  %3337 = vmatpush.bf16.msrb.mxu0 %v4265_v56 }
 0x5d0   : > { %v1840_v0 = vpop.permute.xlu1 %1839  ;;  %4275 = vmatpush.bf16.msra.mxu3 %v4264_v3  ;;  %3338 = vmatpush.bf16.msrb.mxu0 %v4264_v3 }
 0x5d1   : > { %1882 = vst.msk [vmem:[#allocation3 + $0x30] sm:$0xff] %vm1875_vm1, %v1840_v0 }
 0x5d3   : > { %1851 = vrot.lane.b32.xlu1 %v6227_v37, %s4868_s26  ;;  %v4261_v37 = vld [vmem:[#allocation10] sm:$0xff] }
 0x5d4   : > { %4276 = vmatpush.bf16.msra.mxu3 %v4263_v13  ;;  %3339 = vmatpush.bf16.msrb.mxu0 %v4263_v13 }
 0x5d8   : > { %4277 = vmatpush.bf16.msra.mxu3 %v4262_v36  ;;  %3340 = vmatpush.bf16.msrb.mxu0 %v4262_v36 }
 0x5db   : > { %v3134_v24 = vpop.permute.xlu2 %3133 }
 0x5dc   : > { %3180 = vst.msk [vmem:[#allocation3 + $0x10] sm:$0xff] %vm3177_vm3, %v3134_v24  ;;  %4278 = vmatpush.bf16.msra.mxu3 %v4261_v37  ;;  %3341 = vmatpush.bf16.msrb.mxu0 %v4261_v37 }
 0x5e3   : > { %v1842_v35 = vpop.permute.xlu2 %1841  ;;  %v3244_v31 = vld [vmem:[#allocation3 + $0x10] sm:$0xff] }
 0x5e4   : > { %1883 = vst.msk [vmem:[#allocation3 + $0x38] sm:$0xff] %vm1875_vm1, %v1842_v35 }
 0x5ec   : > { %v3138_v10 = vpop.permute.xlu2 %3137 }
 0x5f4   : > { %v1846_v20 = vpop.permute.xlu2 %1845 }
 0x5f5   : > { %1885 = vst.msk [vmem:[#allocation3 + $0x48] sm:$0xff] %vm1875_vm1, %v1846_v20 }
 0x5f6   : > { %v2487_v54 = vpop.permute.xlu0 %2486 }
 0x5f7   : > { %2531 = vst.msk [vmem:[#allocation3 + $0x20] sm:$0xff] %vm2526_vm2, %v2487_v54 }
 0x5f8   : > { %3182 = vst.msk [vmem:[#allocation3 + $0x20] sm:$0xff] %vm3177_vm3, %v3138_v10 }
 0x5fc   : > { %v3142_v30 = vpop.permute.xlu2 %3141 }
 0x5fe   : > { %v3136_v57 = vpop.permute.xlu0 %3135  ;;  %v2489_v40 = vpop.permute.xlu1 %2488 }
 0x5ff   : > { %3181 = vst.msk [vmem:[#allocation3 + $0x18] sm:$0xff] %vm3177_vm3, %v3136_v57  ;;  %v3246_v46 = vld [vmem:[#allocation3 + $0x20] sm:$0xff] }
 0x600   : > { %2532 = vst.msk [vmem:[#allocation3 + $0x28] sm:$0xff] %vm2526_vm2, %v2489_v40 }
 0x604   : > { %v1850_v33 = vpop.permute.xlu2 %1849 }
 0x605   : > { %1887 = vst.msk [vmem:[#allocation3 + $0x58] sm:$0xff] %vm1875_vm1, %v1850_v33 }
 0x606   : > { %v3245_v2 = vld [vmem:[#allocation3 + $0x18] sm:$0xff] }
 0x607   : > { %v3259_v34 = vpack.c.bf16 %v3245_v2, %v3244_v31 }
 0x609   : > { %3347 = vmatmul.bf16.vlgmr.msra.gmra.mxu3 %v3259_v34 }
 0x60c   : > { %v3146_v11 = vpop.permute.xlu2 %3145 }
 0x614   : > { %v1854_v43 = vpop.permute.xlu2 %1853 }
 0x615   : > { %1889 = vst.msk [vmem:[#allocation3 + $0x68] sm:$0xff] %vm1875_vm1, %v1854_v43  ;;  %v2491_v5 = vpop.permute.xlu0 %2490 }
 0x616   : > { %2533 = vst.msk [vmem:[#allocation3 + $0x30] sm:$0xff] %vm2526_vm2, %v2491_v5 }
 0x617   : > { %v3103_v9 = vpop.f32.mrf.mxu2  ;;  %3184 = vst.msk [vmem:[#allocation3 + $0x30] sm:$0xff] %vm3177_vm3, %v3142_v30 }
 0x618   : > { %3153 = vrot.lane.b32.xlu2 %v3103_v9, %s4867_s8 }
 0x61a   : > { %v2452_v42 = vpop.f32.mrf.mxu0 }
 0x61b   : > { %2502 = vrot.lane.b32.xlu0 %v2452_v42, %s4866_s27 }
 0x61c   : > { %v3150_v52 = vpop.permute.xlu2 %3149 }
 0x61d   : > { %v3140_v51 = vpop.permute.xlu0 %3139  ;;  %v2493_v4 = vpop.permute.xlu1 %2492 }
 0x61e   : > { %3183 = vst.msk [vmem:[#allocation3 + $0x28] sm:$0xff] %vm3177_vm3, %v3140_v51  ;;  %v3248_v15 = vld [vmem:[#allocation3 + $0x30] sm:$0xff] }
 0x61f   : > { %v3105_v50 = vpop.f32.mrf.mxu2  ;;  %2534 = vst.msk [vmem:[#allocation3 + $0x38] sm:$0xff] %vm2526_vm2, %v2493_v4 }
 0x620   : > { %1829 = vrot.lane.b32.xlu2 %v6124_v44, %s4868_s26 }
 0x622   : > { %v2454_v48 = vpop.f32.mrf.mxu0 }
 0x623   : > { %3151 = vrot.lane.b32.xlu0 %v3100_v17, %s4867_s8  ;;  %2504 = vrot.lane.b32.xlu1 %v2454_v48, %s4866_s27 }
 0x624   : > { %v1858_v39 = vpop.permute.xlu2 %1857 }
 0x625   : > { %1891 = vst.msk [vmem:[#allocation3 + $0x78] sm:$0xff] %vm1875_vm1, %v1858_v39  ;;  %v2495_v41 = vpop.permute.xlu0 %2494  ;;  %v1844_v23 = vpop.permute.xlu1 %1843  ;;  %v3247_v60 = vld [vmem:[#allocation3 + $0x28] sm:$0xff] }
 0x626   : > { %1884 = vst.msk [vmem:[#allocation3 + $0x40] sm:$0xff] %vm1875_vm1, %v1844_v23  ;;  %v3260_v63 = vpack.c.bf16 %v3247_v60, %v3246_v46 }
 0x627   : > { %v3108_v14 = vpop.f32.mrf.mxu2  ;;  %2535 = vst.msk [vmem:[#allocation3 + $0x40] sm:$0xff] %vm2526_vm2, %v2495_v41 }
 0x628   : > { %3157 = vrot.lane.b32.xlu2 %v3108_v14, %s4867_s8  ;;  %3186 = vst.msk [vmem:[#allocation3 + $0x40] sm:$0xff] %vm3177_vm3, %v3146_v11  ;;  %3352 = vmatmul.bf16.gmra.mxu3 %v3260_v63 }
 0x62b   : > { %1855 = vrot.lane.b32.xlu1 %v6236_v32, %s4868_s26 }
 0x62d   : > { %v3144_v44 = vpop.permute.xlu0 %3143  ;;  %v2497_v18 = vpop.permute.xlu1 %2496 }
 0x62e   : > { %3185 = vst.msk [vmem:[#allocation3 + $0x38] sm:$0xff] %vm3177_vm3, %v3144_v44 }
 0x62f   : > { %2536 = vst.msk [vmem:[#allocation3 + $0x48] sm:$0xff] %vm2526_vm2, %v2497_v18  ;;  %v3250_v58 = vld [vmem:[#allocation3 + $0x40] sm:$0xff]  ;;  %v3110_v21 = vpop.f32.mrf.mxu2 }
 0x630   : > { %3129 = vrot.lane.b32.xlu2 %v6242_v8, %s4867_s8 }
 0x631   : > { %v2457_v55 = vpop.f32.mrf.mxu0 }
 0x632   : > { %2506 = vrot.lane.b32.xlu0 %v2457_v55, %s4866_s27 }
 0x635   : > { %v1848_v47 = vpop.permute.xlu1 %1847  ;;  %v2499_v49 = vpop.permute.xlu0 %2498  ;;  %v3249_v7 = vld [vmem:[#allocation3 + $0x38] sm:$0xff] }
 0x636   : > { %1886 = vst.msk [vmem:[#allocation3 + $0x50] sm:$0xff] %vm1875_vm1, %v1848_v47  ;;  %v3261_v12 = vpack.c.bf16 %v3249_v7, %v3248_v15 }
 0x637   : > { %2537 = vst.msk [vmem:[#allocation3 + $0x50] sm:$0xff] %vm2526_vm2, %v2499_v49 }
 0x638   : > { %3188 = vst.msk [vmem:[#allocation3 + $0x50] sm:$0xff] %vm3177_vm3, %v3150_v52  ;;  %3357 = vmatmul.bf16.gmra.mxu3 %v3261_v12 }
 0x639   : > { %v2459_v32 = vpop.f32.mrf.mxu0 }
 0x63a   : > { %3155 = vrot.lane.b32.xlu0 %v3105_v50, %s4867_s8  ;;  %2508 = vrot.lane.b32.xlu1 %v2459_v32, %s4866_s27 }
 0x63d   : > { %v3148_v8 = vpop.permute.xlu0 %3147  ;;  %v2501_v19 = vpop.permute.xlu1 %2500 }
 0x63e   : > { %3187 = vst.msk [vmem:[#allocation3 + $0x48] sm:$0xff] %vm3177_vm3, %v3148_v8 }
 0x63f   : > { %2538 = vst.msk [vmem:[#allocation3 + $0x58] sm:$0xff] %vm2526_vm2, %v2501_v19  ;;  %v3252_v53 = vld [vmem:[#allocation3 + $0x50] sm:$0xff] }
 0x642   : > { %2478 = vrot.lane.b32.xlu0 %v6211_v28, %s4866_s27  ;;  %1827 = vrot.lane.b32.xlu1 %v6115_v38, %s4868_s26  ;;  %v6358_v38 = vld [vmem:[%s6473_s4] ss:$0 sm:$0xff] }
 0x645   : > { %v1852_v26 = vpop.permute.xlu1 %1851  ;;  %v3251_v22 = vld [vmem:[#allocation3 + $0x48] sm:$0xff] }
 0x646   : > { %1888 = vst.msk [vmem:[#allocation3 + $0x60] sm:$0xff] %vm1875_vm1, %v1852_v26  ;;  %v3262_v62 = vpack.c.bf16 %v3251_v22, %v3250_v58 }
 0x648   : > { %3362 = vmatmul.bf16.gmra.mxu3 %v3262_v62 }
 0x64a   : > { %2480 = vrot.lane.b32.xlu1 %v6222_v45, %s4866_s27  ;;  %3159 = vrot.lane.b32.xlu0 %v3110_v21, %s4867_s8  ;;  %s4763_s27 = sshra.s32 %s3437_s12, 4  ;;  %s4764_s27 = int_to_ptr.hbm [resolvable:$true] %s4763_s27 }
 0x64b   : > { %p4770_p11 = scmp.lt.s32.totalorder %s4764_s27, %s6475_s6 }
 0x652   : > { %3131 = vrot.lane.b32.xlu0 %v6245_v59, %s4867_s8  ;;  %s4765_s8 = scalar_lea.hbm %s4764_s27, 128 }
 0x653   : > { %p4766_p1 = scmp.ne.s32.totalorder %s4764_s27, %s4765_s8  ;;  %p4771_p9 = scmp.lt.s32.totalorder %s4769_s9, %s4765_s8 }
 0x655   : > { %p4767_p4 = pnand %p4766_p1, %p4989_p7  ;;  %p4772_p2 = por %p4771_p9, %p4770_p11 }
 0x657   : > { %p4768_p8 = pneg %p4767_p4 }
 0x659   : > { %p4773_p10 = pnand %p4772_p2, %p4768_p8 }
 0x672   : > { %v3154_v28 = vpop.permute.xlu2 %3153 }
 0x67a   : > { %v1830_v61 = vpop.permute.xlu2 %1829 }
 0x67b   : > { %1877 = vst.msk [vmem:[#allocation3 + $0x8] sm:$0xff] %vm1875_vm1, %v1830_v61 }
 0x682   : > { %v3158_v24 = vpop.permute.xlu2 %3157 }
 0x68a   : > { %v3130_v31 = vpop.permute.xlu2 %3129 }
 0x68c   : > { %v3348_v16 = vpop.f32.mrf.mxu3 }
 0x68d   : > { %v3349_v1 = vadd.f32 %v6358_v38, %v3348_v16  ;;  %v2503_v29 = vpop.permute.xlu0 %2502 }
 0x68e   : > { %2539 = vst.msk [vmem:[#allocation3 + $0x60] sm:$0xff] %vm2526_vm2, %v2503_v29 }
 0x68f   : > { %3385 = vst [vmem:[%s6363_s18 + $0x10] sm:$0xff] %v3349_v1 }
 0x690   : > { %3190 = vst.msk [vmem:[#allocation3 + $0x60] sm:$0xff] %vm3177_vm3, %v3154_v28 }
 0x694   : > { %v3350_v45 = vpop.f32.mrf.mxu3 }
 0x695   : > { %v3351_v59 = vadd.f32 %v6358_v38, %v3350_v45  ;;  %v3152_v27 = vpop.permute.xlu0 %3151  ;;  %v2505_v6 = vpop.permute.xlu1 %2504 }
 0x696   : > { %3189 = vst.msk [vmem:[#allocation3 + $0x58] sm:$0xff] %vm3177_vm3, %v3152_v27 }
 0x697   : > { %3386 = vst [vmem:[%s6363_s18 + $0x18] sm:$0xff] %v3351_v59  ;;  %v3254_v57 = vld [vmem:[#allocation3 + $0x60] sm:$0xff] }
 0x698   : > { %2540 = vst.msk [vmem:[#allocation3 + $0x68] sm:$0xff] %vm2526_vm2, %v2505_v6 }
 0x69d   : > { %v1856_v25 = vpop.permute.xlu1 %1855  ;;  %v3253_v0 = vld [vmem:[#allocation3 + $0x58] sm:$0xff] }
 0x69e   : > { %1890 = vst.msk [vmem:[#allocation3 + $0x70] sm:$0xff] %vm1875_vm1, %v1856_v25  ;;  %v3263_v56 = vpack.c.bf16 %v3253_v0, %v3252_v53 }
 0x6a0   : > { %3367 = vmatmul.bf16.gmra.mxu3 %v3263_v56 }
 0x6a4   : > { %v2507_v3 = vpop.permute.xlu0 %2506 }
 0x6a5   : > { %2541 = vst.msk [vmem:[#allocation3 + $0x70] sm:$0xff] %vm2526_vm2, %v2507_v3 }
 0x6a6   : > { %3192 = vst.msk [vmem:[#allocation3 + $0x70] sm:$0xff] %vm3177_vm3, %v3158_v24 }
 0x6ab   : > { %v3353_v13 = vpop.f32.mrf.mxu3 }
 0x6ac   : > { %v3354_v36 = vadd.f32 %v6358_v38, %v3353_v13  ;;  %v3156_v35 = vpop.permute.xlu0 %3155  ;;  %v2509_v37 = vpop.permute.xlu1 %2508 }
 0x6ad   : > { %3191 = vst.msk [vmem:[#allocation3 + $0x68] sm:$0xff] %vm3177_vm3, %v3156_v35  ;;  %v3256_v42 = vld [vmem:[#allocation3 + $0x70] sm:$0xff] }
 0x6ae   : > { %3387 = vst [vmem:[%s6363_s18 + $0x20] sm:$0xff] %v3354_v36 }
 0x6af   : > { %2542 = vst.msk [vmem:[#allocation3 + $0x78] sm:$0xff] %vm2526_vm2, %v2509_v37 }
 0x6b3   : > { %v3355_v10 = vpop.f32.mrf.mxu3 }
 0x6b4   : > { %v3356_v20 = vadd.f32 %v6358_v38, %v3355_v10  ;;  %v2479_v54 = vpop.permute.xlu0 %2478  ;;  %v1828_v30 = vpop.permute.xlu1 %1827  ;;  %v3255_v40 = vld [vmem:[#allocation3 + $0x68] sm:$0xff] }
 0x6b5   : > { %1876 = vst.msk [vmem:[#allocation3] sm:$0xff] %vm1875_vm1, %v1828_v30  ;;  %v3264_v33 = vpack.c.bf16 %v3255_v40, %v3254_v57 }
 0x6b6   : > { %3388 = vst [vmem:[%s6363_s18 + $0x28] sm:$0xff] %v3356_v20 }
 0x6b7   : > { %2527 = vst.msk [vmem:[#allocation3] sm:$0xff] %vm2526_vm2, %v2479_v54  ;;  %3372 = vmatmul.bf16.gmra.mxu3 %v3264_v33 }
 0x6b8   : > { %3178 = vst.msk [vmem:[#allocation3] sm:$0xff] %vm3177_vm3, %v3130_v31 }
 0x6bb   : > { %v3358_v2 = vpop.f32.mrf.mxu3 }
 0x6bc   : > { %v3359_v34 = vadd.f32 %v6358_v38, %v3358_v2  ;;  %v2481_v11 = vpop.permute.xlu1 %2480  ;;  %v3160_v17 = vpop.permute.xlu0 %3159 }
 0x6bd   : > { %2528 = vst.msk [vmem:[#allocation3 + $0x8] sm:$0xff] %vm2526_vm2, %v2481_v11 }
 0x6be   : > { %3389 = vst [vmem:[%s6363_s18 + $0x30] sm:$0xff] %v3359_v34 }
 0x6bf   : > { %3193 = vst.msk [vmem:[#allocation3 + $0x78] sm:$0xff] %vm3177_vm3, %v3160_v17  ;;  %v3242_v48 = vld [vmem:[#allocation3] sm:$0xff] }
 0x6c3   : > { %v3360_v43 = vpop.f32.mrf.mxu3 }
 0x6c4   : > { %v3361_v5 = vadd.f32 %v6358_v38, %v3360_v43  ;;  %v3132_v9 = vpop.permute.xlu0 %3131 }
 0x6c5   : > { %3179 = vst.msk [vmem:[#allocation3 + $0x8] sm:$0xff] %vm3177_vm3, %v3132_v9 }
 0x6c6   : > { %3390 = vst [vmem:[%s6363_s18 + $0x38] sm:$0xff] %v3361_v5  ;;  %v3257_v52 = vld [vmem:[#allocation3 + $0x78] sm:$0xff] }
 0x6c7   : > { %v3265_v51 = vpack.c.bf16 %v3257_v52, %v3256_v42 }
 0x6c9   : > { %3377 = vmatmul.bf16.gmra.mxu3 %v3265_v51 }
 0x6cb   : > { %v3363_v4 = vpop.f32.mrf.mxu3 }
 0x6cc   : > { %v3364_v50 = vadd.f32 %v6358_v38, %v3363_v4  ;;  %v3243_v39 = vld [vmem:[#allocation3 + $0x8] sm:$0xff] }
 0x6cd   : > { %v3258_v41 = vpack.c.bf16 %v3243_v39, %v3242_v48 }
 0x6ce   : > { %3391 = vst [vmem:[%s6363_s18 + $0x40] sm:$0xff] %v3364_v50 }
 0x6cf   : > { %3342 = vmatmul.bf16.vlgmr.msrb.gmra.mxu0 %v3258_v41 }
 0x6d3   : > { %v3365_v23 = vpop.f32.mrf.mxu3 }
 0x6d4   : > { %v3366_v46 = vadd.f32 %v6358_v38, %v3365_v23 }
 0x6d6   : > { %3392 = vst [vmem:[%s6363_s18 + $0x48] sm:$0xff] %v3366_v46 }
 0x6d7   : > { %4776 = shalt.err (!%p4773_p10)
}
 0x6d8   : > { %s4869_s30 = smov 128   ;;  %s4870_s20 = smov 8  }
 0x6d9   : > { %4294 = dma.vmem_to_hbm [thread:$0]  (%p4989_p7), %s3435_s17, 2048, %s3437_s12, %s3405_s13, %s4869_s30, %s4869_s30, %s4870_s20  }
 0x6da   : > { %s3416_s11 = scalar_lea.hbm %s6474_s5, %s4269_s19  ;;  %s3417_s29 = sshll.u32 %s6363_s18, 4  ;;  %s3418_s29 = int_to_ptr.vmem [resolvable:$true] %s3417_s29 }
 0x6db   : > { %s3419_s17 = sshll.u32 %s3416_s11, 4  ;;  %s3400_s12 = scalar_lea.sflag [#allocation6], %s5017_s16  ;;  %s3420_s17 = int_to_ptr.hbm [resolvable:$true] %s3419_s17 }
 0x6dc   : > { %s4791_s13 = sshra.s32 %s3420_s17, 4  ;;  %s4797_s8 = scalar_lea.hbm %s6474_s5, 256  ;;  %s4792_s13 = int_to_ptr.hbm [resolvable:$true] %s4791_s13 }
 0x6dd   : > { %s4793_s25 = scalar_lea.hbm %s4792_s13, 128  ;;  %p4798_p3 = scmp.lt.s32.totalorder %s4792_s13, %s6474_s5 }
 0x6de   : > { %p4794_p12 = scmp.ne.s32.totalorder %s4792_s13, %s4793_s25  ;;  %p4799_p5 = scmp.lt.s32.totalorder %s4797_s8, %s4793_s25 }
 0x6e0   : > { %p4795_p13 = pnand %p4794_p12, %p4989_p7  ;;  %p4800_p1 = por %p4799_p5, %p4798_p3 }
 0x6e2   : > { %p4796_p0 = pneg %p4795_p13 }
 0x6e4   : > { %p4801_p4 = pnand %p4800_p1, %p4796_p0 }
 0x723   : > { %v3368_v60 = vpop.f32.mrf.mxu3 }
 0x724   : > { %v3369_v14 = vadd.f32 %v6358_v38, %v3368_v60 }
 0x726   : > { %3393 = vst [vmem:[%s6363_s18 + $0x50] sm:$0xff] %v3369_v14 }
 0x72b   : > { %v3370_v63 = vpop.f32.mrf.mxu3 }
 0x72c   : > { %v3371_v44 = vadd.f32 %v6358_v38, %v3370_v63 }
 0x72e   : > { %3394 = vst [vmem:[%s6363_s18 + $0x58] sm:$0xff] %v3371_v44 }
 0x73a   : > { %v3373_v18 = vpop.f32.mrf.mxu3 }
 0x73b   : > { %v3374_v55 = vadd.f32 %v6358_v38, %v3373_v18 }
 0x73d   : > { %3395 = vst [vmem:[%s6363_s18 + $0x60] sm:$0xff] %v3374_v55 }
 0x742   : > { %v3375_v47 = vpop.f32.mrf.mxu3 }
 0x743   : > { %v3376_v49 = vadd.f32 %v6358_v38, %v3375_v47 }
 0x745   : > { %3396 = vst [vmem:[%s6363_s18 + $0x68] sm:$0xff] %v3376_v49 }
 0x74c   : > { %v3378_v15 = vpop.f32.mrf.mxu3  ;;  %v3343_v7 = vpop.f32.mrf.mxu0 }
 0x74d   : > { %v3379_v12 = vadd.f32 %v6358_v38, %v3378_v15  ;;  %v3344_v32 = vadd.f32 %v6358_v38, %v3343_v7 }
 0x74f   : > { %3397 = vst [vmem:[%s6363_s18 + $0x70] sm:$0xff] %v3379_v12 }
 0x750   : > { %3383 = vst [vmem:[%s6363_s18] sm:$0xff] %v3344_v32 }
 0x754   : > { %v3380_v8 = vpop.f32.mrf.mxu3  ;;  %v3345_v19 = vpop.f32.mrf.mxu0 }
 0x755   : > { %v3381_v26 = vadd.f32 %v6358_v38, %v3380_v8  ;;  %v3346_v58 = vadd.f32 %v6358_v38, %v3345_v19 }
 0x757   : > { %3398 = vst [vmem:[%s6363_s18 + $0x78] sm:$0xff] %v3381_v26 }
 0x758   : > { %3384 = vst [vmem:[%s6363_s18 + $0x8] sm:$0xff] %v3346_v58 }
 0x759   : > { %4804 = shalt.err (!%p4801_p4)
}
 0x75a   : > { %4293 = dma.vmem_to_hbm [thread:$0]  (%p4989_p7), %s3418_s29, 2048, %s3420_s17, %s3400_s12, %s4869_s30, %s4869_s30, %s4870_s20  }
 0x75b PF: > { %s3451_s16 = sand.u32 1, %s4843_s21   ;;  %p6549_p8 = scmp.ge.s32.totalorder %s4855_s24, 2 }
 0x75c   : > { %s3452_s18 = scalar_lea.sflag [#allocation6], %s3451_s16 }
 0x75d   : > { %p4312_p11 = pnand %p6549_p8, %p4941_p6 }
 0x75f   : > { %p4313_p9 = pneg %p4312_p11 }
 0x761   : > { %4834 = dma.done.wait (%p4313_p9), %s3452_s18, 2048  }
 0x762   : > { %4836 = vsyncadd (%p4313_p9), %s3452_s18, 4294965248  ;;  %s3462_s9 = scalar_lea.sflag [#allocation14], %s3451_s16 }
 0x763   : > { %4838 = dma.done.wait (%p4313_p9), %s3462_s9, 2048  }
 0x764   : > { %4840 = vsyncadd (%p4313_p9), %s3462_s9, 4294965248  ;;  %p25_p7 = scmp.ge.s32.totalorder %s4975_s10, 4   ;;  %s6550_s21 = smov %s4847_s22 }
 0x765   : > { %s6551_s22 = smov %s4851_s23  ;;  %s6552_s23 = smov %s4985_s14 }
 0x766   : > { %s6553_s24 = smov %s4975_s10  ;;  %27 = sbr.rel (!%p25_p7) target bundleno = 12 (0xc), region = 114 }
 0x76b   :  { %3468 = vsyncpa [#allocation5], 1 }
 0x76c   :  { %3470 = vsyncpa [#allocation5 + $0x1], 1 }
 0x76d   :  { %3471 = vsyncpa [#allocation8], 1 }
 0x76e   :  { %3472 = vsyncpa [#allocation11], 1 }
 0x76f   :  { %3473 = vsyncpa [#allocation6], 1 }
 0x770   :  { %3475 = vsyncpa [#allocation6 + $0x1], 1 }
 0x771   :  { %3476 = vsyncpa [#allocation14], 1 }
 0x772   :  { %3478 = vsyncpa [#allocation14 + $0x1], 1 }

</bundles_post_ra>
